<compile_context>
chip_gen: v7x
topology: tpu7x:2x2x1
jax: 0.10.0
libtpu: 0.0.40
codegen_flags: <defaults>
</compile_context>

<pallas_src>
import functools
import math

import jax
import jax.numpy as jnp
from jax import lax
from jax.experimental import pallas as pl
from jax.experimental.pallas import tpu as pltpu


_T_CHUNK = 32  # timesteps per grid step (clamped to the padded sequence length)


def _bilstm_chunk_kernel(maxlen_ref,                            # SMEM (1,) int32
                         gx_ref, len_ref, whh_ref, h0_ref, c0_ref,
                         out_ref, hn_ref, cn_ref,
                         h_s, c_s,
                         *, t_chunk, l_pad, hidden, unroll):
    """Fused bidirectional LSTM recurrence.  grid = (direction, time-chunk)."""
    d = pl.program_id(0)            # 0 = forward, 1 = backward
    c = pl.program_id(1)            # grid chunk index (processing order)
    nc = pl.num_programs(1)

    # Per-direction initial state at the first chunk.
    @pl.when(c == 0)
    def _():
        h_s[...] = h0_ref[...].astype(jnp.float32)
        c_s[...] = c0_ref[...].astype(jnp.float32)

    # Smallest ORIGINAL timestep touched by this chunk; if >= max(lengths) the
    # whole chunk is padding -> skip all compute and just store zeros.
    t_orig_min = (1 - d) * (c * t_chunk) + d * (l_pad - (c + 1) * t_chunk)
    do_work = t_orig_min < maxlen_ref[0]

    @pl.when(do_work)
    def _():
        lens = len_ref[...]                                  # (B, 1) int32
        w_hh = whh_ref[...]                                  # (H, 4H) bf16

        def step(i, carry):
            h, cc = carry
            # within-chunk position in ORIGINAL time order (reversed for d==1)
            pos = (1 - d) * i + d * (t_chunk - 1 - i)
            # recurrent projection: bf16 MXU matmul, f32 accumulation; gx is
            # streamed in bf16 and widened here.
            gates = gx_ref[pos].astype(jnp.float32) + jnp.dot(
                h.astype(w_hh.dtype), w_hh,
                preferred_element_type=jnp.float32)          # (B, 4H) f32
            # PyTorch gate order i, f, g, o.  For hidden % 128 == 0 these are
            # lane-tile-aligned slices (free); sub-128 hidden (test config)
            # costs XLU shuffles per step.
            ig = jax.nn.sigmoid(gates[:, 0 * hidden:1 * hidden])
            fg = jax.nn.sigmoid(gates[:, 1 * hidden:2 * hidden])
            gg = jnp.tanh(gates[:, 2 * hidden:3 * hidden])
            og = jax.nn.sigmoid(gates[:, 3 * hidden:4 * hidden])
            c_new = fg * cc + ig * gg
            h_new = og * jnp.tanh(c_new)

            # packed-sequence masking on the ORIGINAL timestep
            t_proc = c * t_chunk + i
            t_orig = (1 - d) * t_proc + d * (l_pad - 1 - t_proc)
            valid = t_orig < lens                            # (B, 1) bool
            h = jnp.where(valid, h_new, h)
            cc = jnp.where(valid, c_new, cc)

            # store in ORIGINAL time order; padded positions are exact zeros
            out_ref[pos] = jnp.where(valid, h_new, 0.0).astype(out_ref.dtype)
            return h, cc

        h, cc = lax.fori_loop(0, t_chunk, step, (h_s[...], c_s[...]),
                              unroll=unroll)
        h_s[...] = h
        c_s[...] = cc

    @pl.when(jnp.logical_not(do_work))
    def _():
        out_ref[...] = jnp.zeros_like(out_ref)

    # Final (h, c): masking freezes the state after each sequence's last valid
    # step, so the state after the last chunk is exactly the packed-seq h_n/c_n.
    @pl.when(c == nc - 1)
    def _():
        hn_ref[...] = h_s[...].astype(hn_ref.dtype)
        cn_ref[...] = c_s[...].astype(cn_ref.dtype)


def _input_projection(x, params, l_pad):
    """Hoisted x @ W_ih^T + b for BOTH directions as ONE bf16 MXU matmul.

    Returns gx of shape (l_pad, B, 8H) bf16 in ORIGINAL time order; lanes
    [0,4H) are the forward direction, [4H,8H) the backward direction.
    """
    L, B, D = x.shape
    w_cat = jnp.concatenate([params[0][0], params[1][0]], axis=1)     # (D, 8H)
    b_cat = jnp.concatenate([params[0][2], params[1][2]], axis=0)     # (8H,)
    p = jnp.dot(x.reshape(L * B, D).astype(jnp.bfloat16),
                w_cat.astype(jnp.bfloat16),
                preferred_element_type=jnp.float32) + b_cat           # f32
    p = p.astype(jnp.bfloat16).reshape(L, B, -1)                      # bf16
    return jnp.pad(p, ((0, l_pad - L), (0, 0), (0, 0)))               # (Lp,B,8H)


def _vmem_limit_bytes(t_chunk, B, H):
    """Explicit scoped-VMEM budget (double-buffered operands + scratch)."""
    gx = 2 * t_chunk * B * 4 * H * 2          # bf16 gx chunk, double buffered
    out = 2 * t_chunk * B * H * 4             # f32 per-direction out chunk
    whh = 2 * H * 4 * H * 2                   # bf16 W_hh block
    small = 4 * 2 * B * H * 4 + 2 * B * 4     # h0/c0/hn/cn blocks + lengths
    scratch = 2 * B * H * 4                   # h/c state scratch
    est = gx + out + whh + small + scratch
    # >= 32 MiB helps v5e (16 MiB default); <= 48 MiB stays safe on v7x (64 MiB).
    return int(min(max(2 * est, 32 << 20), 48 << 20))


def bilstm(x, lengths, params, h0, c0, *, t_chunk=_T_CHUNK):
    """Fused bidirectional single-layer LSTM over a padded sequence.

    x: (L, B, D); lengths: (B,); params[d] = (W_ih^T (D,4H), W_hh^T (H,4H),
    bias (4H,)); h0/c0: (2, B, H).  Returns (out (L,B,2H), h_n (2,B,H),
    c_n (2,B,H)) with PyTorch packed-sequence semantics.
    """
    L, B, D = x.shape
    H = h0.shape[-1]
    assert (4 * H) % 128 == 0, "hidden_dim must be a multiple of 32"

    t_chunk = int(min(t_chunk, max(8, -(-L // 8) * 8)))   # clamp to padded len
    unroll = True if t_chunk <= 16 else 8
    nc = pl.cdiv(L, t_chunk)
    l_pad = nc * t_chunk

    gx = _input_projection(x, params, l_pad)                       # (Lp,B,8H) bf16
    w_hh = jnp.stack([params[0][1], params[1][1]], 0).astype(jnp.bfloat16)
    len2d = lengths.reshape(B, 1).astype(jnp.int32)
    max_len = jnp.max(lengths).astype(jnp.int32).reshape(1)

    kernel = functools.partial(_bilstm_chunk_kernel,
                               t_chunk=t_chunk, l_pad=l_pad, hidden=H,
                               unroll=unroll)

    def chunk_idx(d, c):
        # forward processes chunk c; backward processes the mirrored chunk so
        # original-time order is preserved without materializing a flip.
        return (1 - d) * c + d * (nc - 1 - c)

    in_specs = [
        # gx: lane-offset block selects the direction's 4H columns.
        pl.BlockSpec((t_chunk, B, 4 * H),
                     lambda d, c, ml: (chunk_idx(d, c), 0, d)),
        pl.BlockSpec((B, 1), lambda d, c, ml: (0, 0)),
        pl.BlockSpec((None, H, 4 * H), lambda d, c, ml: (d, 0, 0)),
        pl.BlockSpec((None, B, H), lambda d, c, ml: (d, 0, 0)),
        pl.BlockSpec((None, B, H), lambda d, c, ml: (d, 0, 0)),
    ]

    fuse_out = (H % 128 == 0)
    if fuse_out:
        # Fold the fwd/bwd concat into the kernel: both directions write
        # lane-offset H-wide blocks of one (l_pad, B, 2H) buffer.
        seq_shape = jax.ShapeDtypeStruct((l_pad, B, 2 * H), jnp.float32)
        seq_spec = pl.BlockSpec((t_chunk, B, H),
                                lambda d, c, ml: (chunk_idx(d, c), 0, d))
    else:
        # Small-H fallback (keeps block shapes tile-legal); concat in XLA.
        seq_shape = jax.ShapeDtypeStruct((2, l_pad, B, H), jnp.float32)
        seq_spec = pl.BlockSpec((None, t_chunk, B, H),
                                lambda d, c, ml: (d, chunk_idx(d, c), 0, 0))

    grid_spec = pltpu.PrefetchScalarGridSpec(
        num_scalar_prefetch=1,
        grid=(2, nc),
        in_specs=in_specs,
        out_specs=(
            seq_spec,
            pl.BlockSpec((None, B, H), lambda d, c, ml: (d, 0, 0)),
            pl.BlockSpec((None, B, H), lambda d, c, ml: (d, 0, 0)),
        ),
        scratch_shapes=[pltpu.VMEM((B, H), jnp.float32),
                        pltpu.VMEM((B, H), jnp.float32)],
    )

    seq, hn, cn = pl.pallas_call(
        kernel,
        grid_spec=grid_spec,
        out_shape=(seq_shape,
                   jax.ShapeDtypeStruct((2, B, H), jnp.float32),
                   jax.ShapeDtypeStruct((2, B, H), jnp.float32)),
        compiler_params=pltpu.CompilerParams(
            dimension_semantics=("parallel", "arbitrary"),
            vmem_limit_bytes=_vmem_limit_bytes(t_chunk, B, H)),
    )(max_len, gx, len2d, w_hh,
      h0.astype(jnp.float32), c0.astype(jnp.float32))

    if fuse_out:
        out = seq[:L]                                             # (L, B, 2H)
    else:
        out = jnp.concatenate([seq[0, :L], seq[1, :L]], axis=-1)  # (L, B, 2H)
    return out, hn, cn


@jax.jit
def bicond_lstm_forward(txt_e, top_e, txt_l, top_l, topic_params, text_params):
    """Forward pass of BiCondLSTMLayer (num_layers=1, dropout=0)."""
    B = top_e.shape[1]
    H = topic_params[0][1].shape[0]            # W_hh^T is (H, 4H)
    zeros = jnp.zeros((2, B, H), jnp.float32)

    # topic bidirectional LSTM (zero initial state)
    padded_topic_output, last_top_hn, last_top_cn = bilstm(
        top_e, top_l, topic_params, zeros, zeros)

    # text bidirectional LSTM initialized with topic's final (h, c)
    padded_output, txt_last_hn, _ = bilstm(
        txt_e, txt_l, text_params, last_top_hn, last_top_cn)

    # (2, B, H) -> (B, 2, H) -> (B, 2H)
    txt_fw_bw_hn = jnp.transpose(txt_last_hn, (1, 0, 2)).reshape(B, 2 * H)

    return padded_output, txt_fw_bw_hn, last_top_hn, padded_topic_output


def init_bilstm_params(key, input_dim, hidden_dim):
    """Deterministic init matching nn.LSTM shapes: U(-1/sqrt(H), 1/sqrt(H))."""
    k = 1.0 / math.sqrt(hidden_dim)
    params = []
    for _ in range(2):  # forward, reverse directions
        key, k1, k2, k3, k4 = jax.random.split(key, 5)
        w_ih = jax.random.uniform(k1, (4 * hidden_dim, input_dim),
                                  jnp.float32, -k, k)
        w_hh = jax.random.uniform(k2, (4 * hidden_dim, hidden_dim),
                                  jnp.float32, -k, k)
        b_ih = jax.random.uniform(k3, (4 * hidden_dim,), jnp.float32, -k, k)
        b_hh = jax.random.uniform(k4, (4 * hidden_dim,), jnp.float32, -k, k)
        # pre-transpose for x @ W, combine biases (equivalent to b_ih + b_hh)
        params.append((w_ih.T, w_hh.T, b_ih + b_hh))
    return params, key


def _check_packed_semantics(out, hn, lengths, H):
    """In-script consistency checks implied by packed-sequence semantics:
    padded positions are zero; fwd h_n = out at the last valid step (fwd half);
    bwd h_n = out at t=0 (bwd half)."""
    L = out.shape[0]
    B = out.shape[1]
    for b in range(B):
        l = int(lengths[b])
        if l < L:
            assert float(jnp.abs(out[l:, b]).max()) == 0.0
        assert jnp.allclose(out[l - 1, b, :H], hn[0, b], atol=1e-6)
        assert jnp.allclose(out[0, b, H:2 * H], hn[1, b], atol=1e-6)


if __name__ == "__main__":
    # --- main test: small shapes matching the module spec (H=32 fallback path)
    hidden_dim = 32
    text_input_dim = 16
    topic_input_dim = 12
    batch = 2
    L_txt = 8
    L_top = 6

    key = jax.random.PRNGKey(0)
    topic_params, key = init_bilstm_params(key, topic_input_dim, hidden_dim)
    text_params, key = init_bilstm_params(key, text_input_dim, hidden_dim)

    key, kx, kt = jax.random.split(key, 3)
    txt_e = jax.random.normal(kx, (L_txt, batch, text_input_dim), jnp.float32)
    top_e = jax.random.normal(kt, (L_top, batch, topic_input_dim), jnp.float32)
    txt_l = jnp.array([8, 5], dtype=jnp.int32)   # per-sequence valid lengths
    top_l = jnp.array([6, 3], dtype=jnp.int32)

    outs = bicond_lstm_forward(txt_e, top_e, txt_l, top_l,
                               topic_params, text_params)
    outs = jax.block_until_ready(outs)
    padded_output, txt_fw_bw_hn, last_top_hn, padded_topic_output = outs

    assert padded_output.shape == (L_txt, batch, 2 * hidden_dim)
    assert txt_fw_bw_hn.shape == (batch, 2 * hidden_dim)
    assert last_top_hn.shape == (2, batch, hidden_dim)
    assert padded_topic_output.shape == (L_top, batch, 2 * hidden_dim)
    # pad_packed_sequence semantics: padded positions exactly zero
    assert float(jnp.abs(padded_output[5:, 1]).max()) == 0.0
    assert float(jnp.abs(padded_topic_output[3:, 1]).max()) == 0.0
    # h_n consistency with the per-timestep outputs (fwd: last valid step,
    # bwd: t=0), for both the topic LSTM and the conditioned text LSTM.
    _check_packed_semantics(padded_topic_output, last_top_hn, top_l, hidden_dim)
    for b in range(batch):
        l = int(txt_l[b])
        assert jnp.allclose(padded_output[l - 1, b, :hidden_dim],
                            txt_fw_bw_hn[b, :hidden_dim], atol=1e-6)
        assert jnp.allclose(padded_output[0, b, hidden_dim:],
                            txt_fw_bw_hn[b, hidden_dim:], atol=1e-6)

    # --- secondary test: lane-aligned hidden (H=128) exercises the fused
    #     in-kernel (l_pad, B, 2H) output path used at production sizes.
    H2 = 128
    params2, key = init_bilstm_params(key, text_input_dim, H2)
    key, kx2 = jax.random.split(key)
    x2 = jax.random.normal(kx2, (L_txt, batch, text_input_dim), jnp.float32)
    lens2 = jnp.array([8, 5], dtype=jnp.int32)
    zeros2 = jnp.zeros((2, batch, H2), jnp.float32)
    out2, hn2, cn2 = bilstm(x2, lens2, params2, zeros2, zeros2)
    out2, hn2, cn2 = jax.block_until_ready((out2, hn2, cn2))
    assert out2.shape == (L_txt, batch, 2 * H2)
    assert hn2.shape == (2, batch, H2) and cn2.shape == (2, batch, H2)
    _check_packed_semantics(out2, hn2, lens2, H2)

    print("KERNEL_OK")
</pallas_src>

<mosaic_0001>
module attributes {stable_mosaic.version = 11 : i64} {
  func.func @_bilstm_chunk_kernel(%arg0: i32, %arg1: i32, %arg2: memref<1xi32, #tpu.memory_space<smem>>, %arg3: memref<8x2x128xbf16, #tpu.memory_space<vmem>>, %arg4: memref<2x1xi32, #tpu.memory_space<vmem>>, %arg5: memref<1x32x128xbf16, #tpu.memory_space<vmem>>, %arg6: memref<1x2x32xf32, #tpu.memory_space<vmem>>, %arg7: memref<1x2x32xf32, #tpu.memory_space<vmem>>, %arg8: memref<1x8x2x32xf32, #tpu.memory_space<vmem>>, %arg9: memref<1x2x32xf32, #tpu.memory_space<vmem>>, %arg10: memref<1x2x32xf32, #tpu.memory_space<vmem>>, %arg11: memref<2x32xf32, #tpu.memory_space<vmem>>, %arg12: memref<2x32xf32, #tpu.memory_space<vmem>>) attributes {dimension_semantics = [#tpu.dimension_semantics<parallel>, #tpu.dimension_semantics<arbitrary>], iteration_bounds = array<i64: 2, 1>, scalar_prefetch = 1 : i64, scratch_operands = 2 : i64, tpu.core_type = #tpu.core_type<tc>, window_params = [{transform_indices = @transform_0, window_bounds = array<i64: 8, 2, 128>}, {pipeline_mode = #tpu.pipeline_mode<synchronous>, transform_indices = @transform_1, window_bounds = array<i64: 2, 1>}, {transform_indices = @transform_2, window_bounds = array<i64: 1, 32, 128>}, {transform_indices = @transform_3, window_bounds = array<i64: 1, 2, 32>}, {transform_indices = @transform_4, window_bounds = array<i64: 1, 2, 32>}, {transform_indices = @transform_5, window_bounds = array<i64: 1, 8, 2, 32>}, {transform_indices = @transform_6, window_bounds = array<i64: 1, 2, 32>}, {transform_indices = @transform_7, window_bounds = array<i64: 1, 2, 32>}]} {
    %c0_i32 = arith.constant 0 : i32
    %0 = arith.cmpi eq, %arg1, %c0_i32 : i32
    %1 = arith.extui %0 : i1 to i32
    %c0_i32_0 = arith.constant 0 : i32
    %2 = arith.cmpi ne, %1, %c0_i32_0 : i32
    scf.if %2 {
      %c0_8 = arith.constant 0 : index
      %c0_9 = arith.constant 0 : index
      %c0_10 = arith.constant 0 : index
      %21 = vector.load %arg6[%c0_8, %c0_9, %c0_10] : memref<1x2x32xf32, #tpu.memory_space<vmem>>, vector<1x2x32xf32>
      %22 = vector.shape_cast %21 : vector<1x2x32xf32> to vector<2x32xf32>
      %c0_11 = arith.constant 0 : index
      %c0_12 = arith.constant 0 : index
      %23 = vector.load %arg11[%c0_11, %c0_12] : memref<2x32xf32, #tpu.memory_space<vmem>>, vector<2x32xf32>
      tpu.vector_store %arg11[%c0_11, %c0_12], %22 {strides = array<i32>} : memref<2x32xf32, #tpu.memory_space<vmem>>, vector<2x32xf32>,
      %c0_13 = arith.constant 0 : index
      %c0_14 = arith.constant 0 : index
      %c0_15 = arith.constant 0 : index
      %24 = vector.load %arg7[%c0_13, %c0_14, %c0_15] : memref<1x2x32xf32, #tpu.memory_space<vmem>>, vector<1x2x32xf32>
      %25 = vector.shape_cast %24 : vector<1x2x32xf32> to vector<2x32xf32>
      %c0_16 = arith.constant 0 : index
      %c0_17 = arith.constant 0 : index
      %26 = vector.load %arg12[%c0_16, %c0_17] : memref<2x32xf32, #tpu.memory_space<vmem>>, vector<2x32xf32>
      tpu.vector_store %arg12[%c0_16, %c0_17], %25 {strides = array<i32>} : memref<2x32xf32, #tpu.memory_space<vmem>>, vector<2x32xf32>,
    } else {
    }
    %c1_i32 = arith.constant 1 : i32
    %3 = arith.subi %c1_i32, %arg0 : i32
    %c8_i32 = arith.constant 8 : i32
    %4 = arith.muli %arg1, %c8_i32 : i32
    %5 = arith.muli %3, %4 : i32
    %c1_i32_1 = arith.constant 1 : i32
    %6 = arith.addi %arg1, %c1_i32_1 : i32
    %c8_i32_2 = arith.constant 8 : i32
    %7 = arith.muli %6, %c8_i32_2 : i32
    %c8_i32_3 = arith.constant 8 : i32
    %8 = arith.subi %c8_i32_3, %7 : i32
    %9 = arith.muli %arg0, %8 : i32
    %10 = arith.addi %5, %9 : i32
    %c0 = arith.constant 0 : index
    %11 = memref.load %arg2[%c0] : memref<1xi32, #tpu.memory_space<smem>>
    %12 = arith.cmpi slt, %10, %11 : i32
    %13 = arith.extui %12 : i1 to i32
    %c0_i32_4 = arith.constant 0 : i32
    %14 = arith.cmpi ne, %13, %c0_i32_4 : i32
    scf.if %14 {
      %c0_8 = arith.constant 0 : index
      %c0_9 = arith.constant 0 : index
      %21 = vector.load %arg4[%c0_8, %c0_9] : memref<2x1xi32, #tpu.memory_space<vmem>>, vector<2x1xi32>
      %c0_10 = arith.constant 0 : index
      %c0_11 = arith.constant 0 : index
      %c0_12 = arith.constant 0 : index
      %22 = vector.load %arg5[%c0_10, %c0_11, %c0_12] : memref<1x32x128xbf16, #tpu.memory_space<vmem>>, vector<1x32x128xbf16>
      %23 = vector.shape_cast %22 : vector<1x32x128xbf16> to vector<32x128xbf16>
      %c0_13 = arith.constant 0 : index
      %c0_14 = arith.constant 0 : index
      %24 = vector.load %arg11[%c0_13, %c0_14] : memref<2x32xf32, #tpu.memory_space<vmem>>, vector<2x32xf32>
      %c0_15 = arith.constant 0 : index
      %c0_16 = arith.constant 0 : index
      %25 = vector.load %arg12[%c0_15, %c0_16] : memref<2x32xf32, #tpu.memory_space<vmem>>, vector<2x32xf32>
      %c0_i32_17 = arith.constant 0 : i32
      %c1_i32_18 = arith.constant 1 : i32
      %26 = arith.subi %c1_i32_18, %arg0 : i32
      %27 = arith.muli %26, %c0_i32_17 : i32
      %c7_i32 = arith.constant 7 : i32
      %28 = arith.subi %c7_i32, %c0_i32_17 : i32
      %29 = arith.muli %arg0, %28 : i32
      %30 = arith.addi %27, %29 : i32
      %31 = arith.index_cast %30 : i32 to index
      %c0_19 = arith.constant 0 : index
      %c0_20 = arith.constant 0 : index
      %32 = vector.load %arg3[%31, %c0_19, %c0_20] : memref<8x2x128xbf16, #tpu.memory_space<vmem>>, vector<1x2x128xbf16>
      %33 = vector.shape_cast %32 : vector<1x2x128xbf16> to vector<2x128xbf16>
      %34 = arith.extf %33 : vector<2x128xbf16> to vector<2x128xf32>
      %35 = arith.truncf %24 : vector<2x32xf32> to vector<2x32xbf16>
      %cst = arith.constant dense<0.000000e+00> : vector<2x128xf32>
      %36 = tpu.matmul %35, %23, %cst {dimension_numbers = #tpu.dot_dimension_numbers<[1], [0], [0], [1], [0, 0, 1, 1], [], []>} : vector<2x32xbf16>, vector<32x128xbf16>, vector<2x128xf32> -> vector<2x128xf32>
      %37 = arith.addf %34, %36 : vector<2x128xf32>
      %38 = vector.extract_strided_slice %37 {offsets = [0, 0], sizes = [2, 32], strides = [1, 1]} : vector<2x128xf32> to vector<2x32xf32>
      %39 = arith.negf %38 : vector<2x32xf32>
      %40 = math.exp %39 : vector<2x32xf32>
      %cst_21 = arith.constant 1.000000e+00 : f32
      %41 = vector.broadcast %cst_21 : f32 to vector<2x32xf32>
      %42 = arith.addf %41, %40 : vector<2x32xf32>
      %43 = arith.divf %41, %42 : vector<2x32xf32>
      %44 = vector.extract_strided_slice %37 {offsets = [0, 32], sizes = [2, 32], strides = [1, 1]} : vector<2x128xf32> to vector<2x32xf32>
      %45 = arith.negf %44 : vector<2x32xf32>
      %46 = math.exp %45 : vector<2x32xf32>
      %cst_22 = arith.constant 1.000000e+00 : f32
      %47 = vector.broadcast %cst_22 : f32 to vector<2x32xf32>
      %48 = arith.addf %47, %46 : vector<2x32xf32>
      %49 = arith.divf %47, %48 : vector<2x32xf32>
      %50 = vector.extract_strided_slice %37 {offsets = [0, 64], sizes = [2, 32], strides = [1, 1]} : vector<2x128xf32> to vector<2x32xf32>
      %51 = math.tanh %50 : vector<2x32xf32>
      %52 = vector.extract_strided_slice %37 {offsets = [0, 96], sizes = [2, 32], strides = [1, 1]} : vector<2x128xf32> to vector<2x32xf32>
      %53 = arith.negf %52 : vector<2x32xf32>
      %54 = math.exp %53 : vector<2x32xf32>
      %cst_23 = arith.constant 1.000000e+00 : f32
      %55 = vector.broadcast %cst_23 : f32 to vector<2x32xf32>
      %56 = arith.addf %55, %54 : vector<2x32xf32>
      %57 = arith.divf %55, %56 : vector<2x32xf32>
      %58 = arith.mulf %49, %25 : vector<2x32xf32>
      %59 = arith.mulf %43, %51 : vector<2x32xf32>
      %60 = arith.addf %58, %59 : vector<2x32xf32>
      %61 = math.tanh %60 : vector<2x32xf32>
      %62 = arith.mulf %57, %61 : vector<2x32xf32>
      %c8_i32_24 = arith.constant 8 : i32
      %63 = arith.muli %arg1, %c8_i32_24 : i32
      %64 = arith.addi %63, %c0_i32_17 : i32
      %c1_i32_25 = arith.constant 1 : i32
      %65 = arith.subi %c1_i32_25, %arg0 : i32
      %66 = arith.muli %65, %64 : i32
      %c7_i32_26 = arith.constant 7 : i32
      %67 = arith.subi %c7_i32_26, %64 : i32
      %68 = arith.muli %arg0, %67 : i32
      %69 = arith.addi %66, %68 : i32
      %70 = vector.broadcast %69 : i32 to vector<2x1xi32>
      %71 = arith.cmpi slt, %70, %21 : vector<2x1xi32>
      %72 = vector.shape_cast %71 : vector<2x1xi1> to vector<2x1xi1>
      %73 = vector.broadcast %72 : vector<2x1xi1> to vector<2x32xi1>
      %74 = arith.select %73, %62, %24 : vector<2x32xi1>, vector<2x32xf32>
      %75 = vector.shape_cast %71 : vector<2x1xi1> to vector<2x1xi1>
      %76 = vector.broadcast %75 : vector<2x1xi1> to vector<2x32xi1>
      %77 = arith.select %76, %60, %25 : vector<2x32xi1>, vector<2x32xf32>
      %cst_27 = arith.constant 0.000000e+00 : f32
      %78 = vector.shape_cast %71 : vector<2x1xi1> to vector<2x1xi1>
      %79 = vector.broadcast %78 : vector<2x1xi1> to vector<2x32xi1>
      %80 = vector.broadcast %cst_27 : f32 to vector<2x32xf32>
      %81 = arith.select %79, %62, %80 : vector<2x32xi1>, vector<2x32xf32>
      %c0_28 = arith.constant 0 : index
      %82 = arith.index_cast %30 : i32 to index
      %c0_29 = arith.constant 0 : index
      %c0_30 = arith.constant 0 : index
      %83 = vector.load %arg8[%c0_28, %82, %c0_29, %c0_30] : memref<1x8x2x32xf32, #tpu.memory_space<vmem>>, vector<1x1x2x32xf32>
      %84 = vector.shape_cast %83 : vector<1x1x2x32xf32> to vector<2x32xf32>
      %85 = vector.shape_cast %81 : vector<2x32xf32> to vector<1x1x2x32xf32>
      tpu.vector_store %arg8[%c0_28, %82, %c0_29, %c0_30], %85 {strides = array<i32>} : memref<1x8x2x32xf32, #tpu.memory_space<vmem>>, vector<1x1x2x32xf32>,
      %c1_i32_31 = arith.constant 1 : i32
      %c1_i32_32 = arith.constant 1 : i32
      %86 = arith.subi %c1_i32_32, %arg0 : i32
      %87 = arith.muli %86, %c1_i32_31 : i32
      %c7_i32_33 = arith.constant 7 : i32
      %88 = arith.subi %c7_i32_33, %c1_i32_31 : i32
      %89 = arith.muli %arg0, %88 : i32
      %90 = arith.addi %87, %89 : i32
      %91 = arith.index_cast %90 : i32 to index
      %c0_34 = arith.constant 0 : index
      %c0_35 = arith.constant 0 : index
      %92 = vector.load %arg3[%91, %c0_34, %c0_35] : memref<8x2x128xbf16, #tpu.memory_space<vmem>>, vector<1x2x128xbf16>
      %93 = vector.shape_cast %92 : vector<1x2x128xbf16> to vector<2x128xbf16>
      %94 = arith.extf %93 : vector<2x128xbf16> to vector<2x128xf32>
      %95 = arith.truncf %74 : vector<2x32xf32> to vector<2x32xbf16>
      %cst_36 = arith.constant dense<0.000000e+00> : vector<2x128xf32>
      %96 = tpu.matmul %95, %23, %cst_36 {dimension_numbers = #tpu.dot_dimension_numbers<[1], [0], [0], [1], [0, 0, 1, 1], [], []>} : vector<2x32xbf16>, vector<32x128xbf16>, vector<2x128xf32> -> vector<2x128xf32>
      %97 = arith.addf %94, %96 : vector<2x128xf32>
      %98 = vector.extract_strided_slice %97 {offsets = [0, 0], sizes = [2, 32], strides = [1, 1]} : vector<2x128xf32> to vector<2x32xf32>
      %99 = arith.negf %98 : vector<2x32xf32>
      %100 = math.exp %99 : vector<2x32xf32>
      %cst_37 = arith.constant 1.000000e+00 : f32
      %101 = vector.broadcast %cst_37 : f32 to vector<2x32xf32>
      %102 = arith.addf %101, %100 : vector<2x32xf32>
      %103 = arith.divf %101, %102 : vector<2x32xf32>
      %104 = vector.extract_strided_slice %97 {offsets = [0, 32], sizes = [2, 32], strides = [1, 1]} : vector<2x128xf32> to vector<2x32xf32>
      %105 = arith.negf %104 : vector<2x32xf32>
      %106 = math.exp %105 : vector<2x32xf32>
      %cst_38 = arith.constant 1.000000e+00 : f32
      %107 = vector.broadcast %cst_38 : f32 to vector<2x32xf32>
      %108 = arith.addf %107, %106 : vector<2x32xf32>
      %109 = arith.divf %107, %108 : vector<2x32xf32>
      %110 = vector.extract_strided_slice %97 {offsets = [0, 64], sizes = [2, 32], strides = [1, 1]} : vector<2x128xf32> to vector<2x32xf32>
      %111 = math.tanh %110 : vector<2x32xf32>
      %112 = vector.extract_strided_slice %97 {offsets = [0, 96], sizes = [2, 32], strides = [1, 1]} : vector<2x128xf32> to vector<2x32xf32>
      %113 = arith.negf %112 : vector<2x32xf32>
      %114 = math.exp %113 : vector<2x32xf32>
      %cst_39 = arith.constant 1.000000e+00 : f32
      %115 = vector.broadcast %cst_39 : f32 to vector<2x32xf32>
      %116 = arith.addf %115, %114 : vector<2x32xf32>
      %117 = arith.divf %115, %116 : vector<2x32xf32>
      %118 = arith.mulf %109, %77 : vector<2x32xf32>
      %119 = arith.mulf %103, %111 : vector<2x32xf32>
      %120 = arith.addf %118, %119 : vector<2x32xf32>
      %121 = math.tanh %120 : vector<2x32xf32>
      %122 = arith.mulf %117, %121 : vector<2x32xf32>
      %c8_i32_40 = arith.constant 8 : i32
      %123 = arith.muli %arg1, %c8_i32_40 : i32
      %124 = arith.addi %123, %c1_i32_31 : i32
      %c1_i32_41 = arith.constant 1 : i32
      %125 = arith.subi %c1_i32_41, %arg0 : i32
      %126 = arith.muli %125, %124 : i32
      %c7_i32_42 = arith.constant 7 : i32
      %127 = arith.subi %c7_i32_42, %124 : i32
      %128 = arith.muli %arg0, %127 : i32
      %129 = arith.addi %126, %128 : i32
      %130 = vector.broadcast %129 : i32 to vector<2x1xi32>
      %131 = arith.cmpi slt, %130, %21 : vector<2x1xi32>
      %132 = vector.shape_cast %131 : vector<2x1xi1> to vector<2x1xi1>
      %133 = vector.broadcast %132 : vector<2x1xi1> to vector<2x32xi1>
      %134 = arith.select %133, %122, %74 : vector<2x32xi1>, vector<2x32xf32>
      %135 = vector.shape_cast %131 : vector<2x1xi1> to vector<2x1xi1>
      %136 = vector.broadcast %135 : vector<2x1xi1> to vector<2x32xi1>
      %137 = arith.select %136, %120, %77 : vector<2x32xi1>, vector<2x32xf32>
      %cst_43 = arith.constant 0.000000e+00 : f32
      %138 = vector.shape_cast %131 : vector<2x1xi1> to vector<2x1xi1>
      %139 = vector.broadcast %138 : vector<2x1xi1> to vector<2x32xi1>
      %140 = vector.broadcast %cst_43 : f32 to vector<2x32xf32>
      %141 = arith.select %139, %122, %140 : vector<2x32xi1>, vector<2x32xf32>
      %c0_44 = arith.constant 0 : index
      %142 = arith.index_cast %90 : i32 to index
      %c0_45 = arith.constant 0 : index
      %c0_46 = arith.constant 0 : index
      %143 = vector.load %arg8[%c0_44, %142, %c0_45, %c0_46] : memref<1x8x2x32xf32, #tpu.memory_space<vmem>>, vector<1x1x2x32xf32>
      %144 = vector.shape_cast %143 : vector<1x1x2x32xf32> to vector<2x32xf32>
      %145 = vector.shape_cast %141 : vector<2x32xf32> to vector<1x1x2x32xf32>
      tpu.vector_store %arg8[%c0_44, %142, %c0_45, %c0_46], %145 {strides = array<i32>} : memref<1x8x2x32xf32, #tpu.memory_space<vmem>>, vector<1x1x2x32xf32>,
      %c2_i32 = arith.constant 2 : i32
      %c1_i32_47 = arith.constant 1 : i32
      %146 = arith.subi %c1_i32_47, %arg0 : i32
      %147 = arith.muli %146, %c2_i32 : i32
      %c7_i32_48 = arith.constant 7 : i32
      %148 = arith.subi %c7_i32_48, %c2_i32 : i32
      %149 = arith.muli %arg0, %148 : i32
      %150 = arith.addi %147, %149 : i32
      %151 = arith.index_cast %150 : i32 to index
      %c0_49 = arith.constant 0 : index
      %c0_50 = arith.constant 0 : index
      %152 = vector.load %arg3[%151, %c0_49, %c0_50] : memref<8x2x128xbf16, #tpu.memory_space<vmem>>, vector<1x2x128xbf16>
      %153 = vector.shape_cast %152 : vector<1x2x128xbf16> to vector<2x128xbf16>
      %154 = arith.extf %153 : vector<2x128xbf16> to vector<2x128xf32>
      %155 = arith.truncf %134 : vector<2x32xf32> to vector<2x32xbf16>
      %cst_51 = arith.constant dense<0.000000e+00> : vector<2x128xf32>
      %156 = tpu.matmul %155, %23, %cst_51 {dimension_numbers = #tpu.dot_dimension_numbers<[1], [0], [0], [1], [0, 0, 1, 1], [], []>} : vector<2x32xbf16>, vector<32x128xbf16>, vector<2x128xf32> -> vector<2x128xf32>
      %157 = arith.addf %154, %156 : vector<2x128xf32>
      %158 = vector.extract_strided_slice %157 {offsets = [0, 0], sizes = [2, 32], strides = [1, 1]} : vector<2x128xf32> to vector<2x32xf32>
      %159 = arith.negf %158 : vector<2x32xf32>
      %160 = math.exp %159 : vector<2x32xf32>
      %cst_52 = arith.constant 1.000000e+00 : f32
      %161 = vector.broadcast %cst_52 : f32 to vector<2x32xf32>
      %162 = arith.addf %161, %160 : vector<2x32xf32>
      %163 = arith.divf %161, %162 : vector<2x32xf32>
      %164 = vector.extract_strided_slice %157 {offsets = [0, 32], sizes = [2, 32], strides = [1, 1]} : vector<2x128xf32> to vector<2x32xf32>
      %165 = arith.negf %164 : vector<2x32xf32>
      %166 = math.exp %165 : vector<2x32xf32>
      %cst_53 = arith.constant 1.000000e+00 : f32
      %167 = vector.broadcast %cst_53 : f32 to vector<2x32xf32>
      %168 = arith.addf %167, %166 : vector<2x32xf32>
      %169 = arith.divf %167, %168 : vector<2x32xf32>
      %170 = vector.extract_strided_slice %157 {offsets = [0, 64], sizes = [2, 32], strides = [1, 1]} : vector<2x128xf32> to vector<2x32xf32>
      %171 = math.tanh %170 : vector<2x32xf32>
      %172 = vector.extract_strided_slice %157 {offsets = [0, 96], sizes = [2, 32], strides = [1, 1]} : vector<2x128xf32> to vector<2x32xf32>
      %173 = arith.negf %172 : vector<2x32xf32>
      %174 = math.exp %173 : vector<2x32xf32>
      %cst_54 = arith.constant 1.000000e+00 : f32
      %175 = vector.broadcast %cst_54 : f32 to vector<2x32xf32>
      %176 = arith.addf %175, %174 : vector<2x32xf32>
      %177 = arith.divf %175, %176 : vector<2x32xf32>
      %178 = arith.mulf %169, %137 : vector<2x32xf32>
      %179 = arith.mulf %163, %171 : vector<2x32xf32>
      %180 = arith.addf %178, %179 : vector<2x32xf32>
      %181 = math.tanh %180 : vector<2x32xf32>
      %182 = arith.mulf %177, %181 : vector<2x32xf32>
      %c8_i32_55 = arith.constant 8 : i32
      %183 = arith.muli %arg1, %c8_i32_55 : i32
      %184 = arith.addi %183, %c2_i32 : i32
      %c1_i32_56 = arith.constant 1 : i32
      %185 = arith.subi %c1_i32_56, %arg0 : i32
      %186 = arith.muli %185, %184 : i32
      %c7_i32_57 = arith.constant 7 : i32
      %187 = arith.subi %c7_i32_57, %184 : i32
      %188 = arith.muli %arg0, %187 : i32
      %189 = arith.addi %186, %188 : i32
      %190 = vector.broadcast %189 : i32 to vector<2x1xi32>
      %191 = arith.cmpi slt, %190, %21 : vector<2x1xi32>
      %192 = vector.shape_cast %191 : vector<2x1xi1> to vector<2x1xi1>
      %193 = vector.broadcast %192 : vector<2x1xi1> to vector<2x32xi1>
      %194 = arith.select %193, %182, %134 : vector<2x32xi1>, vector<2x32xf32>
      %195 = vector.shape_cast %191 : vector<2x1xi1> to vector<2x1xi1>
      %196 = vector.broadcast %195 : vector<2x1xi1> to vector<2x32xi1>
      %197 = arith.select %196, %180, %137 : vector<2x32xi1>, vector<2x32xf32>
      %cst_58 = arith.constant 0.000000e+00 : f32
      %198 = vector.shape_cast %191 : vector<2x1xi1> to vector<2x1xi1>
      %199 = vector.broadcast %198 : vector<2x1xi1> to vector<2x32xi1>
      %200 = vector.broadcast %cst_58 : f32 to vector<2x32xf32>
      %201 = arith.select %199, %182, %200 : vector<2x32xi1>, vector<2x32xf32>
      %c0_59 = arith.constant 0 : index
      %202 = arith.index_cast %150 : i32 to index
      %c0_60 = arith.constant 0 : index
      %c0_61 = arith.constant 0 : index
      %203 = vector.load %arg8[%c0_59, %202, %c0_60, %c0_61] : memref<1x8x2x32xf32, #tpu.memory_space<vmem>>, vector<1x1x2x32xf32>
      %204 = vector.shape_cast %203 : vector<1x1x2x32xf32> to vector<2x32xf32>
      %205 = vector.shape_cast %201 : vector<2x32xf32> to vector<1x1x2x32xf32>
      tpu.vector_store %arg8[%c0_59, %202, %c0_60, %c0_61], %205 {strides = array<i32>} : memref<1x8x2x32xf32, #tpu.memory_space<vmem>>, vector<1x1x2x32xf32>,
      %c3_i32 = arith.constant 3 : i32
      %c1_i32_62 = arith.constant 1 : i32
      %206 = arith.subi %c1_i32_62, %arg0 : i32
      %207 = arith.muli %206, %c3_i32 : i32
      %c7_i32_63 = arith.constant 7 : i32
      %208 = arith.subi %c7_i32_63, %c3_i32 : i32
      %209 = arith.muli %arg0, %208 : i32
      %210 = arith.addi %207, %209 : i32
      %211 = arith.index_cast %210 : i32 to index
      %c0_64 = arith.constant 0 : index
      %c0_65 = arith.constant 0 : index
      %212 = vector.load %arg3[%211, %c0_64, %c0_65] : memref<8x2x128xbf16, #tpu.memory_space<vmem>>, vector<1x2x128xbf16>
      %213 = vector.shape_cast %212 : vector<1x2x128xbf16> to vector<2x128xbf16>
      %214 = arith.extf %213 : vector<2x128xbf16> to vector<2x128xf32>
      %215 = arith.truncf %194 : vector<2x32xf32> to vector<2x32xbf16>
      %cst_66 = arith.constant dense<0.000000e+00> : vector<2x128xf32>
      %216 = tpu.matmul %215, %23, %cst_66 {dimension_numbers = #tpu.dot_dimension_numbers<[1], [0], [0], [1], [0, 0, 1, 1], [], []>} : vector<2x32xbf16>, vector<32x128xbf16>, vector<2x128xf32> -> vector<2x128xf32>
      %217 = arith.addf %214, %216 : vector<2x128xf32>
      %218 = vector.extract_strided_slice %217 {offsets = [0, 0], sizes = [2, 32], strides = [1, 1]} : vector<2x128xf32> to vector<2x32xf32>
      %219 = arith.negf %218 : vector<2x32xf32>
      %220 = math.exp %219 : vector<2x32xf32>
      %cst_67 = arith.constant 1.000000e+00 : f32
      %221 = vector.broadcast %cst_67 : f32 to vector<2x32xf32>
      %222 = arith.addf %221, %220 : vector<2x32xf32>
      %223 = arith.divf %221, %222 : vector<2x32xf32>
      %224 = vector.extract_strided_slice %217 {offsets = [0, 32], sizes = [2, 32], strides = [1, 1]} : vector<2x128xf32> to vector<2x32xf32>
      %225 = arith.negf %224 : vector<2x32xf32>
      %226 = math.exp %225 : vector<2x32xf32>
      %cst_68 = arith.constant 1.000000e+00 : f32
      %227 = vector.broadcast %cst_68 : f32 to vector<2x32xf32>
      %228 = arith.addf %227, %226 : vector<2x32xf32>
      %229 = arith.divf %227, %228 : vector<2x32xf32>
      %230 = vector.extract_strided_slice %217 {offsets = [0, 64], sizes = [2, 32], strides = [1, 1]} : vector<2x128xf32> to vector<2x32xf32>
      %231 = math.tanh %230 : vector<2x32xf32>
      %232 = vector.extract_strided_slice %217 {offsets = [0, 96], sizes = [2, 32], strides = [1, 1]} : vector<2x128xf32> to vector<2x32xf32>
      %233 = arith.negf %232 : vector<2x32xf32>
      %234 = math.exp %233 : vector<2x32xf32>
      %cst_69 = arith.constant 1.000000e+00 : f32
      %235 = vector.broadcast %cst_69 : f32 to vector<2x32xf32>
      %236 = arith.addf %235, %234 : vector<2x32xf32>
      %237 = arith.divf %235, %236 : vector<2x32xf32>
      %238 = arith.mulf %229, %197 : vector<2x32xf32>
      %239 = arith.mulf %223, %231 : vector<2x32xf32>
      %240 = arith.addf %238, %239 : vector<2x32xf32>
      %241 = math.tanh %240 : vector<2x32xf32>
      %242 = arith.mulf %237, %241 : vector<2x32xf32>
      %c8_i32_70 = arith.constant 8 : i32
      %243 = arith.muli %arg1, %c8_i32_70 : i32
      %244 = arith.addi %243, %c3_i32 : i32
      %c1_i32_71 = arith.constant 1 : i32
      %245 = arith.subi %c1_i32_71, %arg0 : i32
      %246 = arith.muli %245, %244 : i32
      %c7_i32_72 = arith.constant 7 : i32
      %247 = arith.subi %c7_i32_72, %244 : i32
      %248 = arith.muli %arg0, %247 : i32
      %249 = arith.addi %246, %248 : i32
      %250 = vector.broadcast %249 : i32 to vector<2x1xi32>
      %251 = arith.cmpi slt, %250, %21 : vector<2x1xi32>
      %252 = vector.shape_cast %251 : vector<2x1xi1> to vector<2x1xi1>
      %253 = vector.broadcast %252 : vector<2x1xi1> to vector<2x32xi1>
      %254 = arith.select %253, %242, %194 : vector<2x32xi1>, vector<2x32xf32>
      %255 = vector.shape_cast %251 : vector<2x1xi1> to vector<2x1xi1>
      %256 = vector.broadcast %255 : vector<2x1xi1> to vector<2x32xi1>
      %257 = arith.select %256, %240, %197 : vector<2x32xi1>, vector<2x32xf32>
      %cst_73 = arith.constant 0.000000e+00 : f32
      %258 = vector.shape_cast %251 : vector<2x1xi1> to vector<2x1xi1>
      %259 = vector.broadcast %258 : vector<2x1xi1> to vector<2x32xi1>
      %260 = vector.broadcast %cst_73 : f32 to vector<2x32xf32>
      %261 = arith.select %259, %242, %260 : vector<2x32xi1>, vector<2x32xf32>
      %c0_74 = arith.constant 0 : index
      %262 = arith.index_cast %210 : i32 to index
      %c0_75 = arith.constant 0 : index
      %c0_76 = arith.constant 0 : index
      %263 = vector.load %arg8[%c0_74, %262, %c0_75, %c0_76] : memref<1x8x2x32xf32, #tpu.memory_space<vmem>>, vector<1x1x2x32xf32>
      %264 = vector.shape_cast %263 : vector<1x1x2x32xf32> to vector<2x32xf32>
      %265 = vector.shape_cast %261 : vector<2x32xf32> to vector<1x1x2x32xf32>
      tpu.vector_store %arg8[%c0_74, %262, %c0_75, %c0_76], %265 {strides = array<i32>} : memref<1x8x2x32xf32, #tpu.memory_space<vmem>>, vector<1x1x2x32xf32>,
      %c4_i32 = arith.constant 4 : i32
      %c1_i32_77 = arith.constant 1 : i32
      %266 = arith.subi %c1_i32_77, %arg0 : i32
      %267 = arith.muli %266, %c4_i32 : i32
      %c7_i32_78 = arith.constant 7 : i32
      %268 = arith.subi %c7_i32_78, %c4_i32 : i32
      %269 = arith.muli %arg0, %268 : i32
      %270 = arith.addi %267, %269 : i32
      %271 = arith.index_cast %270 : i32 to index
      %c0_79 = arith.constant 0 : index
      %c0_80 = arith.constant 0 : index
      %272 = vector.load %arg3[%271, %c0_79, %c0_80] : memref<8x2x128xbf16, #tpu.memory_space<vmem>>, vector<1x2x128xbf16>
      %273 = vector.shape_cast %272 : vector<1x2x128xbf16> to vector<2x128xbf16>
      %274 = arith.extf %273 : vector<2x128xbf16> to vector<2x128xf32>
      %275 = arith.truncf %254 : vector<2x32xf32> to vector<2x32xbf16>
      %cst_81 = arith.constant dense<0.000000e+00> : vector<2x128xf32>
      %276 = tpu.matmul %275, %23, %cst_81 {dimension_numbers = #tpu.dot_dimension_numbers<[1], [0], [0], [1], [0, 0, 1, 1], [], []>} : vector<2x32xbf16>, vector<32x128xbf16>, vector<2x128xf32> -> vector<2x128xf32>
      %277 = arith.addf %274, %276 : vector<2x128xf32>
      %278 = vector.extract_strided_slice %277 {offsets = [0, 0], sizes = [2, 32], strides = [1, 1]} : vector<2x128xf32> to vector<2x32xf32>
      %279 = arith.negf %278 : vector<2x32xf32>
      %280 = math.exp %279 : vector<2x32xf32>
      %cst_82 = arith.constant 1.000000e+00 : f32
      %281 = vector.broadcast %cst_82 : f32 to vector<2x32xf32>
      %282 = arith.addf %281, %280 : vector<2x32xf32>
      %283 = arith.divf %281, %282 : vector<2x32xf32>
      %284 = vector.extract_strided_slice %277 {offsets = [0, 32], sizes = [2, 32], strides = [1, 1]} : vector<2x128xf32> to vector<2x32xf32>
      %285 = arith.negf %284 : vector<2x32xf32>
      %286 = math.exp %285 : vector<2x32xf32>
      %cst_83 = arith.constant 1.000000e+00 : f32
      %287 = vector.broadcast %cst_83 : f32 to vector<2x32xf32>
      %288 = arith.addf %287, %286 : vector<2x32xf32>
      %289 = arith.divf %287, %288 : vector<2x32xf32>
      %290 = vector.extract_strided_slice %277 {offsets = [0, 64], sizes = [2, 32], strides = [1, 1]} : vector<2x128xf32> to vector<2x32xf32>
      %291 = math.tanh %290 : vector<2x32xf32>
      %292 = vector.extract_strided_slice %277 {offsets = [0, 96], sizes = [2, 32], strides = [1, 1]} : vector<2x128xf32> to vector<2x32xf32>
      %293 = arith.negf %292 : vector<2x32xf32>
      %294 = math.exp %293 : vector<2x32xf32>
      %cst_84 = arith.constant 1.000000e+00 : f32
      %295 = vector.broadcast %cst_84 : f32 to vector<2x32xf32>
      %296 = arith.addf %295, %294 : vector<2x32xf32>
      %297 = arith.divf %295, %296 : vector<2x32xf32>
      %298 = arith.mulf %289, %257 : vector<2x32xf32>
      %299 = arith.mulf %283, %291 : vector<2x32xf32>
      %300 = arith.addf %298, %299 : vector<2x32xf32>
      %301 = math.tanh %300 : vector<2x32xf32>
      %302 = arith.mulf %297, %301 : vector<2x32xf32>
      %c8_i32_85 = arith.constant 8 : i32
      %303 = arith.muli %arg1, %c8_i32_85 : i32
      %304 = arith.addi %303, %c4_i32 : i32
      %c1_i32_86 = arith.constant 1 : i32
      %305 = arith.subi %c1_i32_86, %arg0 : i32
      %306 = arith.muli %305, %304 : i32
      %c7_i32_87 = arith.constant 7 : i32
      %307 = arith.subi %c7_i32_87, %304 : i32
      %308 = arith.muli %arg0, %307 : i32
      %309 = arith.addi %306, %308 : i32
      %310 = vector.broadcast %309 : i32 to vector<2x1xi32>
      %311 = arith.cmpi slt, %310, %21 : vector<2x1xi32>
      %312 = vector.shape_cast %311 : vector<2x1xi1> to vector<2x1xi1>
      %313 = vector.broadcast %312 : vector<2x1xi1> to vector<2x32xi1>
      %314 = arith.select %313, %302, %254 : vector<2x32xi1>, vector<2x32xf32>
      %315 = vector.shape_cast %311 : vector<2x1xi1> to vector<2x1xi1>
      %316 = vector.broadcast %315 : vector<2x1xi1> to vector<2x32xi1>
      %317 = arith.select %316, %300, %257 : vector<2x32xi1>, vector<2x32xf32>
      %cst_88 = arith.constant 0.000000e+00 : f32
      %318 = vector.shape_cast %311 : vector<2x1xi1> to vector<2x1xi1>
      %319 = vector.broadcast %318 : vector<2x1xi1> to vector<2x32xi1>
      %320 = vector.broadcast %cst_88 : f32 to vector<2x32xf32>
      %321 = arith.select %319, %302, %320 : vector<2x32xi1>, vector<2x32xf32>
      %c0_89 = arith.constant 0 : index
      %322 = arith.index_cast %270 : i32 to index
      %c0_90 = arith.constant 0 : index
      %c0_91 = arith.constant 0 : index
      %323 = vector.load %arg8[%c0_89, %322, %c0_90, %c0_91] : memref<1x8x2x32xf32, #tpu.memory_space<vmem>>, vector<1x1x2x32xf32>
      %324 = vector.shape_cast %323 : vector<1x1x2x32xf32> to vector<2x32xf32>
      %325 = vector.shape_cast %321 : vector<2x32xf32> to vector<1x1x2x32xf32>
      tpu.vector_store %arg8[%c0_89, %322, %c0_90, %c0_91], %325 {strides = array<i32>} : memref<1x8x2x32xf32, #tpu.memory_space<vmem>>, vector<1x1x2x32xf32>,
      %c5_i32 = arith.constant 5 : i32
      %c1_i32_92 = arith.constant 1 : i32
      %326 = arith.subi %c1_i32_92, %arg0 : i32
      %327 = arith.muli %326, %c5_i32 : i32
      %c7_i32_93 = arith.constant 7 : i32
      %328 = arith.subi %c7_i32_93, %c5_i32 : i32
      %329 = arith.muli %arg0, %328 : i32
      %330 = arith.addi %327, %329 : i32
      %331 = arith.index_cast %330 : i32 to index
      %c0_94 = arith.constant 0 : index
      %c0_95 = arith.constant 0 : index
      %332 = vector.load %arg3[%331, %c0_94, %c0_95] : memref<8x2x128xbf16, #tpu.memory_space<vmem>>, vector<1x2x128xbf16>
      %333 = vector.shape_cast %332 : vector<1x2x128xbf16> to vector<2x128xbf16>
      %334 = arith.extf %333 : vector<2x128xbf16> to vector<2x128xf32>
      %335 = arith.truncf %314 : vector<2x32xf32> to vector<2x32xbf16>
      %cst_96 = arith.constant dense<0.000000e+00> : vector<2x128xf32>
      %336 = tpu.matmul %335, %23, %cst_96 {dimension_numbers = #tpu.dot_dimension_numbers<[1], [0], [0], [1], [0, 0, 1, 1], [], []>} : vector<2x32xbf16>, vector<32x128xbf16>, vector<2x128xf32> -> vector<2x128xf32>
      %337 = arith.addf %334, %336 : vector<2x128xf32>
      %338 = vector.extract_strided_slice %337 {offsets = [0, 0], sizes = [2, 32], strides = [1, 1]} : vector<2x128xf32> to vector<2x32xf32>
      %339 = arith.negf %338 : vector<2x32xf32>
      %340 = math.exp %339 : vector<2x32xf32>
      %cst_97 = arith.constant 1.000000e+00 : f32
      %341 = vector.broadcast %cst_97 : f32 to vector<2x32xf32>
      %342 = arith.addf %341, %340 : vector<2x32xf32>
      %343 = arith.divf %341, %342 : vector<2x32xf32>
      %344 = vector.extract_strided_slice %337 {offsets = [0, 32], sizes = [2, 32], strides = [1, 1]} : vector<2x128xf32> to vector<2x32xf32>
      %345 = arith.negf %344 : vector<2x32xf32>
      %346 = math.exp %345 : vector<2x32xf32>
      %cst_98 = arith.constant 1.000000e+00 : f32
      %347 = vector.broadcast %cst_98 : f32 to vector<2x32xf32>
      %348 = arith.addf %347, %346 : vector<2x32xf32>
      %349 = arith.divf %347, %348 : vector<2x32xf32>
      %350 = vector.extract_strided_slice %337 {offsets = [0, 64], sizes = [2, 32], strides = [1, 1]} : vector<2x128xf32> to vector<2x32xf32>
      %351 = math.tanh %350 : vector<2x32xf32>
      %352 = vector.extract_strided_slice %337 {offsets = [0, 96], sizes = [2, 32], strides = [1, 1]} : vector<2x128xf32> to vector<2x32xf32>
      %353 = arith.negf %352 : vector<2x32xf32>
      %354 = math.exp %353 : vector<2x32xf32>
      %cst_99 = arith.constant 1.000000e+00 : f32
      %355 = vector.broadcast %cst_99 : f32 to vector<2x32xf32>
      %356 = arith.addf %355, %354 : vector<2x32xf32>
      %357 = arith.divf %355, %356 : vector<2x32xf32>
      %358 = arith.mulf %349, %317 : vector<2x32xf32>
      %359 = arith.mulf %343, %351 : vector<2x32xf32>
      %360 = arith.addf %358, %359 : vector<2x32xf32>
      %361 = math.tanh %360 : vector<2x32xf32>
      %362 = arith.mulf %357, %361 : vector<2x32xf32>
      %c8_i32_100 = arith.constant 8 : i32
      %363 = arith.muli %arg1, %c8_i32_100 : i32
      %364 = arith.addi %363, %c5_i32 : i32
      %c1_i32_101 = arith.constant 1 : i32
      %365 = arith.subi %c1_i32_101, %arg0 : i32
      %366 = arith.muli %365, %364 : i32
      %c7_i32_102 = arith.constant 7 : i32
      %367 = arith.subi %c7_i32_102, %364 : i32
      %368 = arith.muli %arg0, %367 : i32
      %369 = arith.addi %366, %368 : i32
      %370 = vector.broadcast %369 : i32 to vector<2x1xi32>
      %371 = arith.cmpi slt, %370, %21 : vector<2x1xi32>
      %372 = vector.shape_cast %371 : vector<2x1xi1> to vector<2x1xi1>
      %373 = vector.broadcast %372 : vector<2x1xi1> to vector<2x32xi1>
      %374 = arith.select %373, %362, %314 : vector<2x32xi1>, vector<2x32xf32>
      %375 = vector.shape_cast %371 : vector<2x1xi1> to vector<2x1xi1>
      %376 = vector.broadcast %375 : vector<2x1xi1> to vector<2x32xi1>
      %377 = arith.select %376, %360, %317 : vector<2x32xi1>, vector<2x32xf32>
      %cst_103 = arith.constant 0.000000e+00 : f32
      %378 = vector.shape_cast %371 : vector<2x1xi1> to vector<2x1xi1>
      %379 = vector.broadcast %378 : vector<2x1xi1> to vector<2x32xi1>
      %380 = vector.broadcast %cst_103 : f32 to vector<2x32xf32>
      %381 = arith.select %379, %362, %380 : vector<2x32xi1>, vector<2x32xf32>
      %c0_104 = arith.constant 0 : index
      %382 = arith.index_cast %330 : i32 to index
      %c0_105 = arith.constant 0 : index
      %c0_106 = arith.constant 0 : index
      %383 = vector.load %arg8[%c0_104, %382, %c0_105, %c0_106] : memref<1x8x2x32xf32, #tpu.memory_space<vmem>>, vector<1x1x2x32xf32>
      %384 = vector.shape_cast %383 : vector<1x1x2x32xf32> to vector<2x32xf32>
      %385 = vector.shape_cast %381 : vector<2x32xf32> to vector<1x1x2x32xf32>
      tpu.vector_store %arg8[%c0_104, %382, %c0_105, %c0_106], %385 {strides = array<i32>} : memref<1x8x2x32xf32, #tpu.memory_space<vmem>>, vector<1x1x2x32xf32>,
      %c6_i32 = arith.constant 6 : i32
      %c1_i32_107 = arith.constant 1 : i32
      %386 = arith.subi %c1_i32_107, %arg0 : i32
      %387 = arith.muli %386, %c6_i32 : i32
      %c7_i32_108 = arith.constant 7 : i32
      %388 = arith.subi %c7_i32_108, %c6_i32 : i32
      %389 = arith.muli %arg0, %388 : i32
      %390 = arith.addi %387, %389 : i32
      %391 = arith.index_cast %390 : i32 to index
      %c0_109 = arith.constant 0 : index
      %c0_110 = arith.constant 0 : index
      %392 = vector.load %arg3[%391, %c0_109, %c0_110] : memref<8x2x128xbf16, #tpu.memory_space<vmem>>, vector<1x2x128xbf16>
      %393 = vector.shape_cast %392 : vector<1x2x128xbf16> to vector<2x128xbf16>
      %394 = arith.extf %393 : vector<2x128xbf16> to vector<2x128xf32>
      %395 = arith.truncf %374 : vector<2x32xf32> to vector<2x32xbf16>
      %cst_111 = arith.constant dense<0.000000e+00> : vector<2x128xf32>
      %396 = tpu.matmul %395, %23, %cst_111 {dimension_numbers = #tpu.dot_dimension_numbers<[1], [0], [0], [1], [0, 0, 1, 1], [], []>} : vector<2x32xbf16>, vector<32x128xbf16>, vector<2x128xf32> -> vector<2x128xf32>
      %397 = arith.addf %394, %396 : vector<2x128xf32>
      %398 = vector.extract_strided_slice %397 {offsets = [0, 0], sizes = [2, 32], strides = [1, 1]} : vector<2x128xf32> to vector<2x32xf32>
      %399 = arith.negf %398 : vector<2x32xf32>
      %400 = math.exp %399 : vector<2x32xf32>
      %cst_112 = arith.constant 1.000000e+00 : f32
      %401 = vector.broadcast %cst_112 : f32 to vector<2x32xf32>
      %402 = arith.addf %401, %400 : vector<2x32xf32>
      %403 = arith.divf %401, %402 : vector<2x32xf32>
      %404 = vector.extract_strided_slice %397 {offsets = [0, 32], sizes = [2, 32], strides = [1, 1]} : vector<2x128xf32> to vector<2x32xf32>
      %405 = arith.negf %404 : vector<2x32xf32>
      %406 = math.exp %405 : vector<2x32xf32>
      %cst_113 = arith.constant 1.000000e+00 : f32
      %407 = vector.broadcast %cst_113 : f32 to vector<2x32xf32>
      %408 = arith.addf %407, %406 : vector<2x32xf32>
      %409 = arith.divf %407, %408 : vector<2x32xf32>
      %410 = vector.extract_strided_slice %397 {offsets = [0, 64], sizes = [2, 32], strides = [1, 1]} : vector<2x128xf32> to vector<2x32xf32>
      %411 = math.tanh %410 : vector<2x32xf32>
      %412 = vector.extract_strided_slice %397 {offsets = [0, 96], sizes = [2, 32], strides = [1, 1]} : vector<2x128xf32> to vector<2x32xf32>
      %413 = arith.negf %412 : vector<2x32xf32>
      %414 = math.exp %413 : vector<2x32xf32>
      %cst_114 = arith.constant 1.000000e+00 : f32
      %415 = vector.broadcast %cst_114 : f32 to vector<2x32xf32>
      %416 = arith.addf %415, %414 : vector<2x32xf32>
      %417 = arith.divf %415, %416 : vector<2x32xf32>
      %418 = arith.mulf %409, %377 : vector<2x32xf32>
      %419 = arith.mulf %403, %411 : vector<2x32xf32>
      %420 = arith.addf %418, %419 : vector<2x32xf32>
      %421 = math.tanh %420 : vector<2x32xf32>
      %422 = arith.mulf %417, %421 : vector<2x32xf32>
      %c8_i32_115 = arith.constant 8 : i32
      %423 = arith.muli %arg1, %c8_i32_115 : i32
      %424 = arith.addi %423, %c6_i32 : i32
      %c1_i32_116 = arith.constant 1 : i32
      %425 = arith.subi %c1_i32_116, %arg0 : i32
      %426 = arith.muli %425, %424 : i32
      %c7_i32_117 = arith.constant 7 : i32
      %427 = arith.subi %c7_i32_117, %424 : i32
      %428 = arith.muli %arg0, %427 : i32
      %429 = arith.addi %426, %428 : i32
      %430 = vector.broadcast %429 : i32 to vector<2x1xi32>
      %431 = arith.cmpi slt, %430, %21 : vector<2x1xi32>
      %432 = vector.shape_cast %431 : vector<2x1xi1> to vector<2x1xi1>
      %433 = vector.broadcast %432 : vector<2x1xi1> to vector<2x32xi1>
      %434 = arith.select %433, %422, %374 : vector<2x32xi1>, vector<2x32xf32>
      %435 = vector.shape_cast %431 : vector<2x1xi1> to vector<2x1xi1>
      %436 = vector.broadcast %435 : vector<2x1xi1> to vector<2x32xi1>
      %437 = arith.select %436, %420, %377 : vector<2x32xi1>, vector<2x32xf32>
      %cst_118 = arith.constant 0.000000e+00 : f32
      %438 = vector.shape_cast %431 : vector<2x1xi1> to vector<2x1xi1>
      %439 = vector.broadcast %438 : vector<2x1xi1> to vector<2x32xi1>
      %440 = vector.broadcast %cst_118 : f32 to vector<2x32xf32>
      %441 = arith.select %439, %422, %440 : vector<2x32xi1>, vector<2x32xf32>
      %c0_119 = arith.constant 0 : index
      %442 = arith.index_cast %390 : i32 to index
      %c0_120 = arith.constant 0 : index
      %c0_121 = arith.constant 0 : index
      %443 = vector.load %arg8[%c0_119, %442, %c0_120, %c0_121] : memref<1x8x2x32xf32, #tpu.memory_space<vmem>>, vector<1x1x2x32xf32>
      %444 = vector.shape_cast %443 : vector<1x1x2x32xf32> to vector<2x32xf32>
      %445 = vector.shape_cast %441 : vector<2x32xf32> to vector<1x1x2x32xf32>
      tpu.vector_store %arg8[%c0_119, %442, %c0_120, %c0_121], %445 {strides = array<i32>} : memref<1x8x2x32xf32, #tpu.memory_space<vmem>>, vector<1x1x2x32xf32>,
      %c7_i32_122 = arith.constant 7 : i32
      %c1_i32_123 = arith.constant 1 : i32
      %446 = arith.subi %c1_i32_123, %arg0 : i32
      %447 = arith.muli %446, %c7_i32_122 : i32
      %c7_i32_124 = arith.constant 7 : i32
      %448 = arith.subi %c7_i32_124, %c7_i32_122 : i32
      %449 = arith.muli %arg0, %448 : i32
      %450 = arith.addi %447, %449 : i32
      %451 = arith.index_cast %450 : i32 to index
      %c0_125 = arith.constant 0 : index
      %c0_126 = arith.constant 0 : index
      %452 = vector.load %arg3[%451, %c0_125, %c0_126] : memref<8x2x128xbf16, #tpu.memory_space<vmem>>, vector<1x2x128xbf16>
      %453 = vector.shape_cast %452 : vector<1x2x128xbf16> to vector<2x128xbf16>
      %454 = arith.extf %453 : vector<2x128xbf16> to vector<2x128xf32>
      %455 = arith.truncf %434 : vector<2x32xf32> to vector<2x32xbf16>
      %cst_127 = arith.constant dense<0.000000e+00> : vector<2x128xf32>
      %456 = tpu.matmul %455, %23, %cst_127 {dimension_numbers = #tpu.dot_dimension_numbers<[1], [0], [0], [1], [0, 0, 1, 1], [], []>} : vector<2x32xbf16>, vector<32x128xbf16>, vector<2x128xf32> -> vector<2x128xf32>
      %457 = arith.addf %454, %456 : vector<2x128xf32>
      %458 = vector.extract_strided_slice %457 {offsets = [0, 0], sizes = [2, 32], strides = [1, 1]} : vector<2x128xf32> to vector<2x32xf32>
      %459 = arith.negf %458 : vector<2x32xf32>
      %460 = math.exp %459 : vector<2x32xf32>
      %cst_128 = arith.constant 1.000000e+00 : f32
      %461 = vector.broadcast %cst_128 : f32 to vector<2x32xf32>
      %462 = arith.addf %461, %460 : vector<2x32xf32>
      %463 = arith.divf %461, %462 : vector<2x32xf32>
      %464 = vector.extract_strided_slice %457 {offsets = [0, 32], sizes = [2, 32], strides = [1, 1]} : vector<2x128xf32> to vector<2x32xf32>
      %465 = arith.negf %464 : vector<2x32xf32>
      %466 = math.exp %465 : vector<2x32xf32>
      %cst_129 = arith.constant 1.000000e+00 : f32
      %467 = vector.broadcast %cst_129 : f32 to vector<2x32xf32>
      %468 = arith.addf %467, %466 : vector<2x32xf32>
      %469 = arith.divf %467, %468 : vector<2x32xf32>
      %470 = vector.extract_strided_slice %457 {offsets = [0, 64], sizes = [2, 32], strides = [1, 1]} : vector<2x128xf32> to vector<2x32xf32>
      %471 = math.tanh %470 : vector<2x32xf32>
      %472 = vector.extract_strided_slice %457 {offsets = [0, 96], sizes = [2, 32], strides = [1, 1]} : vector<2x128xf32> to vector<2x32xf32>
      %473 = arith.negf %472 : vector<2x32xf32>
      %474 = math.exp %473 : vector<2x32xf32>
      %cst_130 = arith.constant 1.000000e+00 : f32
      %475 = vector.broadcast %cst_130 : f32 to vector<2x32xf32>
      %476 = arith.addf %475, %474 : vector<2x32xf32>
      %477 = arith.divf %475, %476 : vector<2x32xf32>
      %478 = arith.mulf %469, %437 : vector<2x32xf32>
      %479 = arith.mulf %463, %471 : vector<2x32xf32>
      %480 = arith.addf %478, %479 : vector<2x32xf32>
      %481 = math.tanh %480 : vector<2x32xf32>
      %482 = arith.mulf %477, %481 : vector<2x32xf32>
      %c8_i32_131 = arith.constant 8 : i32
      %483 = arith.muli %arg1, %c8_i32_131 : i32
      %484 = arith.addi %483, %c7_i32_122 : i32
      %c1_i32_132 = arith.constant 1 : i32
      %485 = arith.subi %c1_i32_132, %arg0 : i32
      %486 = arith.muli %485, %484 : i32
      %c7_i32_133 = arith.constant 7 : i32
      %487 = arith.subi %c7_i32_133, %484 : i32
      %488 = arith.muli %arg0, %487 : i32
      %489 = arith.addi %486, %488 : i32
      %490 = vector.broadcast %489 : i32 to vector<2x1xi32>
      %491 = arith.cmpi slt, %490, %21 : vector<2x1xi32>
      %492 = vector.shape_cast %491 : vector<2x1xi1> to vector<2x1xi1>
      %493 = vector.broadcast %492 : vector<2x1xi1> to vector<2x32xi1>
      %494 = arith.select %493, %482, %434 : vector<2x32xi1>, vector<2x32xf32>
      %495 = vector.shape_cast %491 : vector<2x1xi1> to vector<2x1xi1>
      %496 = vector.broadcast %495 : vector<2x1xi1> to vector<2x32xi1>
      %497 = arith.select %496, %480, %437 : vector<2x32xi1>, vector<2x32xf32>
      %cst_134 = arith.constant 0.000000e+00 : f32
      %498 = vector.shape_cast %491 : vector<2x1xi1> to vector<2x1xi1>
      %499 = vector.broadcast %498 : vector<2x1xi1> to vector<2x32xi1>
      %500 = vector.broadcast %cst_134 : f32 to vector<2x32xf32>
      %501 = arith.select %499, %482, %500 : vector<2x32xi1>, vector<2x32xf32>
      %c0_135 = arith.constant 0 : index
      %502 = arith.index_cast %450 : i32 to index
      %c0_136 = arith.constant 0 : index
      %c0_137 = arith.constant 0 : index
      %503 = vector.load %arg8[%c0_135, %502, %c0_136, %c0_137] : memref<1x8x2x32xf32, #tpu.memory_space<vmem>>, vector<1x1x2x32xf32>
      %504 = vector.shape_cast %503 : vector<1x1x2x32xf32> to vector<2x32xf32>
      %505 = vector.shape_cast %501 : vector<2x32xf32> to vector<1x1x2x32xf32>
      tpu.vector_store %arg8[%c0_135, %502, %c0_136, %c0_137], %505 {strides = array<i32>} : memref<1x8x2x32xf32, #tpu.memory_space<vmem>>, vector<1x1x2x32xf32>,
      %c8_i32_138 = arith.constant 8 : i32
      %c0_139 = arith.constant 0 : index
      %c0_140 = arith.constant 0 : index
      %506 = vector.load %arg11[%c0_139, %c0_140] : memref<2x32xf32, #tpu.memory_space<vmem>>, vector<2x32xf32>
      tpu.vector_store %arg11[%c0_139, %c0_140], %494 {strides = array<i32>} : memref<2x32xf32, #tpu.memory_space<vmem>>, vector<2x32xf32>,
      %c0_141 = arith.constant 0 : index
      %c0_142 = arith.constant 0 : index
      %507 = vector.load %arg12[%c0_141, %c0_142] : memref<2x32xf32, #tpu.memory_space<vmem>>, vector<2x32xf32>
      tpu.vector_store %arg12[%c0_141, %c0_142], %497 {strides = array<i32>} : memref<2x32xf32, #tpu.memory_space<vmem>>, vector<2x32xf32>,
    } else {
    }
    %true = arith.constant true
    %15 = arith.xori %12, %true : i1
    %16 = arith.extui %15 : i1 to i32
    %c0_i32_5 = arith.constant 0 : i32
    %17 = arith.cmpi ne, %16, %c0_i32_5 : i32
    scf.if %17 {
      %cst = arith.constant 0.000000e+00 : f32
      %21 = vector.broadcast %cst : f32 to vector<8x2x32xf32>
      %c0_8 = arith.constant 0 : index
      %c0_9 = arith.constant 0 : index
      %c0_10 = arith.constant 0 : index
      %c0_11 = arith.constant 0 : index
      %22 = vector.load %arg8[%c0_8, %c0_9, %c0_10, %c0_11] : memref<1x8x2x32xf32, #tpu.memory_space<vmem>>, vector<1x8x2x32xf32>
      %23 = vector.shape_cast %22 : vector<1x8x2x32xf32> to vector<8x2x32xf32>
      %24 = vector.shape_cast %21 : vector<8x2x32xf32> to vector<1x8x2x32xf32>
      tpu.vector_store %arg8[%c0_8, %c0_9, %c0_10, %c0_11], %24 {strides = array<i32>} : memref<1x8x2x32xf32, #tpu.memory_space<vmem>>, vector<1x8x2x32xf32>,
    } else {
    }
    %c0_i32_6 = arith.constant 0 : i32
    %18 = arith.cmpi eq, %arg1, %c0_i32_6 : i32
    %19 = arith.extui %18 : i1 to i32
    %c0_i32_7 = arith.constant 0 : i32
    %20 = arith.cmpi ne, %19, %c0_i32_7 : i32
    scf.if %20 {
      %c0_8 = arith.constant 0 : index
      %c0_9 = arith.constant 0 : index
      %21 = vector.load %arg11[%c0_8, %c0_9] : memref<2x32xf32, #tpu.memory_space<vmem>>, vector<2x32xf32>
      %c0_10 = arith.constant 0 : index
      %c0_11 = arith.constant 0 : index
      %c0_12 = arith.constant 0 : index
      %22 = vector.load %arg9[%c0_10, %c0_11, %c0_12] : memref<1x2x32xf32, #tpu.memory_space<vmem>>, vector<1x2x32xf32>
      %23 = vector.shape_cast %22 : vector<1x2x32xf32> to vector<2x32xf32>
      %24 = vector.shape_cast %21 : vector<2x32xf32> to vector<1x2x32xf32>
      tpu.vector_store %arg9[%c0_10, %c0_11, %c0_12], %24 {strides = array<i32>} : memref<1x2x32xf32, #tpu.memory_space<vmem>>, vector<1x2x32xf32>,
      %c0_13 = arith.constant 0 : index
      %c0_14 = arith.constant 0 : index
      %25 = vector.load %arg12[%c0_13, %c0_14] : memref<2x32xf32, #tpu.memory_space<vmem>>, vector<2x32xf32>
      %c0_15 = arith.constant 0 : index
      %c0_16 = arith.constant 0 : index
      %c0_17 = arith.constant 0 : index
      %26 = vector.load %arg10[%c0_15, %c0_16, %c0_17] : memref<1x2x32xf32, #tpu.memory_space<vmem>>, vector<1x2x32xf32>
      %27 = vector.shape_cast %26 : vector<1x2x32xf32> to vector<2x32xf32>
      %28 = vector.shape_cast %25 : vector<2x32xf32> to vector<1x2x32xf32>
      tpu.vector_store %arg10[%c0_15, %c0_16, %c0_17], %28 {strides = array<i32>} : memref<1x2x32xf32, #tpu.memory_space<vmem>>, vector<1x2x32xf32>,
    } else {
    }
    return
  }
  func.func @transform_0(%arg0: i32, %arg1: i32, %arg2: memref<1xi32, #tpu.memory_space<smem>>) -> (i32, i32, i32) {
    %c1_i32 = arith.constant 1 : i32
    %0 = arith.subi %c1_i32, %arg0 : i32
    %1 = arith.muli %0, %arg1 : i32
    %c0_i32 = arith.constant 0 : i32
    %2 = arith.subi %c0_i32, %arg1 : i32
    %3 = arith.muli %arg0, %2 : i32
    %4 = arith.addi %1, %3 : i32
    %c0_i32_0 = arith.constant 0 : i32
    %c0_i32_1 = arith.constant 0 : i32
    return %4, %c0_i32_0, %arg0 : i32, i32, i32
  }
  func.func @transform_1(%arg0: i32, %arg1: i32, %arg2: memref<1xi32, #tpu.memory_space<smem>>) -> (i32, i32) {
    %c0_i32 = arith.constant 0 : i32
    %c0_i32_0 = arith.constant 0 : i32
    %c0_i32_1 = arith.constant 0 : i32
    return %c0_i32, %c0_i32_0 : i32, i32
  }
  func.func @transform_2(%arg0: i32, %arg1: i32, %arg2: memref<1xi32, #tpu.memory_space<smem>>) -> (i32, i32, i32) {
    %c0_i32 = arith.constant 0 : i32
    %c0_i32_0 = arith.constant 0 : i32
    %c0_i32_1 = arith.constant 0 : i32
    return %arg0, %c0_i32, %c0_i32_0 : i32, i32, i32
  }
  func.func @transform_3(%arg0: i32, %arg1: i32, %arg2: memref<1xi32, #tpu.memory_space<smem>>) -> (i32, i32, i32) {
    %c0_i32 = arith.constant 0 : i32
    %c0_i32_0 = arith.constant 0 : i32
    %c0_i32_1 = arith.constant 0 : i32
    return %arg0, %c0_i32, %c0_i32_0 : i32, i32, i32
  }
  func.func @transform_4(%arg0: i32, %arg1: i32, %arg2: memref<1xi32, #tpu.memory_space<smem>>) -> (i32, i32, i32) {
    %c0_i32 = arith.constant 0 : i32
    %c0_i32_0 = arith.constant 0 : i32
    %c0_i32_1 = arith.constant 0 : i32
    return %arg0, %c0_i32, %c0_i32_0 : i32, i32, i32
  }
  func.func @transform_5(%arg0: i32, %arg1: i32, %arg2: memref<1xi32, #tpu.memory_space<smem>>) -> (i32, i32, i32, i32) {
    %c1_i32 = arith.constant 1 : i32
    %0 = arith.subi %c1_i32, %arg0 : i32
    %1 = arith.muli %0, %arg1 : i32
    %c0_i32 = arith.constant 0 : i32
    %2 = arith.subi %c0_i32, %arg1 : i32
    %3 = arith.muli %arg0, %2 : i32
    %4 = arith.addi %1, %3 : i32
    %c0_i32_0 = arith.constant 0 : i32
    %c0_i32_1 = arith.constant 0 : i32
    %c0_i32_2 = arith.constant 0 : i32
    return %arg0, %4, %c0_i32_0, %c0_i32_1 : i32, i32, i32, i32
  }
  func.func @transform_6(%arg0: i32, %arg1: i32, %arg2: memref<1xi32, #tpu.memory_space<smem>>) -> (i32, i32, i32) {
    %c0_i32 = arith.constant 0 : i32
    %c0_i32_0 = arith.constant 0 : i32
    %c0_i32_1 = arith.constant 0 : i32
    return %arg0, %c0_i32, %c0_i32_0 : i32, i32, i32
  }
  func.func @transform_7(%arg0: i32, %arg1: i32, %arg2: memref<1xi32, #tpu.memory_space<smem>>) -> (i32, i32, i32) {
    %c0_i32 = arith.constant 0 : i32
    %c0_i32_0 = arith.constant 0 : i32
    %c0_i32_1 = arith.constant 0 : i32
    return %arg0, %c0_i32, %c0_i32_0 : i32, i32, i32
  }
}

module attributes {stable_mosaic.version = 11 : i64} {
  func.func @_bilstm_chunk_kernel(%arg0: i32, %arg1: i32, %arg2: memref<1xi32, #tpu.memory_space<smem>>, %arg3: memref<8x2x128xbf16, #tpu.memory_space<vmem>>, %arg4: memref<2x1xi32, #tpu.memory_space<vmem>>, %arg5: memref<1x32x128xbf16, #tpu.memory_space<vmem>>, %arg6: memref<1x2x32xf32, #tpu.memory_space<vmem>>, %arg7: memref<1x2x32xf32, #tpu.memory_space<vmem>>, %arg8: memref<1x8x2x32xf32, #tpu.memory_space<vmem>>, %arg9: memref<1x2x32xf32, #tpu.memory_space<vmem>>, %arg10: memref<1x2x32xf32, #tpu.memory_space<vmem>>, %arg11: memref<2x32xf32, #tpu.memory_space<vmem>>, %arg12: memref<2x32xf32, #tpu.memory_space<vmem>>) attributes {dimension_semantics = [#tpu.dimension_semantics<parallel>, #tpu.dimension_semantics<arbitrary>], iteration_bounds = array<i64: 2, 1>, scalar_prefetch = 1 : i64, scratch_operands = 2 : i64, tpu.core_type = #tpu.core_type<tc>, window_params = [{transform_indices = @transform_0, window_bounds = array<i64: 8, 2, 128>}, {pipeline_mode = #tpu.pipeline_mode<synchronous>, transform_indices = @transform_1, window_bounds = array<i64: 2, 1>}, {transform_indices = @transform_2, window_bounds = array<i64: 1, 32, 128>}, {transform_indices = @transform_3, window_bounds = array<i64: 1, 2, 32>}, {transform_indices = @transform_4, window_bounds = array<i64: 1, 2, 32>}, {transform_indices = @transform_5, window_bounds = array<i64: 1, 8, 2, 32>}, {transform_indices = @transform_6, window_bounds = array<i64: 1, 2, 32>}, {transform_indices = @transform_7, window_bounds = array<i64: 1, 2, 32>}]} {
    %c0_i32 = arith.constant 0 : i32
    %0 = arith.cmpi eq, %arg1, %c0_i32 : i32
    %1 = arith.extui %0 : i1 to i32
    %c0_i32_0 = arith.constant 0 : i32
    %2 = arith.cmpi ne, %1, %c0_i32_0 : i32
    scf.if %2 {
      %c0_8 = arith.constant 0 : index
      %c0_9 = arith.constant 0 : index
      %c0_10 = arith.constant 0 : index
      %21 = vector.load %arg6[%c0_8, %c0_9, %c0_10] : memref<1x2x32xf32, #tpu.memory_space<vmem>>, vector<1x2x32xf32>
      %22 = vector.shape_cast %21 : vector<1x2x32xf32> to vector<2x32xf32>
      %c0_11 = arith.constant 0 : index
      %c0_12 = arith.constant 0 : index
      %23 = vector.load %arg11[%c0_11, %c0_12] : memref<2x32xf32, #tpu.memory_space<vmem>>, vector<2x32xf32>
      tpu.vector_store %arg11[%c0_11, %c0_12], %22 {strides = array<i32>} : memref<2x32xf32, #tpu.memory_space<vmem>>, vector<2x32xf32>,
      %c0_13 = arith.constant 0 : index
      %c0_14 = arith.constant 0 : index
      %c0_15 = arith.constant 0 : index
      %24 = vector.load %arg7[%c0_13, %c0_14, %c0_15] : memref<1x2x32xf32, #tpu.memory_space<vmem>>, vector<1x2x32xf32>
      %25 = vector.shape_cast %24 : vector<1x2x32xf32> to vector<2x32xf32>
      %c0_16 = arith.constant 0 : index
      %c0_17 = arith.constant 0 : index
      %26 = vector.load %arg12[%c0_16, %c0_17] : memref<2x32xf32, #tpu.memory_space<vmem>>, vector<2x32xf32>
      tpu.vector_store %arg12[%c0_16, %c0_17], %25 {strides = array<i32>} : memref<2x32xf32, #tpu.memory_space<vmem>>, vector<2x32xf32>,
    } else {
    }
    %c1_i32 = arith.constant 1 : i32
    %3 = arith.subi %c1_i32, %arg0 : i32
    %c8_i32 = arith.constant 8 : i32
    %4 = arith.muli %arg1, %c8_i32 : i32
    %5 = arith.muli %3, %4 : i32
    %c1_i32_1 = arith.constant 1 : i32
    %6 = arith.addi %arg1, %c1_i32_1 : i32
    %c8_i32_2 = arith.constant 8 : i32
    %7 = arith.muli %6, %c8_i32_2 : i32
    %c8_i32_3 = arith.constant 8 : i32
    %8 = arith.subi %c8_i32_3, %7 : i32
    %9 = arith.muli %arg0, %8 : i32
    %10 = arith.addi %5, %9 : i32
    %c0 = arith.constant 0 : index
    %11 = memref.load %arg2[%c0] : memref<1xi32, #tpu.memory_space<smem>>
    %12 = arith.cmpi slt, %10, %11 : i32
    %13 = arith.extui %12 : i1 to i32
    %c0_i32_4 = arith.constant 0 : i32
    %14 = arith.cmpi ne, %13, %c0_i32_4 : i32
    scf.if %14 {
      %c0_8 = arith.constant 0 : index
      %c0_9 = arith.constant 0 : index
      %21 = vector.load %arg4[%c0_8, %c0_9] : memref<2x1xi32, #tpu.memory_space<vmem>>, vector<2x1xi32>
      %c0_10 = arith.constant 0 : index
      %c0_11 = arith.constant 0 : index
      %c0_12 = arith.constant 0 : index
      %22 = vector.load %arg5[%c0_10, %c0_11, %c0_12] : memref<1x32x128xbf16, #tpu.memory_space<vmem>>, vector<1x32x128xbf16>
      %23 = vector.shape_cast %22 : vector<1x32x128xbf16> to vector<32x128xbf16>
      %c0_13 = arith.constant 0 : index
      %c0_14 = arith.constant 0 : index
      %24 = vector.load %arg11[%c0_13, %c0_14] : memref<2x32xf32, #tpu.memory_space<vmem>>, vector<2x32xf32>
      %c0_15 = arith.constant 0 : index
      %c0_16 = arith.constant 0 : index
      %25 = vector.load %arg12[%c0_15, %c0_16] : memref<2x32xf32, #tpu.memory_space<vmem>>, vector<2x32xf32>
      %c0_i32_17 = arith.constant 0 : i32
      %c1_i32_18 = arith.constant 1 : i32
      %26 = arith.subi %c1_i32_18, %arg0 : i32
      %27 = arith.muli %26, %c0_i32_17 : i32
      %c7_i32 = arith.constant 7 : i32
      %28 = arith.subi %c7_i32, %c0_i32_17 : i32
      %29 = arith.muli %arg0, %28 : i32
      %30 = arith.addi %27, %29 : i32
      %31 = arith.index_cast %30 : i32 to index
      %c0_19 = arith.constant 0 : index
      %c0_20 = arith.constant 0 : index
      %32 = vector.load %arg3[%31, %c0_19, %c0_20] : memref<8x2x128xbf16, #tpu.memory_space<vmem>>, vector<1x2x128xbf16>
      %33 = vector.shape_cast %32 : vector<1x2x128xbf16> to vector<2x128xbf16>
      %34 = arith.extf %33 : vector<2x128xbf16> to vector<2x128xf32>
      %35 = arith.truncf %24 : vector<2x32xf32> to vector<2x32xbf16>
      %cst = arith.constant dense<0.000000e+00> : vector<2x128xf32>
      %36 = tpu.matmul %35, %23, %cst {dimension_numbers = #tpu.dot_dimension_numbers<[1], [0], [0], [1], [0, 0, 1, 1], [], []>} : vector<2x32xbf16>, vector<32x128xbf16>, vector<2x128xf32> -> vector<2x128xf32>
      %37 = arith.addf %34, %36 : vector<2x128xf32>
      %38 = vector.extract_strided_slice %37 {offsets = [0, 0], sizes = [2, 32], strides = [1, 1]} : vector<2x128xf32> to vector<2x32xf32>
      %39 = arith.negf %38 : vector<2x32xf32>
      %40 = math.exp %39 : vector<2x32xf32>
      %cst_21 = arith.constant 1.000000e+00 : f32
      %41 = vector.broadcast %cst_21 : f32 to vector<2x32xf32>
      %42 = arith.addf %41, %40 : vector<2x32xf32>
      %43 = arith.divf %41, %42 : vector<2x32xf32>
      %44 = vector.extract_strided_slice %37 {offsets = [0, 32], sizes = [2, 32], strides = [1, 1]} : vector<2x128xf32> to vector<2x32xf32>
      %45 = arith.negf %44 : vector<2x32xf32>
      %46 = math.exp %45 : vector<2x32xf32>
      %cst_22 = arith.constant 1.000000e+00 : f32
      %47 = vector.broadcast %cst_22 : f32 to vector<2x32xf32>
      %48 = arith.addf %47, %46 : vector<2x32xf32>
      %49 = arith.divf %47, %48 : vector<2x32xf32>
      %50 = vector.extract_strided_slice %37 {offsets = [0, 64], sizes = [2, 32], strides = [1, 1]} : vector<2x128xf32> to vector<2x32xf32>
      %51 = math.tanh %50 : vector<2x32xf32>
      %52 = vector.extract_strided_slice %37 {offsets = [0, 96], sizes = [2, 32], strides = [1, 1]} : vector<2x128xf32> to vector<2x32xf32>
      %53 = arith.negf %52 : vector<2x32xf32>
      %54 = math.exp %53 : vector<2x32xf32>
      %cst_23 = arith.constant 1.000000e+00 : f32
      %55 = vector.broadcast %cst_23 : f32 to vector<2x32xf32>
      %56 = arith.addf %55, %54 : vector<2x32xf32>
      %57 = arith.divf %55, %56 : vector<2x32xf32>
      %58 = arith.mulf %49, %25 : vector<2x32xf32>
      %59 = arith.mulf %43, %51 : vector<2x32xf32>
      %60 = arith.addf %58, %59 : vector<2x32xf32>
      %61 = math.tanh %60 : vector<2x32xf32>
      %62 = arith.mulf %57, %61 : vector<2x32xf32>
      %c8_i32_24 = arith.constant 8 : i32
      %63 = arith.muli %arg1, %c8_i32_24 : i32
      %64 = arith.addi %63, %c0_i32_17 : i32
      %c1_i32_25 = arith.constant 1 : i32
      %65 = arith.subi %c1_i32_25, %arg0 : i32
      %66 = arith.muli %65, %64 : i32
      %c7_i32_26 = arith.constant 7 : i32
      %67 = arith.subi %c7_i32_26, %64 : i32
      %68 = arith.muli %arg0, %67 : i32
      %69 = arith.addi %66, %68 : i32
      %70 = vector.broadcast %69 : i32 to vector<2x1xi32>
      %71 = arith.cmpi slt, %70, %21 : vector<2x1xi32>
      %72 = vector.shape_cast %71 : vector<2x1xi1> to vector<2x1xi1>
      %73 = vector.broadcast %72 : vector<2x1xi1> to vector<2x32xi1>
      %74 = arith.select %73, %62, %24 : vector<2x32xi1>, vector<2x32xf32>
      %75 = vector.shape_cast %71 : vector<2x1xi1> to vector<2x1xi1>
      %76 = vector.broadcast %75 : vector<2x1xi1> to vector<2x32xi1>
      %77 = arith.select %76, %60, %25 : vector<2x32xi1>, vector<2x32xf32>
      %cst_27 = arith.constant 0.000000e+00 : f32
      %78 = vector.shape_cast %71 : vector<2x1xi1> to vector<2x1xi1>
      %79 = vector.broadcast %78 : vector<2x1xi1> to vector<2x32xi1>
      %80 = vector.broadcast %cst_27 : f32 to vector<2x32xf32>
      %81 = arith.select %79, %62, %80 : vector<2x32xi1>, vector<2x32xf32>
      %c0_28 = arith.constant 0 : index
      %82 = arith.index_cast %30 : i32 to index
      %c0_29 = arith.constant 0 : index
      %c0_30 = arith.constant 0 : index
      %83 = vector.load %arg8[%c0_28, %82, %c0_29, %c0_30] : memref<1x8x2x32xf32, #tpu.memory_space<vmem>>, vector<1x1x2x32xf32>
      %84 = vector.shape_cast %83 : vector<1x1x2x32xf32> to vector<2x32xf32>
      %85 = vector.shape_cast %81 : vector<2x32xf32> to vector<1x1x2x32xf32>
      tpu.vector_store %arg8[%c0_28, %82, %c0_29, %c0_30], %85 {strides = array<i32>} : memref<1x8x2x32xf32, #tpu.memory_space<vmem>>, vector<1x1x2x32xf32>,
      %c1_i32_31 = arith.constant 1 : i32
      %c1_i32_32 = arith.constant 1 : i32
      %86 = arith.subi %c1_i32_32, %arg0 : i32
      %87 = arith.muli %86, %c1_i32_31 : i32
      %c7_i32_33 = arith.constant 7 : i32
      %88 = arith.subi %c7_i32_33, %c1_i32_31 : i32
      %89 = arith.muli %arg0, %88 : i32
      %90 = arith.addi %87, %89 : i32
      %91 = arith.index_cast %90 : i32 to index
      %c0_34 = arith.constant 0 : index
      %c0_35 = arith.constant 0 : index
      %92 = vector.load %arg3[%91, %c0_34, %c0_35] : memref<8x2x128xbf16, #tpu.memory_space<vmem>>, vector<1x2x128xbf16>
      %93 = vector.shape_cast %92 : vector<1x2x128xbf16> to vector<2x128xbf16>
      %94 = arith.extf %93 : vector<2x128xbf16> to vector<2x128xf32>
      %95 = arith.truncf %74 : vector<2x32xf32> to vector<2x32xbf16>
      %cst_36 = arith.constant dense<0.000000e+00> : vector<2x128xf32>
      %96 = tpu.matmul %95, %23, %cst_36 {dimension_numbers = #tpu.dot_dimension_numbers<[1], [0], [0], [1], [0, 0, 1, 1], [], []>} : vector<2x32xbf16>, vector<32x128xbf16>, vector<2x128xf32> -> vector<2x128xf32>
      %97 = arith.addf %94, %96 : vector<2x128xf32>
      %98 = vector.extract_strided_slice %97 {offsets = [0, 0], sizes = [2, 32], strides = [1, 1]} : vector<2x128xf32> to vector<2x32xf32>
      %99 = arith.negf %98 : vector<2x32xf32>
      %100 = math.exp %99 : vector<2x32xf32>
      %cst_37 = arith.constant 1.000000e+00 : f32
      %101 = vector.broadcast %cst_37 : f32 to vector<2x32xf32>
      %102 = arith.addf %101, %100 : vector<2x32xf32>
      %103 = arith.divf %101, %102 : vector<2x32xf32>
      %104 = vector.extract_strided_slice %97 {offsets = [0, 32], sizes = [2, 32], strides = [1, 1]} : vector<2x128xf32> to vector<2x32xf32>
      %105 = arith.negf %104 : vector<2x32xf32>
      %106 = math.exp %105 : vector<2x32xf32>
      %cst_38 = arith.constant 1.000000e+00 : f32
      %107 = vector.broadcast %cst_38 : f32 to vector<2x32xf32>
      %108 = arith.addf %107, %106 : vector<2x32xf32>
      %109 = arith.divf %107, %108 : vector<2x32xf32>
      %110 = vector.extract_strided_slice %97 {offsets = [0, 64], sizes = [2, 32], strides = [1, 1]} : vector<2x128xf32> to vector<2x32xf32>
      %111 = math.tanh %110 : vector<2x32xf32>
      %112 = vector.extract_strided_slice %97 {offsets = [0, 96], sizes = [2, 32], strides = [1, 1]} : vector<2x128xf32> to vector<2x32xf32>
      %113 = arith.negf %112 : vector<2x32xf32>
      %114 = math.exp %113 : vector<2x32xf32>
      %cst_39 = arith.constant 1.000000e+00 : f32
      %115 = vector.broadcast %cst_39 : f32 to vector<2x32xf32>
      %116 = arith.addf %115, %114 : vector<2x32xf32>
      %117 = arith.divf %115, %116 : vector<2x32xf32>
      %118 = arith.mulf %109, %77 : vector<2x32xf32>
      %119 = arith.mulf %103, %111 : vector<2x32xf32>
      %120 = arith.addf %118, %119 : vector<2x32xf32>
      %121 = math.tanh %120 : vector<2x32xf32>
      %122 = arith.mulf %117, %121 : vector<2x32xf32>
      %c8_i32_40 = arith.constant 8 : i32
      %123 = arith.muli %arg1, %c8_i32_40 : i32
      %124 = arith.addi %123, %c1_i32_31 : i32
      %c1_i32_41 = arith.constant 1 : i32
      %125 = arith.subi %c1_i32_41, %arg0 : i32
      %126 = arith.muli %125, %124 : i32
      %c7_i32_42 = arith.constant 7 : i32
      %127 = arith.subi %c7_i32_42, %124 : i32
      %128 = arith.muli %arg0, %127 : i32
      %129 = arith.addi %126, %128 : i32
      %130 = vector.broadcast %129 : i32 to vector<2x1xi32>
      %131 = arith.cmpi slt, %130, %21 : vector<2x1xi32>
      %132 = vector.shape_cast %131 : vector<2x1xi1> to vector<2x1xi1>
      %133 = vector.broadcast %132 : vector<2x1xi1> to vector<2x32xi1>
      %134 = arith.select %133, %122, %74 : vector<2x32xi1>, vector<2x32xf32>
      %135 = vector.shape_cast %131 : vector<2x1xi1> to vector<2x1xi1>
      %136 = vector.broadcast %135 : vector<2x1xi1> to vector<2x32xi1>
      %137 = arith.select %136, %120, %77 : vector<2x32xi1>, vector<2x32xf32>
      %cst_43 = arith.constant 0.000000e+00 : f32
      %138 = vector.shape_cast %131 : vector<2x1xi1> to vector<2x1xi1>
      %139 = vector.broadcast %138 : vector<2x1xi1> to vector<2x32xi1>
      %140 = vector.broadcast %cst_43 : f32 to vector<2x32xf32>
      %141 = arith.select %139, %122, %140 : vector<2x32xi1>, vector<2x32xf32>
      %c0_44 = arith.constant 0 : index
      %142 = arith.index_cast %90 : i32 to index
      %c0_45 = arith.constant 0 : index
      %c0_46 = arith.constant 0 : index
      %143 = vector.load %arg8[%c0_44, %142, %c0_45, %c0_46] : memref<1x8x2x32xf32, #tpu.memory_space<vmem>>, vector<1x1x2x32xf32>
      %144 = vector.shape_cast %143 : vector<1x1x2x32xf32> to vector<2x32xf32>
      %145 = vector.shape_cast %141 : vector<2x32xf32> to vector<1x1x2x32xf32>
      tpu.vector_store %arg8[%c0_44, %142, %c0_45, %c0_46], %145 {strides = array<i32>} : memref<1x8x2x32xf32, #tpu.memory_space<vmem>>, vector<1x1x2x32xf32>,
      %c2_i32 = arith.constant 2 : i32
      %c1_i32_47 = arith.constant 1 : i32
      %146 = arith.subi %c1_i32_47, %arg0 : i32
      %147 = arith.muli %146, %c2_i32 : i32
      %c7_i32_48 = arith.constant 7 : i32
      %148 = arith.subi %c7_i32_48, %c2_i32 : i32
      %149 = arith.muli %arg0, %148 : i32
      %150 = arith.addi %147, %149 : i32
      %151 = arith.index_cast %150 : i32 to index
      %c0_49 = arith.constant 0 : index
      %c0_50 = arith.constant 0 : index
      %152 = vector.load %arg3[%151, %c0_49, %c0_50] : memref<8x2x128xbf16, #tpu.memory_space<vmem>>, vector<1x2x128xbf16>
      %153 = vector.shape_cast %152 : vector<1x2x128xbf16> to vector<2x128xbf16>
      %154 = arith.extf %153 : vector<2x128xbf16> to vector<2x128xf32>
      %155 = arith.truncf %134 : vector<2x32xf32> to vector<2x32xbf16>
      %cst_51 = arith.constant dense<0.000000e+00> : vector<2x128xf32>
      %156 = tpu.matmul %155, %23, %cst_51 {dimension_numbers = #tpu.dot_dimension_numbers<[1], [0], [0], [1], [0, 0, 1, 1], [], []>} : vector<2x32xbf16>, vector<32x128xbf16>, vector<2x128xf32> -> vector<2x128xf32>
      %157 = arith.addf %154, %156 : vector<2x128xf32>
      %158 = vector.extract_strided_slice %157 {offsets = [0, 0], sizes = [2, 32], strides = [1, 1]} : vector<2x128xf32> to vector<2x32xf32>
      %159 = arith.negf %158 : vector<2x32xf32>
      %160 = math.exp %159 : vector<2x32xf32>
      %cst_52 = arith.constant 1.000000e+00 : f32
      %161 = vector.broadcast %cst_52 : f32 to vector<2x32xf32>
      %162 = arith.addf %161, %160 : vector<2x32xf32>
      %163 = arith.divf %161, %162 : vector<2x32xf32>
      %164 = vector.extract_strided_slice %157 {offsets = [0, 32], sizes = [2, 32], strides = [1, 1]} : vector<2x128xf32> to vector<2x32xf32>
      %165 = arith.negf %164 : vector<2x32xf32>
      %166 = math.exp %165 : vector<2x32xf32>
      %cst_53 = arith.constant 1.000000e+00 : f32
      %167 = vector.broadcast %cst_53 : f32 to vector<2x32xf32>
      %168 = arith.addf %167, %166 : vector<2x32xf32>
      %169 = arith.divf %167, %168 : vector<2x32xf32>
      %170 = vector.extract_strided_slice %157 {offsets = [0, 64], sizes = [2, 32], strides = [1, 1]} : vector<2x128xf32> to vector<2x32xf32>
      %171 = math.tanh %170 : vector<2x32xf32>
      %172 = vector.extract_strided_slice %157 {offsets = [0, 96], sizes = [2, 32], strides = [1, 1]} : vector<2x128xf32> to vector<2x32xf32>
      %173 = arith.negf %172 : vector<2x32xf32>
      %174 = math.exp %173 : vector<2x32xf32>
      %cst_54 = arith.constant 1.000000e+00 : f32
      %175 = vector.broadcast %cst_54 : f32 to vector<2x32xf32>
      %176 = arith.addf %175, %174 : vector<2x32xf32>
      %177 = arith.divf %175, %176 : vector<2x32xf32>
      %178 = arith.mulf %169, %137 : vector<2x32xf32>
      %179 = arith.mulf %163, %171 : vector<2x32xf32>
      %180 = arith.addf %178, %179 : vector<2x32xf32>
      %181 = math.tanh %180 : vector<2x32xf32>
      %182 = arith.mulf %177, %181 : vector<2x32xf32>
      %c8_i32_55 = arith.constant 8 : i32
      %183 = arith.muli %arg1, %c8_i32_55 : i32
      %184 = arith.addi %183, %c2_i32 : i32
      %c1_i32_56 = arith.constant 1 : i32
      %185 = arith.subi %c1_i32_56, %arg0 : i32
      %186 = arith.muli %185, %184 : i32
      %c7_i32_57 = arith.constant 7 : i32
      %187 = arith.subi %c7_i32_57, %184 : i32
      %188 = arith.muli %arg0, %187 : i32
      %189 = arith.addi %186, %188 : i32
      %190 = vector.broadcast %189 : i32 to vector<2x1xi32>
      %191 = arith.cmpi slt, %190, %21 : vector<2x1xi32>
      %192 = vector.shape_cast %191 : vector<2x1xi1> to vector<2x1xi1>
      %193 = vector.broadcast %192 : vector<2x1xi1> to vector<2x32xi1>
      %194 = arith.select %193, %182, %134 : vector<2x32xi1>, vector<2x32xf32>
      %195 = vector.shape_cast %191 : vector<2x1xi1> to vector<2x1xi1>
      %196 = vector.broadcast %195 : vector<2x1xi1> to vector<2x32xi1>
      %197 = arith.select %196, %180, %137 : vector<2x32xi1>, vector<2x32xf32>
      %cst_58 = arith.constant 0.000000e+00 : f32
      %198 = vector.shape_cast %191 : vector<2x1xi1> to vector<2x1xi1>
      %199 = vector.broadcast %198 : vector<2x1xi1> to vector<2x32xi1>
      %200 = vector.broadcast %cst_58 : f32 to vector<2x32xf32>
      %201 = arith.select %199, %182, %200 : vector<2x32xi1>, vector<2x32xf32>
      %c0_59 = arith.constant 0 : index
      %202 = arith.index_cast %150 : i32 to index
      %c0_60 = arith.constant 0 : index
      %c0_61 = arith.constant 0 : index
      %203 = vector.load %arg8[%c0_59, %202, %c0_60, %c0_61] : memref<1x8x2x32xf32, #tpu.memory_space<vmem>>, vector<1x1x2x32xf32>
      %204 = vector.shape_cast %203 : vector<1x1x2x32xf32> to vector<2x32xf32>
      %205 = vector.shape_cast %201 : vector<2x32xf32> to vector<1x1x2x32xf32>
      tpu.vector_store %arg8[%c0_59, %202, %c0_60, %c0_61], %205 {strides = array<i32>} : memref<1x8x2x32xf32, #tpu.memory_space<vmem>>, vector<1x1x2x32xf32>,
      %c3_i32 = arith.constant 3 : i32
      %c1_i32_62 = arith.constant 1 : i32
      %206 = arith.subi %c1_i32_62, %arg0 : i32
      %207 = arith.muli %206, %c3_i32 : i32
      %c7_i32_63 = arith.constant 7 : i32
      %208 = arith.subi %c7_i32_63, %c3_i32 : i32
      %209 = arith.muli %arg0, %208 : i32
      %210 = arith.addi %207, %209 : i32
      %211 = arith.index_cast %210 : i32 to index
      %c0_64 = arith.constant 0 : index
      %c0_65 = arith.constant 0 : index
      %212 = vector.load %arg3[%211, %c0_64, %c0_65] : memref<8x2x128xbf16, #tpu.memory_space<vmem>>, vector<1x2x128xbf16>
      %213 = vector.shape_cast %212 : vector<1x2x128xbf16> to vector<2x128xbf16>
      %214 = arith.extf %213 : vector<2x128xbf16> to vector<2x128xf32>
      %215 = arith.truncf %194 : vector<2x32xf32> to vector<2x32xbf16>
      %cst_66 = arith.constant dense<0.000000e+00> : vector<2x128xf32>
      %216 = tpu.matmul %215, %23, %cst_66 {dimension_numbers = #tpu.dot_dimension_numbers<[1], [0], [0], [1], [0, 0, 1, 1], [], []>} : vector<2x32xbf16>, vector<32x128xbf16>, vector<2x128xf32> -> vector<2x128xf32>
      %217 = arith.addf %214, %216 : vector<2x128xf32>
      %218 = vector.extract_strided_slice %217 {offsets = [0, 0], sizes = [2, 32], strides = [1, 1]} : vector<2x128xf32> to vector<2x32xf32>
      %219 = arith.negf %218 : vector<2x32xf32>
      %220 = math.exp %219 : vector<2x32xf32>
      %cst_67 = arith.constant 1.000000e+00 : f32
      %221 = vector.broadcast %cst_67 : f32 to vector<2x32xf32>
      %222 = arith.addf %221, %220 : vector<2x32xf32>
      %223 = arith.divf %221, %222 : vector<2x32xf32>
      %224 = vector.extract_strided_slice %217 {offsets = [0, 32], sizes = [2, 32], strides = [1, 1]} : vector<2x128xf32> to vector<2x32xf32>
      %225 = arith.negf %224 : vector<2x32xf32>
      %226 = math.exp %225 : vector<2x32xf32>
      %cst_68 = arith.constant 1.000000e+00 : f32
      %227 = vector.broadcast %cst_68 : f32 to vector<2x32xf32>
      %228 = arith.addf %227, %226 : vector<2x32xf32>
      %229 = arith.divf %227, %228 : vector<2x32xf32>
      %230 = vector.extract_strided_slice %217 {offsets = [0, 64], sizes = [2, 32], strides = [1, 1]} : vector<2x128xf32> to vector<2x32xf32>
      %231 = math.tanh %230 : vector<2x32xf32>
      %232 = vector.extract_strided_slice %217 {offsets = [0, 96], sizes = [2, 32], strides = [1, 1]} : vector<2x128xf32> to vector<2x32xf32>
      %233 = arith.negf %232 : vector<2x32xf32>
      %234 = math.exp %233 : vector<2x32xf32>
      %cst_69 = arith.constant 1.000000e+00 : f32
      %235 = vector.broadcast %cst_69 : f32 to vector<2x32xf32>
      %236 = arith.addf %235, %234 : vector<2x32xf32>
      %237 = arith.divf %235, %236 : vector<2x32xf32>
      %238 = arith.mulf %229, %197 : vector<2x32xf32>
      %239 = arith.mulf %223, %231 : vector<2x32xf32>
      %240 = arith.addf %238, %239 : vector<2x32xf32>
      %241 = math.tanh %240 : vector<2x32xf32>
      %242 = arith.mulf %237, %241 : vector<2x32xf32>
      %c8_i32_70 = arith.constant 8 : i32
      %243 = arith.muli %arg1, %c8_i32_70 : i32
      %244 = arith.addi %243, %c3_i32 : i32
      %c1_i32_71 = arith.constant 1 : i32
      %245 = arith.subi %c1_i32_71, %arg0 : i32
      %246 = arith.muli %245, %244 : i32
      %c7_i32_72 = arith.constant 7 : i32
      %247 = arith.subi %c7_i32_72, %244 : i32
      %248 = arith.muli %arg0, %247 : i32
      %249 = arith.addi %246, %248 : i32
      %250 = vector.broadcast %249 : i32 to vector<2x1xi32>
      %251 = arith.cmpi slt, %250, %21 : vector<2x1xi32>
      %252 = vector.shape_cast %251 : vector<2x1xi1> to vector<2x1xi1>
      %253 = vector.broadcast %252 : vector<2x1xi1> to vector<2x32xi1>
      %254 = arith.select %253, %242, %194 : vector<2x32xi1>, vector<2x32xf32>
      %255 = vector.shape_cast %251 : vector<2x1xi1> to vector<2x1xi1>
      %256 = vector.broadcast %255 : vector<2x1xi1> to vector<2x32xi1>
      %257 = arith.select %256, %240, %197 : vector<2x32xi1>, vector<2x32xf32>
      %cst_73 = arith.constant 0.000000e+00 : f32
      %258 = vector.shape_cast %251 : vector<2x1xi1> to vector<2x1xi1>
      %259 = vector.broadcast %258 : vector<2x1xi1> to vector<2x32xi1>
      %260 = vector.broadcast %cst_73 : f32 to vector<2x32xf32>
      %261 = arith.select %259, %242, %260 : vector<2x32xi1>, vector<2x32xf32>
      %c0_74 = arith.constant 0 : index
      %262 = arith.index_cast %210 : i32 to index
      %c0_75 = arith.constant 0 : index
      %c0_76 = arith.constant 0 : index
      %263 = vector.load %arg8[%c0_74, %262, %c0_75, %c0_76] : memref<1x8x2x32xf32, #tpu.memory_space<vmem>>, vector<1x1x2x32xf32>
      %264 = vector.shape_cast %263 : vector<1x1x2x32xf32> to vector<2x32xf32>
      %265 = vector.shape_cast %261 : vector<2x32xf32> to vector<1x1x2x32xf32>
      tpu.vector_store %arg8[%c0_74, %262, %c0_75, %c0_76], %265 {strides = array<i32>} : memref<1x8x2x32xf32, #tpu.memory_space<vmem>>, vector<1x1x2x32xf32>,
      %c4_i32 = arith.constant 4 : i32
      %c1_i32_77 = arith.constant 1 : i32
      %266 = arith.subi %c1_i32_77, %arg0 : i32
      %267 = arith.muli %266, %c4_i32 : i32
      %c7_i32_78 = arith.constant 7 : i32
      %268 = arith.subi %c7_i32_78, %c4_i32 : i32
      %269 = arith.muli %arg0, %268 : i32
      %270 = arith.addi %267, %269 : i32
      %271 = arith.index_cast %270 : i32 to index
      %c0_79 = arith.constant 0 : index
      %c0_80 = arith.constant 0 : index
      %272 = vector.load %arg3[%271, %c0_79, %c0_80] : memref<8x2x128xbf16, #tpu.memory_space<vmem>>, vector<1x2x128xbf16>
      %273 = vector.shape_cast %272 : vector<1x2x128xbf16> to vector<2x128xbf16>
      %274 = arith.extf %273 : vector<2x128xbf16> to vector<2x128xf32>
      %275 = arith.truncf %254 : vector<2x32xf32> to vector<2x32xbf16>
      %cst_81 = arith.constant dense<0.000000e+00> : vector<2x128xf32>
      %276 = tpu.matmul %275, %23, %cst_81 {dimension_numbers = #tpu.dot_dimension_numbers<[1], [0], [0], [1], [0, 0, 1, 1], [], []>} : vector<2x32xbf16>, vector<32x128xbf16>, vector<2x128xf32> -> vector<2x128xf32>
      %277 = arith.addf %274, %276 : vector<2x128xf32>
      %278 = vector.extract_strided_slice %277 {offsets = [0, 0], sizes = [2, 32], strides = [1, 1]} : vector<2x128xf32> to vector<2x32xf32>
      %279 = arith.negf %278 : vector<2x32xf32>
      %280 = math.exp %279 : vector<2x32xf32>
      %cst_82 = arith.constant 1.000000e+00 : f32
      %281 = vector.broadcast %cst_82 : f32 to vector<2x32xf32>
      %282 = arith.addf %281, %280 : vector<2x32xf32>
      %283 = arith.divf %281, %282 : vector<2x32xf32>
      %284 = vector.extract_strided_slice %277 {offsets = [0, 32], sizes = [2, 32], strides = [1, 1]} : vector<2x128xf32> to vector<2x32xf32>
      %285 = arith.negf %284 : vector<2x32xf32>
      %286 = math.exp %285 : vector<2x32xf32>
      %cst_83 = arith.constant 1.000000e+00 : f32
      %287 = vector.broadcast %cst_83 : f32 to vector<2x32xf32>
      %288 = arith.addf %287, %286 : vector<2x32xf32>
      %289 = arith.divf %287, %288 : vector<2x32xf32>
      %290 = vector.extract_strided_slice %277 {offsets = [0, 64], sizes = [2, 32], strides = [1, 1]} : vector<2x128xf32> to vector<2x32xf32>
      %291 = math.tanh %290 : vector<2x32xf32>
      %292 = vector.extract_strided_slice %277 {offsets = [0, 96], sizes = [2, 32], strides = [1, 1]} : vector<2x128xf32> to vector<2x32xf32>
      %293 = arith.negf %292 : vector<2x32xf32>
      %294 = math.exp %293 : vector<2x32xf32>
      %cst_84 = arith.constant 1.000000e+00 : f32
      %295 = vector.broadcast %cst_84 : f32 to vector<2x32xf32>
      %296 = arith.addf %295, %294 : vector<2x32xf32>
      %297 = arith.divf %295, %296 : vector<2x32xf32>
      %298 = arith.mulf %289, %257 : vector<2x32xf32>
      %299 = arith.mulf %283, %291 : vector<2x32xf32>
      %300 = arith.addf %298, %299 : vector<2x32xf32>
      %301 = math.tanh %300 : vector<2x32xf32>
      %302 = arith.mulf %297, %301 : vector<2x32xf32>
      %c8_i32_85 = arith.constant 8 : i32
      %303 = arith.muli %arg1, %c8_i32_85 : i32
      %304 = arith.addi %303, %c4_i32 : i32
      %c1_i32_86 = arith.constant 1 : i32
      %305 = arith.subi %c1_i32_86, %arg0 : i32
      %306 = arith.muli %305, %304 : i32
      %c7_i32_87 = arith.constant 7 : i32
      %307 = arith.subi %c7_i32_87, %304 : i32
      %308 = arith.muli %arg0, %307 : i32
      %309 = arith.addi %306, %308 : i32
      %310 = vector.broadcast %309 : i32 to vector<2x1xi32>
      %311 = arith.cmpi slt, %310, %21 : vector<2x1xi32>
      %312 = vector.shape_cast %311 : vector<2x1xi1> to vector<2x1xi1>
      %313 = vector.broadcast %312 : vector<2x1xi1> to vector<2x32xi1>
      %314 = arith.select %313, %302, %254 : vector<2x32xi1>, vector<2x32xf32>
      %315 = vector.shape_cast %311 : vector<2x1xi1> to vector<2x1xi1>
      %316 = vector.broadcast %315 : vector<2x1xi1> to vector<2x32xi1>
      %317 = arith.select %316, %300, %257 : vector<2x32xi1>, vector<2x32xf32>
      %cst_88 = arith.constant 0.000000e+00 : f32
      %318 = vector.shape_cast %311 : vector<2x1xi1> to vector<2x1xi1>
      %319 = vector.broadcast %318 : vector<2x1xi1> to vector<2x32xi1>
      %320 = vector.broadcast %cst_88 : f32 to vector<2x32xf32>
      %321 = arith.select %319, %302, %320 : vector<2x32xi1>, vector<2x32xf32>
      %c0_89 = arith.constant 0 : index
      %322 = arith.index_cast %270 : i32 to index
      %c0_90 = arith.constant 0 : index
      %c0_91 = arith.constant 0 : index
      %323 = vector.load %arg8[%c0_89, %322, %c0_90, %c0_91] : memref<1x8x2x32xf32, #tpu.memory_space<vmem>>, vector<1x1x2x32xf32>
      %324 = vector.shape_cast %323 : vector<1x1x2x32xf32> to vector<2x32xf32>
      %325 = vector.shape_cast %321 : vector<2x32xf32> to vector<1x1x2x32xf32>
      tpu.vector_store %arg8[%c0_89, %322, %c0_90, %c0_91], %325 {strides = array<i32>} : memref<1x8x2x32xf32, #tpu.memory_space<vmem>>, vector<1x1x2x32xf32>,
      %c5_i32 = arith.constant 5 : i32
      %c1_i32_92 = arith.constant 1 : i32
      %326 = arith.subi %c1_i32_92, %arg0 : i32
      %327 = arith.muli %326, %c5_i32 : i32
      %c7_i32_93 = arith.constant 7 : i32
      %328 = arith.subi %c7_i32_93, %c5_i32 : i32
      %329 = arith.muli %arg0, %328 : i32
      %330 = arith.addi %327, %329 : i32
      %331 = arith.index_cast %330 : i32 to index
      %c0_94 = arith.constant 0 : index
      %c0_95 = arith.constant 0 : index
      %332 = vector.load %arg3[%331, %c0_94, %c0_95] : memref<8x2x128xbf16, #tpu.memory_space<vmem>>, vector<1x2x128xbf16>
      %333 = vector.shape_cast %332 : vector<1x2x128xbf16> to vector<2x128xbf16>
      %334 = arith.extf %333 : vector<2x128xbf16> to vector<2x128xf32>
      %335 = arith.truncf %314 : vector<2x32xf32> to vector<2x32xbf16>
      %cst_96 = arith.constant dense<0.000000e+00> : vector<2x128xf32>
      %336 = tpu.matmul %335, %23, %cst_96 {dimension_numbers = #tpu.dot_dimension_numbers<[1], [0], [0], [1], [0, 0, 1, 1], [], []>} : vector<2x32xbf16>, vector<32x128xbf16>, vector<2x128xf32> -> vector<2x128xf32>
      %337 = arith.addf %334, %336 : vector<2x128xf32>
      %338 = vector.extract_strided_slice %337 {offsets = [0, 0], sizes = [2, 32], strides = [1, 1]} : vector<2x128xf32> to vector<2x32xf32>
      %339 = arith.negf %338 : vector<2x32xf32>
      %340 = math.exp %339 : vector<2x32xf32>
      %cst_97 = arith.constant 1.000000e+00 : f32
      %341 = vector.broadcast %cst_97 : f32 to vector<2x32xf32>
      %342 = arith.addf %341, %340 : vector<2x32xf32>
      %343 = arith.divf %341, %342 : vector<2x32xf32>
      %344 = vector.extract_strided_slice %337 {offsets = [0, 32], sizes = [2, 32], strides = [1, 1]} : vector<2x128xf32> to vector<2x32xf32>
      %345 = arith.negf %344 : vector<2x32xf32>
      %346 = math.exp %345 : vector<2x32xf32>
      %cst_98 = arith.constant 1.000000e+00 : f32
      %347 = vector.broadcast %cst_98 : f32 to vector<2x32xf32>
      %348 = arith.addf %347, %346 : vector<2x32xf32>
      %349 = arith.divf %347, %348 : vector<2x32xf32>
      %350 = vector.extract_strided_slice %337 {offsets = [0, 64], sizes = [2, 32], strides = [1, 1]} : vector<2x128xf32> to vector<2x32xf32>
      %351 = math.tanh %350 : vector<2x32xf32>
      %352 = vector.extract_strided_slice %337 {offsets = [0, 96], sizes = [2, 32], strides = [1, 1]} : vector<2x128xf32> to vector<2x32xf32>
      %353 = arith.negf %352 : vector<2x32xf32>
      %354 = math.exp %353 : vector<2x32xf32>
      %cst_99 = arith.constant 1.000000e+00 : f32
      %355 = vector.broadcast %cst_99 : f32 to vector<2x32xf32>
      %356 = arith.addf %355, %354 : vector<2x32xf32>
      %357 = arith.divf %355, %356 : vector<2x32xf32>
      %358 = arith.mulf %349, %317 : vector<2x32xf32>
      %359 = arith.mulf %343, %351 : vector<2x32xf32>
      %360 = arith.addf %358, %359 : vector<2x32xf32>
      %361 = math.tanh %360 : vector<2x32xf32>
      %362 = arith.mulf %357, %361 : vector<2x32xf32>
      %c8_i32_100 = arith.constant 8 : i32
      %363 = arith.muli %arg1, %c8_i32_100 : i32
      %364 = arith.addi %363, %c5_i32 : i32
      %c1_i32_101 = arith.constant 1 : i32
      %365 = arith.subi %c1_i32_101, %arg0 : i32
      %366 = arith.muli %365, %364 : i32
      %c7_i32_102 = arith.constant 7 : i32
      %367 = arith.subi %c7_i32_102, %364 : i32
      %368 = arith.muli %arg0, %367 : i32
      %369 = arith.addi %366, %368 : i32
      %370 = vector.broadcast %369 : i32 to vector<2x1xi32>
      %371 = arith.cmpi slt, %370, %21 : vector<2x1xi32>
      %372 = vector.shape_cast %371 : vector<2x1xi1> to vector<2x1xi1>
      %373 = vector.broadcast %372 : vector<2x1xi1> to vector<2x32xi1>
      %374 = arith.select %373, %362, %314 : vector<2x32xi1>, vector<2x32xf32>
      %375 = vector.shape_cast %371 : vector<2x1xi1> to vector<2x1xi1>
      %376 = vector.broadcast %375 : vector<2x1xi1> to vector<2x32xi1>
      %377 = arith.select %376, %360, %317 : vector<2x32xi1>, vector<2x32xf32>
      %cst_103 = arith.constant 0.000000e+00 : f32
      %378 = vector.shape_cast %371 : vector<2x1xi1> to vector<2x1xi1>
      %379 = vector.broadcast %378 : vector<2x1xi1> to vector<2x32xi1>
      %380 = vector.broadcast %cst_103 : f32 to vector<2x32xf32>
      %381 = arith.select %379, %362, %380 : vector<2x32xi1>, vector<2x32xf32>
      %c0_104 = arith.constant 0 : index
      %382 = arith.index_cast %330 : i32 to index
      %c0_105 = arith.constant 0 : index
      %c0_106 = arith.constant 0 : index
      %383 = vector.load %arg8[%c0_104, %382, %c0_105, %c0_106] : memref<1x8x2x32xf32, #tpu.memory_space<vmem>>, vector<1x1x2x32xf32>
      %384 = vector.shape_cast %383 : vector<1x1x2x32xf32> to vector<2x32xf32>
      %385 = vector.shape_cast %381 : vector<2x32xf32> to vector<1x1x2x32xf32>
      tpu.vector_store %arg8[%c0_104, %382, %c0_105, %c0_106], %385 {strides = array<i32>} : memref<1x8x2x32xf32, #tpu.memory_space<vmem>>, vector<1x1x2x32xf32>,
      %c6_i32 = arith.constant 6 : i32
      %c1_i32_107 = arith.constant 1 : i32
      %386 = arith.subi %c1_i32_107, %arg0 : i32
      %387 = arith.muli %386, %c6_i32 : i32
      %c7_i32_108 = arith.constant 7 : i32
      %388 = arith.subi %c7_i32_108, %c6_i32 : i32
      %389 = arith.muli %arg0, %388 : i32
      %390 = arith.addi %387, %389 : i32
      %391 = arith.index_cast %390 : i32 to index
      %c0_109 = arith.constant 0 : index
      %c0_110 = arith.constant 0 : index
      %392 = vector.load %arg3[%391, %c0_109, %c0_110] : memref<8x2x128xbf16, #tpu.memory_space<vmem>>, vector<1x2x128xbf16>
      %393 = vector.shape_cast %392 : vector<1x2x128xbf16> to vector<2x128xbf16>
      %394 = arith.extf %393 : vector<2x128xbf16> to vector<2x128xf32>
      %395 = arith.truncf %374 : vector<2x32xf32> to vector<2x32xbf16>
      %cst_111 = arith.constant dense<0.000000e+00> : vector<2x128xf32>
      %396 = tpu.matmul %395, %23, %cst_111 {dimension_numbers = #tpu.dot_dimension_numbers<[1], [0], [0], [1], [0, 0, 1, 1], [], []>} : vector<2x32xbf16>, vector<32x128xbf16>, vector<2x128xf32> -> vector<2x128xf32>
      %397 = arith.addf %394, %396 : vector<2x128xf32>
      %398 = vector.extract_strided_slice %397 {offsets = [0, 0], sizes = [2, 32], strides = [1, 1]} : vector<2x128xf32> to vector<2x32xf32>
      %399 = arith.negf %398 : vector<2x32xf32>
      %400 = math.exp %399 : vector<2x32xf32>
      %cst_112 = arith.constant 1.000000e+00 : f32
      %401 = vector.broadcast %cst_112 : f32 to vector<2x32xf32>
      %402 = arith.addf %401, %400 : vector<2x32xf32>
      %403 = arith.divf %401, %402 : vector<2x32xf32>
      %404 = vector.extract_strided_slice %397 {offsets = [0, 32], sizes = [2, 32], strides = [1, 1]} : vector<2x128xf32> to vector<2x32xf32>
      %405 = arith.negf %404 : vector<2x32xf32>
      %406 = math.exp %405 : vector<2x32xf32>
      %cst_113 = arith.constant 1.000000e+00 : f32
      %407 = vector.broadcast %cst_113 : f32 to vector<2x32xf32>
      %408 = arith.addf %407, %406 : vector<2x32xf32>
      %409 = arith.divf %407, %408 : vector<2x32xf32>
      %410 = vector.extract_strided_slice %397 {offsets = [0, 64], sizes = [2, 32], strides = [1, 1]} : vector<2x128xf32> to vector<2x32xf32>
      %411 = math.tanh %410 : vector<2x32xf32>
      %412 = vector.extract_strided_slice %397 {offsets = [0, 96], sizes = [2, 32], strides = [1, 1]} : vector<2x128xf32> to vector<2x32xf32>
      %413 = arith.negf %412 : vector<2x32xf32>
      %414 = math.exp %413 : vector<2x32xf32>
      %cst_114 = arith.constant 1.000000e+00 : f32
      %415 = vector.broadcast %cst_114 : f32 to vector<2x32xf32>
      %416 = arith.addf %415, %414 : vector<2x32xf32>
      %417 = arith.divf %415, %416 : vector<2x32xf32>
      %418 = arith.mulf %409, %377 : vector<2x32xf32>
      %419 = arith.mulf %403, %411 : vector<2x32xf32>
      %420 = arith.addf %418, %419 : vector<2x32xf32>
      %421 = math.tanh %420 : vector<2x32xf32>
      %422 = arith.mulf %417, %421 : vector<2x32xf32>
      %c8_i32_115 = arith.constant 8 : i32
      %423 = arith.muli %arg1, %c8_i32_115 : i32
      %424 = arith.addi %423, %c6_i32 : i32
      %c1_i32_116 = arith.constant 1 : i32
      %425 = arith.subi %c1_i32_116, %arg0 : i32
      %426 = arith.muli %425, %424 : i32
      %c7_i32_117 = arith.constant 7 : i32
      %427 = arith.subi %c7_i32_117, %424 : i32
      %428 = arith.muli %arg0, %427 : i32
      %429 = arith.addi %426, %428 : i32
      %430 = vector.broadcast %429 : i32 to vector<2x1xi32>
      %431 = arith.cmpi slt, %430, %21 : vector<2x1xi32>
      %432 = vector.shape_cast %431 : vector<2x1xi1> to vector<2x1xi1>
      %433 = vector.broadcast %432 : vector<2x1xi1> to vector<2x32xi1>
      %434 = arith.select %433, %422, %374 : vector<2x32xi1>, vector<2x32xf32>
      %435 = vector.shape_cast %431 : vector<2x1xi1> to vector<2x1xi1>
      %436 = vector.broadcast %435 : vector<2x1xi1> to vector<2x32xi1>
      %437 = arith.select %436, %420, %377 : vector<2x32xi1>, vector<2x32xf32>
      %cst_118 = arith.constant 0.000000e+00 : f32
      %438 = vector.shape_cast %431 : vector<2x1xi1> to vector<2x1xi1>
      %439 = vector.broadcast %438 : vector<2x1xi1> to vector<2x32xi1>
      %440 = vector.broadcast %cst_118 : f32 to vector<2x32xf32>
      %441 = arith.select %439, %422, %440 : vector<2x32xi1>, vector<2x32xf32>
      %c0_119 = arith.constant 0 : index
      %442 = arith.index_cast %390 : i32 to index
      %c0_120 = arith.constant 0 : index
      %c0_121 = arith.constant 0 : index
      %443 = vector.load %arg8[%c0_119, %442, %c0_120, %c0_121] : memref<1x8x2x32xf32, #tpu.memory_space<vmem>>, vector<1x1x2x32xf32>
      %444 = vector.shape_cast %443 : vector<1x1x2x32xf32> to vector<2x32xf32>
      %445 = vector.shape_cast %441 : vector<2x32xf32> to vector<1x1x2x32xf32>
      tpu.vector_store %arg8[%c0_119, %442, %c0_120, %c0_121], %445 {strides = array<i32>} : memref<1x8x2x32xf32, #tpu.memory_space<vmem>>, vector<1x1x2x32xf32>,
      %c7_i32_122 = arith.constant 7 : i32
      %c1_i32_123 = arith.constant 1 : i32
      %446 = arith.subi %c1_i32_123, %arg0 : i32
      %447 = arith.muli %446, %c7_i32_122 : i32
      %c7_i32_124 = arith.constant 7 : i32
      %448 = arith.subi %c7_i32_124, %c7_i32_122 : i32
      %449 = arith.muli %arg0, %448 : i32
      %450 = arith.addi %447, %449 : i32
      %451 = arith.index_cast %450 : i32 to index
      %c0_125 = arith.constant 0 : index
      %c0_126 = arith.constant 0 : index
      %452 = vector.load %arg3[%451, %c0_125, %c0_126] : memref<8x2x128xbf16, #tpu.memory_space<vmem>>, vector<1x2x128xbf16>
      %453 = vector.shape_cast %452 : vector<1x2x128xbf16> to vector<2x128xbf16>
      %454 = arith.extf %453 : vector<2x128xbf16> to vector<2x128xf32>
      %455 = arith.truncf %434 : vector<2x32xf32> to vector<2x32xbf16>
      %cst_127 = arith.constant dense<0.000000e+00> : vector<2x128xf32>
      %456 = tpu.matmul %455, %23, %cst_127 {dimension_numbers = #tpu.dot_dimension_numbers<[1], [0], [0], [1], [0, 0, 1, 1], [], []>} : vector<2x32xbf16>, vector<32x128xbf16>, vector<2x128xf32> -> vector<2x128xf32>
      %457 = arith.addf %454, %456 : vector<2x128xf32>
      %458 = vector.extract_strided_slice %457 {offsets = [0, 0], sizes = [2, 32], strides = [1, 1]} : vector<2x128xf32> to vector<2x32xf32>
      %459 = arith.negf %458 : vector<2x32xf32>
      %460 = math.exp %459 : vector<2x32xf32>
      %cst_128 = arith.constant 1.000000e+00 : f32
      %461 = vector.broadcast %cst_128 : f32 to vector<2x32xf32>
      %462 = arith.addf %461, %460 : vector<2x32xf32>
      %463 = arith.divf %461, %462 : vector<2x32xf32>
      %464 = vector.extract_strided_slice %457 {offsets = [0, 32], sizes = [2, 32], strides = [1, 1]} : vector<2x128xf32> to vector<2x32xf32>
      %465 = arith.negf %464 : vector<2x32xf32>
      %466 = math.exp %465 : vector<2x32xf32>
      %cst_129 = arith.constant 1.000000e+00 : f32
      %467 = vector.broadcast %cst_129 : f32 to vector<2x32xf32>
      %468 = arith.addf %467, %466 : vector<2x32xf32>
      %469 = arith.divf %467, %468 : vector<2x32xf32>
      %470 = vector.extract_strided_slice %457 {offsets = [0, 64], sizes = [2, 32], strides = [1, 1]} : vector<2x128xf32> to vector<2x32xf32>
      %471 = math.tanh %470 : vector<2x32xf32>
      %472 = vector.extract_strided_slice %457 {offsets = [0, 96], sizes = [2, 32], strides = [1, 1]} : vector<2x128xf32> to vector<2x32xf32>
      %473 = arith.negf %472 : vector<2x32xf32>
      %474 = math.exp %473 : vector<2x32xf32>
      %cst_130 = arith.constant 1.000000e+00 : f32
      %475 = vector.broadcast %cst_130 : f32 to vector<2x32xf32>
      %476 = arith.addf %475, %474 : vector<2x32xf32>
      %477 = arith.divf %475, %476 : vector<2x32xf32>
      %478 = arith.mulf %469, %437 : vector<2x32xf32>
      %479 = arith.mulf %463, %471 : vector<2x32xf32>
      %480 = arith.addf %478, %479 : vector<2x32xf32>
      %481 = math.tanh %480 : vector<2x32xf32>
      %482 = arith.mulf %477, %481 : vector<2x32xf32>
      %c8_i32_131 = arith.constant 8 : i32
      %483 = arith.muli %arg1, %c8_i32_131 : i32
      %484 = arith.addi %483, %c7_i32_122 : i32
      %c1_i32_132 = arith.constant 1 : i32
      %485 = arith.subi %c1_i32_132, %arg0 : i32
      %486 = arith.muli %485, %484 : i32
      %c7_i32_133 = arith.constant 7 : i32
      %487 = arith.subi %c7_i32_133, %484 : i32
      %488 = arith.muli %arg0, %487 : i32
      %489 = arith.addi %486, %488 : i32
      %490 = vector.broadcast %489 : i32 to vector<2x1xi32>
      %491 = arith.cmpi slt, %490, %21 : vector<2x1xi32>
      %492 = vector.shape_cast %491 : vector<2x1xi1> to vector<2x1xi1>
      %493 = vector.broadcast %492 : vector<2x1xi1> to vector<2x32xi1>
      %494 = arith.select %493, %482, %434 : vector<2x32xi1>, vector<2x32xf32>
      %495 = vector.shape_cast %491 : vector<2x1xi1> to vector<2x1xi1>
      %496 = vector.broadcast %495 : vector<2x1xi1> to vector<2x32xi1>
      %497 = arith.select %496, %480, %437 : vector<2x32xi1>, vector<2x32xf32>
      %cst_134 = arith.constant 0.000000e+00 : f32
      %498 = vector.shape_cast %491 : vector<2x1xi1> to vector<2x1xi1>
      %499 = vector.broadcast %498 : vector<2x1xi1> to vector<2x32xi1>
      %500 = vector.broadcast %cst_134 : f32 to vector<2x32xf32>
      %501 = arith.select %499, %482, %500 : vector<2x32xi1>, vector<2x32xf32>
      %c0_135 = arith.constant 0 : index
      %502 = arith.index_cast %450 : i32 to index
      %c0_136 = arith.constant 0 : index
      %c0_137 = arith.constant 0 : index
      %503 = vector.load %arg8[%c0_135, %502, %c0_136, %c0_137] : memref<1x8x2x32xf32, #tpu.memory_space<vmem>>, vector<1x1x2x32xf32>
      %504 = vector.shape_cast %503 : vector<1x1x2x32xf32> to vector<2x32xf32>
      %505 = vector.shape_cast %501 : vector<2x32xf32> to vector<1x1x2x32xf32>
      tpu.vector_store %arg8[%c0_135, %502, %c0_136, %c0_137], %505 {strides = array<i32>} : memref<1x8x2x32xf32, #tpu.memory_space<vmem>>, vector<1x1x2x32xf32>,
      %c8_i32_138 = arith.constant 8 : i32
      %c0_139 = arith.constant 0 : index
      %c0_140 = arith.constant 0 : index
      %506 = vector.load %arg11[%c0_139, %c0_140] : memref<2x32xf32, #tpu.memory_space<vmem>>, vector<2x32xf32>
      tpu.vector_store %arg11[%c0_139, %c0_140], %494 {strides = array<i32>} : memref<2x32xf32, #tpu.memory_space<vmem>>, vector<2x32xf32>,
      %c0_141 = arith.constant 0 : index
      %c0_142 = arith.constant 0 : index
      %507 = vector.load %arg12[%c0_141, %c0_142] : memref<2x32xf32, #tpu.memory_space<vmem>>, vector<2x32xf32>
      tpu.vector_store %arg12[%c0_141, %c0_142], %497 {strides = array<i32>} : memref<2x32xf32, #tpu.memory_space<vmem>>, vector<2x32xf32>,
    } else {
    }
    %true = arith.constant true
    %15 = arith.xori %12, %true : i1
    %16 = arith.extui %15 : i1 to i32
    %c0_i32_5 = arith.constant 0 : i32
    %17 = arith.cmpi ne, %16, %c0_i32_5 : i32
    scf.if %17 {
      %cst = arith.constant 0.000000e+00 : f32
      %21 = vector.broadcast %cst : f32 to vector<8x2x32xf32>
      %c0_8 = arith.constant 0 : index
      %c0_9 = arith.constant 0 : index
      %c0_10 = arith.constant 0 : index
      %c0_11 = arith.constant 0 : index
      %22 = vector.load %arg8[%c0_8, %c0_9, %c0_10, %c0_11] : memref<1x8x2x32xf32, #tpu.memory_space<vmem>>, vector<1x8x2x32xf32>
      %23 = vector.shape_cast %22 : vector<1x8x2x32xf32> to vector<8x2x32xf32>
      %24 = vector.shape_cast %21 : vector<8x2x32xf32> to vector<1x8x2x32xf32>
      tpu.vector_store %arg8[%c0_8, %c0_9, %c0_10, %c0_11], %24 {strides = array<i32>} : memref<1x8x2x32xf32, #tpu.memory_space<vmem>>, vector<1x8x2x32xf32>,
    } else {
    }
    %c0_i32_6 = arith.constant 0 : i32
    %18 = arith.cmpi eq, %arg1, %c0_i32_6 : i32
    %19 = arith.extui %18 : i1 to i32
    %c0_i32_7 = arith.constant 0 : i32
    %20 = arith.cmpi ne, %19, %c0_i32_7 : i32
    scf.if %20 {
      %c0_8 = arith.constant 0 : index
      %c0_9 = arith.constant 0 : index
      %21 = vector.load %arg11[%c0_8, %c0_9] : memref<2x32xf32, #tpu.memory_space<vmem>>, vector<2x32xf32>
      %c0_10 = arith.constant 0 : index
      %c0_11 = arith.constant 0 : index
      %c0_12 = arith.constant 0 : index
      %22 = vector.load %arg9[%c0_10, %c0_11, %c0_12] : memref<1x2x32xf32, #tpu.memory_space<vmem>>, vector<1x2x32xf32>
      %23 = vector.shape_cast %22 : vector<1x2x32xf32> to vector<2x32xf32>
      %24 = vector.shape_cast %21 : vector<2x32xf32> to vector<1x2x32xf32>
      tpu.vector_store %arg9[%c0_10, %c0_11, %c0_12], %24 {strides = array<i32>} : memref<1x2x32xf32, #tpu.memory_space<vmem>>, vector<1x2x32xf32>,
      %c0_13 = arith.constant 0 : index
      %c0_14 = arith.constant 0 : index
      %25 = vector.load %arg12[%c0_13, %c0_14] : memref<2x32xf32, #tpu.memory_space<vmem>>, vector<2x32xf32>
      %c0_15 = arith.constant 0 : index
      %c0_16 = arith.constant 0 : index
      %c0_17 = arith.constant 0 : index
      %26 = vector.load %arg10[%c0_15, %c0_16, %c0_17] : memref<1x2x32xf32, #tpu.memory_space<vmem>>, vector<1x2x32xf32>
      %27 = vector.shape_cast %26 : vector<1x2x32xf32> to vector<2x32xf32>
      %28 = vector.shape_cast %25 : vector<2x32xf32> to vector<1x2x32xf32>
      tpu.vector_store %arg10[%c0_15, %c0_16, %c0_17], %28 {strides = array<i32>} : memref<1x2x32xf32, #tpu.memory_space<vmem>>, vector<1x2x32xf32>,
    } else {
    }
    return
  }
  func.func @transform_0(%arg0: i32, %arg1: i32, %arg2: memref<1xi32, #tpu.memory_space<smem>>) -> (i32, i32, i32) {
    %c1_i32 = arith.constant 1 : i32
    %0 = arith.subi %c1_i32, %arg0 : i32
    %1 = arith.muli %0, %arg1 : i32
    %c0_i32 = arith.constant 0 : i32
    %2 = arith.subi %c0_i32, %arg1 : i32
    %3 = arith.muli %arg0, %2 : i32
    %4 = arith.addi %1, %3 : i32
    %c0_i32_0 = arith.constant 0 : i32
    %c0_i32_1 = arith.constant 0 : i32
    return %4, %c0_i32_0, %arg0 : i32, i32, i32
  }
  func.func @transform_1(%arg0: i32, %arg1: i32, %arg2: memref<1xi32, #tpu.memory_space<smem>>) -> (i32, i32) {
    %c0_i32 = arith.constant 0 : i32
    %c0_i32_0 = arith.constant 0 : i32
    %c0_i32_1 = arith.constant 0 : i32
    return %c0_i32, %c0_i32_0 : i32, i32
  }
  func.func @transform_2(%arg0: i32, %arg1: i32, %arg2: memref<1xi32, #tpu.memory_space<smem>>) -> (i32, i32, i32) {
    %c0_i32 = arith.constant 0 : i32
    %c0_i32_0 = arith.constant 0 : i32
    %c0_i32_1 = arith.constant 0 : i32
    return %arg0, %c0_i32, %c0_i32_0 : i32, i32, i32
  }
  func.func @transform_3(%arg0: i32, %arg1: i32, %arg2: memref<1xi32, #tpu.memory_space<smem>>) -> (i32, i32, i32) {
    %c0_i32 = arith.constant 0 : i32
    %c0_i32_0 = arith.constant 0 : i32
    %c0_i32_1 = arith.constant 0 : i32
    return %arg0, %c0_i32, %c0_i32_0 : i32, i32, i32
  }
  func.func @transform_4(%arg0: i32, %arg1: i32, %arg2: memref<1xi32, #tpu.memory_space<smem>>) -> (i32, i32, i32) {
    %c0_i32 = arith.constant 0 : i32
    %c0_i32_0 = arith.constant 0 : i32
    %c0_i32_1 = arith.constant 0 : i32
    return %arg0, %c0_i32, %c0_i32_0 : i32, i32, i32
  }
  func.func @transform_5(%arg0: i32, %arg1: i32, %arg2: memref<1xi32, #tpu.memory_space<smem>>) -> (i32, i32, i32, i32) {
    %c1_i32 = arith.constant 1 : i32
    %0 = arith.subi %c1_i32, %arg0 : i32
    %1 = arith.muli %0, %arg1 : i32
    %c0_i32 = arith.constant 0 : i32
    %2 = arith.subi %c0_i32, %arg1 : i32
    %3 = arith.muli %arg0, %2 : i32
    %4 = arith.addi %1, %3 : i32
    %c0_i32_0 = arith.constant 0 : i32
    %c0_i32_1 = arith.constant 0 : i32
    %c0_i32_2 = arith.constant 0 : i32
    return %arg0, %4, %c0_i32_0, %c0_i32_1 : i32, i32, i32, i32
  }
  func.func @transform_6(%arg0: i32, %arg1: i32, %arg2: memref<1xi32, #tpu.memory_space<smem>>) -> (i32, i32, i32) {
    %c0_i32 = arith.constant 0 : i32
    %c0_i32_0 = arith.constant 0 : i32
    %c0_i32_1 = arith.constant 0 : i32
    return %arg0, %c0_i32, %c0_i32_0 : i32, i32, i32
  }
  func.func @transform_7(%arg0: i32, %arg1: i32, %arg2: memref<1xi32, #tpu.memory_space<smem>>) -> (i32, i32, i32) {
    %c0_i32 = arith.constant 0 : i32
    %c0_i32_0 = arith.constant 0 : i32
    %c0_i32_1 = arith.constant 0 : i32
    return %arg0, %c0_i32, %c0_i32_0 : i32, i32, i32
  }
}

</mosaic_0001>

<bundles_post_ra>
// kernel: bicond_lstm_forward.3
= control target key start
LH: loop header
LB: loop body
LE: loop exit
PB: predicated region body
PF: predicated region fallthrough
CT: control target
= control target key end

     0   :  { %s2680_s0 = inlined_call_operand.<no memory space> [shape: s32[1], index: 0, kind: input, shape index: {}]   ;;  %s2681_s1 = inlined_call_operand.vmem [shape: bf16[8,2,256], index: 1, kind: input, shape index: {}]   ;;  %s2682_s2 = inlined_call_operand.vmem [shape: s32[2,1], index: 2, kind: input, shape index: {}]   ;;  %s2683_s3 = inlined_call_operand.vmem [shape: bf16[2,32,128], index: 3, kind: input, shape index: {}]   ;;  %s2684_s4 = inlined_call_operand.vmem [shape: f32[2,2,32], index: 4, kind: input, shape index: {}]   ;;  %s2685_s5 = inlined_call_operand.vmem [shape: f32[2,2,32], index: 5, kind: input, shape index: {}]   ;;  %s2686_s6 = inlined_call_operand.vmem [shape: f32[2,8,2,32], index: 6, kind: output, shape index: {0}]   ;;  %s2687_s7 = inlined_call_operand.vmem [shape: f32[2,2,32], index: 7, kind: output, shape index: {1}]   ;;  %s2688_s8 = inlined_call_operand.hbm [shape: f32[2,2,32], index: 8, kind: output, shape index: {2}]  }
   0x1   :  { %2696 = sst [smem:[#allocation17_spill]] %s2681_s1 }
   0x2   :  { %14 = sst [smem:[#allocation5]] %s2680_s0 }
   0x3   :  { %15 = vsyncpa [#allocation8], 0 }
   0x4   :  { %17 = vsyncpa [#allocation8 + $0x1], 0  ;;  %s2259_s29 = smov 0   ;;  %s2261_s30 = smov 0  }
   0x5   :  { %s2263_s9 = smov 0   ;;  %s2265_s10 = smov 0  }
   0x6   :  { %s2267_s11 = smov 0   ;;  %s2269_s12 = smov 0  }
   0x7 LB: > { %2697 = sst [smem:[#allocation10_spill]] %s2184_s30  ;;  %s1844_s0 = sadd.s32 4294967295, %s2200_s12   ;;  %s2200_s12 = sphi %s2269_s12, %s23_s12   ;;  %s2196_s11 = sphi %s2267_s11, %s2713_s11   ;;  %s2192_s10 = sphi %s2265_s10, %s2712_s10   ;;  %s2188_s9 = sphi %s2263_s9, %s2711_s9   ;;  %s2184_s30 = sphi %s2261_s30, %s2710_s30   ;;  %s2180_s29 = sphi %s2259_s29, %s2709_s29  }
   0x8   : > { %2698 = sst [smem:[#allocation11_spill]] %s2188_s9  ;;  %s1845_s13 = sadd.s32 4294967294, %s2200_s12  }
   0x9   : > { %2699 = sst [smem:[#allocation12_spill]] %s2196_s11  ;;  %s35_s14 = sadd.s32 1, %s2196_s11 }
   0xa   : > { %2700 = sst [smem:[#allocation13_spill]] %s2200_s12  ;;  %s54_s15 = sadd.s32 1, %s2188_s9 }
   0xb   : > { %p37_p0 = scmp.ge.s32.totalorder %s35_s14, 2  ;;  %p61_p1 = scmp.ne.s32.totalorder %s2188_s9, %s2184_s30 }
   0xc   : > { %p62_p2 = scmp.eq.s32.totalorder %s2200_s12, 0  ;;  %p254_p3 = scmp.eq.s32.totalorder %s1844_s0, 1 }
   0xd   : > { %s2715_s14 = smov (%p37_p0, %s35_s14), 0  ;;  %p259_p6 = scmp.ne.s32.totalorder %s2184_s30, %s2180_s29 }
   0xe   : > { %2701 = sst [smem:[#allocation14_spill]] %s2715_s14  ;;  %p63_p4 = por %p62_p2, %p61_p1 }
   0xf   : > { %p2298_p5 = por %p254_p3, %p61_p1  ;;  %s50_s17 = ssub.s32 %s2196_s11, %s2715_s14 }
  0x10   : > { %p52_p7 = scmp.eq.s32.totalorder %s50_s17, 0  ;;  %p260_p8 = scmp.eq.s32.totalorder %s1845_s13, 1 }
  0x11   : > { %p1847_p10 = scmp.ge.s32.totalorder %s2200_s12, 2 }
  0x12   : > { %s2307_s18 = scalar_select %p52_p7, %s2188_s9, %s54_s15  }
  0x13   : > { %p2309_p9 = por %p260_p8, %p259_p6  ;;  %279 = sbr.rel (%p1847_p10) target bundleno = 40 (0x28), region = 20 }
  0x14   : > { %2703 = sst [smem:[#allocation15_spill]] %s2307_s18 }
  0x15   : > { %s2704_s19 = scalar_select %p2309_p9, 1, 0 }
  0x17   : > { %2705 = sst [smem:[#allocation16_spill]] %s2704_s19 }
  0x1a   : > { %282 = sbr.rel (!%p63_p4) target bundleno = 40 (0x28), region = 24  ;;  %s284_s20 = sand.u32 (%p63_p4), 1, %s2188_s9  }
  0x1b   : > { %s2706_s1 = sld [smem:[#allocation17_spill]] (%p63_p4)  ;;  %s1848_s24 = sshll.u32 (%p63_p4), %s284_s20, 3 }
  0x1c   : > { %s286_s25 = scalar_lea.vmem (%p63_p4), [#allocation6], %s1848_s24 }
  0x21   : > { %s295_s23 = scalar_lea.vmem %s2706_s1, %s2196_s11 }
  0x22   : > { %v311_v0 = vld [vmem:[%s295_s23] sm:$0x1]  ;;  %v313_v1 = vld [vmem:[%s295_s23 + $0x2] sm:$0x1]  ;;  %v315_v2 = vld [vmem:[%s295_s23 + $0x4] sm:$0x1] }
  0x23   : > { %v317_v3 = vld [vmem:[%s295_s23 + $0x6] sm:$0x1]  ;;  %312 = vst [vmem:[%s286_s25] sm:$0x1] %v311_v0  ;;  %314 = vst [vmem:[%s286_s25 + $0x1] sm:$0x1] %v313_v1 }
  0x24   : > { %316 = vst [vmem:[%s286_s25 + $0x2] sm:$0x1] %v315_v2  ;;  %318 = vst [vmem:[%s286_s25 + $0x3] sm:$0x1] %v317_v3  ;;  %v319_v4 = vld [vmem:[%s295_s23 + $0x8] sm:$0x1] }
  0x25   : > { %v321_v5 = vld [vmem:[%s295_s23 + $0xa] sm:$0x1]  ;;  %v323_v6 = vld [vmem:[%s295_s23 + $0xc] sm:$0x1]  ;;  %320 = vst [vmem:[%s286_s25 + $0x4] sm:$0x1] %v319_v4 }
  0x26   : > { %322 = vst [vmem:[%s286_s25 + $0x5] sm:$0x1] %v321_v5  ;;  %324 = vst [vmem:[%s286_s25 + $0x6] sm:$0x1] %v323_v6  ;;  %v325_v7 = vld [vmem:[%s295_s23 + $0xe] sm:$0x1] }
  0x27   : > { %326 = vst [vmem:[%s286_s25 + $0x7] sm:$0x1] %v325_v7 }
  0x28 PF: > { %p1849_p11 = scmp.ge.s32.totalorder %s2200_s12, 1  ;;  %p386_p12 = scmp.lt.s32.totalorder %s2200_s12, 3 }
  0x2a   : > { %p387_p13 = pnand %p1849_p11, %p386_p12 }
  0x2b   : > { %s2324_s26 = sand.u32 (!%p387_p13), 1, %s2184_s30   ;;  %p461_p0 = scmp.lt.s32.totalorder (!%p387_p13), %s2192_s10, 1  ;;  %vm504_vm0 = vcmask (!%p387_p13), 254976  }
  0x2c   : > { %390 = sbr.rel (%p387_p13) target bundleno = 5754 (0x167a), region = 77  ;;  %s1850_s27 = sshll.u32 (!%p387_p13), %s2324_s26, 3 }
  0x2d   : > { %s1851_s28 = sshll.u32 (!%p387_p13), %s2324_s26, 1  ;;  %s2331_s13 = ssub.s32 (!%p387_p13), 1, %s2192_s10 }
  0x2e   : > { %s2333_s15 = sld [smem:[#allocation5]] (!%p387_p13)  ;;  %s2359_s22 = scalar_lea.vmem (!%p387_p13), [#allocation6], %s1850_s27 }
  0x2f   : > { %s2361_s24 = scalar_lea.vmem (!%p387_p13), [#allocation7], %s1851_s28 }
  0x33   : > { %s462_s0 = scalar_select %p461_p0, %s2192_s10, 1 }
  0x34   : > { %p1860_p1 = scmp.le.s32.totalorder %s2333_s15, 0 }
  0x35   : > { %s1901_s17 = sshll.u32 %s462_s0, 4  ;;  %s2335_s20 = sshll.u32 %s462_s0, 1  ;;  %v2202_v11 = vmov (!%p1860_p1), 0.0   ;;  %vm2203_vm1 = vmmov (!%p1860_p1), 0   ;;  %vm545_vm2 = vcmask (!%p1860_p1), 261120   ;;  %v601_v23 = vlaneseq (!%p1860_p1) }
  0x36   : > { %s465_s23 = scalar_lea.vmem %s2683_s3, %s1901_s17  ;;  %s469_s1 = scalar_lea.vmem %s2684_s4, %s2335_s20  ;;  %1927 = vmatprep.subr.bf16.mxu0 (!%p1860_p1), %v2202_v11  ;;  %1935 = vmatprep.subr.bf16.mxu1 (!%p1860_p1), %v2202_v11  ;;  %v2204_v21 = vmov (!%p1860_p1), 1983009808   ;;  %v2406_v37 = vld [vmem:[%s2682_s2] sm:$0x3] (!%p1860_p1)  ;;  %v2207_v39 = vmov (!%p1860_p1), 0  }
  0x37   : > { %s2347_s18 = scalar_lea.vmem %s2686_s6, %s1901_s17  ;;  %s497_s30 = scalar_lea.vmem %s2687_s7, %s2335_s20  ;;  %v503_v8 = vld [vmem:[%s469_s1] sm:$0x3]  ;;  %v2369_v12 = vld [vmem:[%s465_s23 + $0x8] sm:$0xff] (!%p1860_p1)   ;;  %1931 = vmatprep.mubr.msk.bf16.mxu0 (!%p1860_p1), %vm2203_vm1, %v2202_v11  ;;  %1939 = vmatprep.mubr.msk.bf16.mxu1 (!%p1860_p1), %vm2203_vm1, %v2202_v11  ;;  %v599_v22 = vunpack.c.l.s4 (!%p1860_p1), %v2204_v21  ;;  %v602_v26 = vshrl.u32 (!%p1860_p1), %v601_v23, 7 }
  0x38   : > { %505 = vst.msk [vmem:[#allocation2] sm:$0x3] %vm504_vm0, %v503_v8  ;;  %s473_s21 = scalar_lea.vmem %s2685_s5, %s2335_s20  ;;  %520 = sbr.rel (%p1860_p1) target bundleno = 5721 (0x1659), region = 89  ;;  %v2364_v10 = vld [vmem:[%s465_s23] sm:$0xff] (!%p1860_p1)   ;;  %2054 = vset.pattern.permute.xlu0 (!%p1860_p1), %v2207_v39  ;;  %2055 = vset.pattern.permute.xlu1 (!%p1860_p1), %v2207_v39 }
  0x39   : > { %v506_v9 = vld [vmem:[%s473_s21] sm:$0x3]  ;;  %1928 = vmatpush3.bf16.msra.mxu0 (!%p1860_p1), %v2364_v10  ;;  %1936 = vmatpush3.bf16.msra.mxu1 (!%p1860_p1), %v2364_v10  ;;  %s528_s1 = smul.u32 (!%p1860_p1), 7, %s2192_s10  ;;  %v600_v25 = vunpack.c.0.s8 (!%p1860_p1), %v599_v22  ;;  %s2205_s11 = smov (!%p1860_p1), 64  }
  0x3a   : > { %507 = vst.msk [vmem:[#allocation3] sm:$0x3] %vm504_vm0, %v506_v9  ;;  %1929 = vmatprep.subr.bf16.mxu0 (!%p1860_p1), %v2202_v11  ;;  %1937 = vmatprep.subr.bf16.mxu1 (!%p1860_p1), %v2202_v11  ;;  %s2206_s12 = smov (!%p1860_p1), 32   ;;  %s2208_s27 = smov (!%p1860_p1), 96  }
  0x3b   : > { %s529_s9 = scalar_lea.vmem (!%p1860_p1), %s2359_s22, %s528_s1 [#allocation6]  ;;  %v2397_v27 = vsub.s32 (!%p1860_p1), %v600_v25, %v602_v26  ;;  %v628_v38 = vstv (!%p1860_p1), %s528_s1  ;;  %s1865_s28 = smul.u32 (!%p1860_p1), 14, %s2192_s10 }
  0x3c   : > { %v530_v15 = vld [vmem:[%s529_s9] sm:$0x1] (!%p1860_p1)  ;;  %vm629_vm3 = vcmp.lt.s32.totalorder (!%p1860_p1), %v628_v38, %v2406_v37  ;;  %s664_s23 = smul.u32 (!%p1860_p1), 6, %s2192_s10  ;;  %s1869_s14 = sshll.u32 (!%p1860_p1), %s2331_s13, 1 }
  0x3d   : > { %1930 = vmatpush3.bf16.msra.mxu0 (!%p1860_p1), %v2369_v12  ;;  %1938 = vmatpush3.bf16.msra.mxu1 (!%p1860_p1), %v2369_v12  ;;  %v531_v16 = vunpack.c.l.bf16 (!%p1860_p1), %v530_v15  ;;  %v630_v40 = vsel (!%p1860_p1), %vm629_vm3, 1, %v2207_v39  ;;  %s661_s17 = scalar_lea.vmem (!%p1860_p1), %s2347_s18, %s1865_s28  ;;  %s790_s9 = smul.u32 (!%p1860_p1), 5, %s2192_s10 }
  0x3e   : > { %1943 = vmatprep.subr.bf16.mxu0 (!%p1860_p1), %v2202_v11  ;;  %1951 = vmatprep.subr.bf16.mxu1 (!%p1860_p1), %v2202_v11  ;;  %s2438_s25 = sadd.s32 (!%p1860_p1), %s664_s23, %s2331_s13 }
  0x3f   : > { %v2373_v13 = vld [vmem:[#allocation2] sm:$0x3]  ;;  %s666_s0 = scalar_lea.vmem %s2359_s22, %s2438_s25 [#allocation6]  ;;  %v754_v5 = vstv %s2438_s25  ;;  %s1868_s21 = sshll.u32 %s2438_s25, 1 }
  0x40   : > { %v532_v14 = vpack.c.bf16 %v2373_v13, %v2373_v13  ;;  %v667_v58 = vld [vmem:[%s666_s0] sm:$0x1]  ;;  %vm755_vm5 = vcmp.lt.s32.totalorder %v754_v5, %v2406_v37  ;;  %s787_s1 = scalar_lea.vmem %s2347_s18, %s1868_s21  ;;  %s2467_s19 = sadd.s32 %s1869_s14, %s790_s9 }
  0x41   : > { %v527_v28 = vld [vmem:[#allocation3] sm:$0x3]  ;;  %v668_v59 = vunpack.c.l.bf16 %v667_v58  ;;  %v756_v9 = vsel %vm755_vm5, 1, %v2207_v39  ;;  %s792_s28 = scalar_lea.vmem %s2359_s22, %s2467_s19 [#allocation6]  ;;  %s915_s25 = smul.u32 3, %s2331_s13 }
  0x42   : > { %1932 = vmatmul.mubr.msk.bf16.vlgmr.msra.gmra.mrb[0].mxu0 %vm545_vm2, %v532_v14  ;;  %v604_v30 = vrot.slane %v527_v28, %v2397_v27  ;;  %s1874_s0 = sshll.u32 %s2192_s10, 2 }
  0x43   : > { %1944 = vmatpush3.bf16.msra.mxu0 %v2364_v10  ;;  %1947 = vmatprep.mubr.msk.bf16.mxu0 %vm2203_vm1, %v2202_v11  ;;  %s2495_s21 = sadd.s32 %s1874_s0, %s915_s25 }
  0x44   : > { %1945 = vmatprep.subr.bf16.mxu0 %v2202_v11  ;;  %s1878_s9 = sshll.u32 %s2495_s21, 1 }
  0x45   : > { %s1039_s14 = scalar_lea.vmem %s2347_s18, %s1878_s9 }
  0x47   : > { %1946 = vmatpush3.bf16.msra.mxu0 %v2369_v12 }
  0x48   : > { %1959 = vmatprep.subr.bf16.mxu0 %v2202_v11 }
 0x115   : > { %v583_v17 = vpop.f32.mrb[0].mxu0 }
 0x116   : > { %v589_v18 = vadd.f32 %v583_v17, %v531_v16  ;;  %v1933_v19 = vpop.f32.mrb[1].mxu0 }
 0x117   : > { %v586_v20 = vpop.f32.mrb[2].mxu0 }
 0x118   : > { %2058 = vtanh.f32 %v589_v18  ;;  %v1934_v24 = vpop.f32.mrb[3].mxu0  ;;  %v1864_v31 = vmul.f32 -1.442695, %v589_v18 }
 0x11a   : > { %2060 = vpow2.f32 %v1864_v31  ;;  %v793_v31 = vld [vmem:[%s792_s28] sm:$0x1]  ;;  %s1879_s28 = sshll.u32 %s2331_s13, 2 }
 0x122   : > { %v2059_v29 = vpop.eup %2058 }
 0x123   : > { %610 = vrot.lane.b32.xlu0 %v2059_v29, %s2205_s11 }
 0x124   : > { %v2061_v32 = vpop.eup %2060 }
 0x125   : > { %v593_v33 = vadd.f32 1.0, %v2061_v32  ;;  %v794_v32 = vunpack.c.l.bf16 %v793_v31 }
 0x127   : > { %605 = vrot.lane.b32.xlu0 %v604_v30, %s2206_s12  ;;  %2062 = vrcp.f32 %v593_v33 }
 0x12b   : > { %632 = vperm.xlu0 %2054, %v630_v40  }
 0x131   : > { %v2063_v34 = vpop.eup %2062 }
 0x195   : > { %v611_v35 = vpop.permute.xlu0 %610 }
 0x196   : > { %v613_v36 = vmul.f32 %v2063_v34, %v611_v35 }
 0x198   : > { %615 = vrot.lane.b32.xlu1 %v613_v36, %s2206_s12 }
 0x199   : > { %v606_v41 = vpop.permute.xlu0 %605 }
 0x19a   : > { %v608_v42 = vmul.f32 %v2063_v34, %v606_v41 }
 0x1aa   : > { %v633_v50 = vpop.permute.xlu0 %632 }
 0x1ab   : > { %vm634_vm4 = vcmp.eq.s32.totalorder %v633_v50, 1 }
 0x20a   : > { %v616_v43 = vpop.permute.xlu1 %615 }
 0x20b   : > { %v618_v44 = vadd.f32 %v616_v43, %v608_v42 }
 0x20d   : > { %2064 = vtanh.f32 %v618_v44  ;;  %v654_v49 = vrot.slane %v618_v44, %v2397_v27  ;;  %v880_v44 = vstv %s2467_s19 }
 0x20e   : > { %vm881_vm7 = vcmp.lt.s32.totalorder %v880_v44, %v2406_v37 }
 0x217   : > { %v2065_v45 = vpop.eup %2064 }
 0x218   : > { %621 = vrot.lane.b32.xlu1 %v2065_v45, %s2205_s11 }
 0x28a   : > { %v622_v46 = vpop.permute.xlu1 %621 }
 0x28b   : > { %v624_v47 = vmul.f32 %v2063_v34, %v622_v46 }
 0x28d   : > { %v642_v48 = vrot.slane %v624_v47, %v2397_v27 }
 0x28f   : > { %643 = vrot.lane.b32.xlu1 %v642_v48, %s2206_s12  ;;  %v882_v48 = vsel %vm881_vm7, 1, %v2207_v39 }
 0x293   : > { %655 = vrot.lane.b32.xlu1 %v654_v49, %s2208_s27 }
 0x301   : > { %v644_v51 = vpop.permute.xlu1 %643 }
 0x302   : > { %v2422_v52 = vsel %vm634_vm4, %v644_v51, %v2373_v13  ;;  %v659_v53 = vsel %vm634_vm4, %v644_v51, 0.0 }
 0x303   : > { %663 = vst.msk [vmem:[%s661_s17] sm:$0x3] %vm504_vm0, %v659_v53  ;;  %v669_v54 = vpack.c.bf16 %v2422_v52, %v2422_v52  ;;  %s1873_s17 = sshll.u32 %s2467_s19, 1  ;;  %s1042_s19 = smul.u32 3, %s2192_s10 }
 0x304   : > { %s913_s23 = scalar_lea.vmem %s2347_s18, %s1873_s17 }
 0x305   : > { %v656_v55 = vpop.permute.xlu1 %655  ;;  %1940 = vmatmul.mubr.msk.bf16.vlgmr.msra.gmra.mrb[0].mxu1 %vm545_vm2, %v669_v54  ;;  %s2522_s17 = sadd.s32 %s1879_s28, %s1042_s19 }
 0x306   : > { %v658_v56 = vsel %vm634_vm4, %v656_v55, %v527_v28  ;;  %1952 = vmatpush3.bf16.msra.mxu1 %v2364_v10  ;;  %1955 = vmatprep.mubr.msk.bf16.mxu1 %vm2203_vm1, %v2202_v11  ;;  %s1883_s25 = sshll.u32 %s2522_s17, 1 }
 0x307   : > { %v728_v57 = vrot.slane %v658_v56, %v2397_v27  ;;  %1953 = vmatprep.subr.bf16.mxu1 %v2202_v11  ;;  %s1165_s0 = scalar_lea.vmem %s2347_s18, %s1883_s25 }
 0x309   : > { %729 = vrot.lane.b32.xlu1 %v728_v57, %s2206_s12 }
 0x30a   : > { %1954 = vmatpush3.bf16.msra.mxu1 %v2369_v12 }
 0x30b   : > { %1967 = vmatprep.subr.bf16.mxu1 %v2202_v11 }
 0x37b   : > { %v730_v13 = vpop.permute.xlu1 %729 }
 0x3d8   : > { %v707_v60 = vpop.f32.mrb[0].mxu1 }
 0x3d9   : > { %v713_v61 = vadd.f32 %v707_v60, %v668_v59  ;;  %v1941_v62 = vpop.f32.mrb[1].mxu1 }
 0x3da   : > { %v710_v63 = vpop.f32.mrb[2].mxu1 }
 0x3db   : > { %2066 = vtanh.f32 %v713_v61  ;;  %v1942_v0 = vpop.f32.mrb[3].mxu1  ;;  %v1867_v2 = vmul.f32 -1.442695, %v713_v61 }
 0x3dd   : > { %2068 = vpow2.f32 %v1867_v2 }
 0x3e5   : > { %v2067_v1 = vpop.eup %2066 }
 0x3e6   : > { %734 = vrot.lane.b32.xlu0 %v2067_v1, %s2205_s11 }
 0x3e7   : > { %v2069_v3 = vpop.eup %2068 }
 0x3e8   : > { %v717_v4 = vadd.f32 1.0, %v2069_v3 }
 0x3ea   : > { %2070 = vrcp.f32 %v717_v4 }
 0x3f4   : > { %v2071_v6 = vpop.eup %2070 }
 0x3f5   : > { %v732_v14 = vmul.f32 %v2071_v6, %v730_v13 }
 0x458   : > { %v735_v7 = vpop.permute.xlu0 %734 }
 0x459   : > { %v737_v8 = vmul.f32 %v2071_v6, %v735_v7 }
 0x45b   : > { %739 = vrot.lane.b32.xlu0 %v737_v8, %s2206_s12 }
 0x45f   : > { %758 = vperm.xlu0 %2054, %v756_v9  }
 0x4cd   : > { %v740_v15 = vpop.permute.xlu0 %739 }
 0x4ce   : > { %v742_v16 = vadd.f32 %v740_v15, %v732_v14 }
 0x4d0   : > { %2072 = vtanh.f32 %v742_v16  ;;  %v780_v17 = vrot.slane %v742_v16, %v2397_v27  ;;  %v1006_v16 = vstv %s2495_s21 }
 0x4d1   : > { %vm1007_vm9 = vcmp.lt.s32.totalorder %v1006_v16, %v2406_v37 }
 0x4d2   : > { %781 = vrot.lane.b32.xlu0 %v780_v17, %s2208_s27 }
 0x4da   : > { %v2073_v18 = vpop.eup %2072 }
 0x4db   : > { %745 = vrot.lane.b32.xlu1 %v2073_v18, %s2205_s11 }
 0x4de   : > { %v759_v19 = vpop.permute.xlu0 %758 }
 0x4df   : > { %vm760_vm6 = vcmp.eq.s32.totalorder %v759_v19, 1 }
 0x544   : > { %v782_v20 = vpop.permute.xlu0 %781 }
 0x545   : > { %v784_v21 = vsel %vm760_vm6, %v782_v20, %v658_v56  ;;  %v1008_v20 = vsel %vm1007_vm9, 1, %v2207_v39 }
 0x546   : > { %v854_v22 = vrot.slane %v784_v21, %v2397_v27 }
 0x548   : > { %855 = vrot.lane.b32.xlu0 %v854_v22, %s2206_s12 }
 0x54d   : > { %v746_v23 = vpop.permute.xlu1 %745 }
 0x54e   : > { %v748_v24 = vmul.f32 %v2071_v6, %v746_v23 }
 0x550   : > { %v768_v25 = vrot.slane %v748_v24, %v2397_v27 }
 0x552   : > { %769 = vrot.lane.b32.xlu1 %v768_v25, %s2206_s12 }
 0x5ba   : > { %v856_v49 = vpop.permute.xlu0 %855 }
 0x5c4   : > { %v770_v26 = vpop.permute.xlu1 %769 }
 0x5c5   : > { %v772_v28 = vsel %vm760_vm6, %v770_v26, %v2422_v52  ;;  %v785_v29 = vsel %vm760_vm6, %v770_v26, 0.0 }
 0x5c6   : > { %788 = vst.msk [vmem:[%s787_s1] sm:$0x3] %vm504_vm0, %v785_v29  ;;  %v795_v30 = vpack.c.bf16 %v772_v28, %v772_v28  ;;  %s918_s1 = scalar_lea.vmem %s2359_s22, %s2495_s21 [#allocation6]  ;;  %s1167_s21 = smul.u32 5, %s2331_s13 }
 0x5c7   : > { %v919_v2 = vld [vmem:[%s918_s1] sm:$0x1]  ;;  %s1884_s1 = sshll.u32 %s2192_s10, 1 }
 0x5c8   : > { %1948 = vmatmul.mubr.msk.bf16.vlgmr.msra.gmra.mrb[4].mxu0 %vm545_vm2, %v795_v30  ;;  %v920_v3 = vunpack.c.l.bf16 %v919_v2  ;;  %s2549_s9 = sadd.s32 %s1884_s1, %s1167_s21  ;;  %s1418_s1 = smul.u32 7, %s2331_s13 }
 0x5c9   : > { %1960 = vmatpush3.bf16.msra.mxu0 %v2364_v10  ;;  %1963 = vmatprep.mubr.msk.bf16.mxu0 %vm2203_vm1, %v2202_v11  ;;  %s1888_s19 = sshll.u32 %s2549_s9, 1 }
 0x5ca   : > { %1961 = vmatprep.subr.bf16.mxu0 %v2202_v11  ;;  %s1291_s28 = scalar_lea.vmem %s2347_s18, %s1888_s19 }
 0x5cd   : > { %1962 = vmatpush3.bf16.msra.mxu0 %v2369_v12 }
 0x5ce   : > { %1975 = vmatprep.subr.bf16.mxu0 %v2202_v11 }
 0x69b   : > { %v833_v33 = vpop.f32.mrb[4].mxu0 }
 0x69c   : > { %v839_v34 = vadd.f32 %v833_v33, %v794_v32  ;;  %v1949_v35 = vpop.f32.mrb[5].mxu0 }
 0x69d   : > { %v836_v36 = vpop.f32.mrb[6].mxu0 }
 0x69e   : > { %2074 = vtanh.f32 %v839_v34  ;;  %v1950_v38 = vpop.f32.mrb[7].mxu0  ;;  %v1871_v41 = vmul.f32 -1.442695, %v839_v34 }
 0x6a0   : > { %2076 = vpow2.f32 %v1871_v41 }
 0x6a8   : > { %v2075_v40 = vpop.eup %2074 }
 0x6a9   : > { %860 = vrot.lane.b32.xlu1 %v2075_v40, %s2205_s11 }
 0x6aa   : > { %v2077_v42 = vpop.eup %2076 }
 0x6ab   : > { %v843_v43 = vadd.f32 1.0, %v2077_v42 }
 0x6ad   : > { %2078 = vrcp.f32 %v843_v43 }
 0x6b7   : > { %v2079_v45 = vpop.eup %2078 }
 0x6b8   : > { %v858_v50 = vmul.f32 %v2079_v45, %v856_v49 }
 0x71b   : > { %v861_v46 = vpop.permute.xlu1 %860 }
 0x71c   : > { %v863_v47 = vmul.f32 %v2079_v45, %v861_v46 }
 0x71e   : > { %865 = vrot.lane.b32.xlu1 %v863_v47, %s2206_s12 }
 0x722   : > { %884 = vperm.xlu1 %2055, %v882_v48  }
 0x790   : > { %v866_v51 = vpop.permute.xlu1 %865 }
 0x791   : > { %v868_v52 = vadd.f32 %v866_v51, %v858_v50 }
 0x793   : > { %2080 = vtanh.f32 %v868_v52  ;;  %v906_v53 = vrot.slane %v868_v52, %v2397_v27  ;;  %v1132_v52 = vstv %s2522_s17 }
 0x794   : > { %vm1133_vm11 = vcmp.lt.s32.totalorder %v1132_v52, %v2406_v37 }
 0x795   : > { %907 = vrot.lane.b32.xlu1 %v906_v53, %s2208_s27 }
 0x79d   : > { %v2081_v54 = vpop.eup %2080 }
 0x79e   : > { %871 = vrot.lane.b32.xlu0 %v2081_v54, %s2205_s11 }
 0x7a1   : > { %v885_v55 = vpop.permute.xlu1 %884 }
 0x7a2   : > { %vm886_vm8 = vcmp.eq.s32.totalorder %v885_v55, 1 }
 0x807   : > { %v908_v56 = vpop.permute.xlu1 %907 }
 0x808   : > { %v910_v57 = vsel %vm886_vm8, %v908_v56, %v784_v21  ;;  %v1134_v56 = vsel %vm1133_vm11, 1, %v2207_v39 }
 0x809   : > { %v980_v58 = vrot.slane %v910_v57, %v2397_v27 }
 0x80b   : > { %981 = vrot.lane.b32.xlu1 %v980_v58, %s2206_s12 }
 0x810   : > { %v872_v59 = vpop.permute.xlu0 %871 }
 0x811   : > { %v874_v60 = vmul.f32 %v2079_v45, %v872_v59 }
 0x813   : > { %v894_v61 = vrot.slane %v874_v60, %v2397_v27 }
 0x815   : > { %895 = vrot.lane.b32.xlu0 %v894_v61, %s2206_s12 }
 0x87d   : > { %v982_v21 = vpop.permute.xlu1 %981 }
 0x887   : > { %v896_v62 = vpop.permute.xlu0 %895 }
 0x888   : > { %v898_v63 = vsel %vm886_vm8, %v896_v62, %v772_v28  ;;  %v911_v0 = vsel %vm886_vm8, %v896_v62, 0.0 }
 0x889   : > { %914 = vst.msk [vmem:[%s913_s23] sm:$0x3] %vm504_vm0, %v911_v0  ;;  %v921_v1 = vpack.c.bf16 %v898_v63, %v898_v63  ;;  %s1044_s23 = scalar_lea.vmem %s2359_s22, %s2522_s17 [#allocation6]  ;;  %s1293_s17 = smul.u32 6, %s2331_s13 }
 0x88a   : > { %v1045_v41 = vld [vmem:[%s1044_s23] sm:$0x1] }
 0x88b   : > { %1956 = vmatmul.mubr.msk.bf16.vlgmr.msra.gmra.mrb[4].mxu1 %vm545_vm2, %v921_v1  ;;  %v1046_v42 = vunpack.c.l.bf16 %v1045_v41  ;;  %s2571_s23 = sadd.s32 %s2192_s10, %s1293_s17 }
 0x88c   : > { %1968 = vmatpush3.bf16.msra.mxu1 %v2364_v10  ;;  %1971 = vmatprep.mubr.msk.bf16.mxu1 %vm2203_vm1, %v2202_v11  ;;  %s1295_s25 = scalar_lea.vmem %s2359_s22, %s2571_s23 [#allocation6] }
 0x88d   : > { %1969 = vmatprep.subr.bf16.mxu1 %v2202_v11 }
 0x890   : > { %1970 = vmatpush3.bf16.msra.mxu1 %v2369_v12 }
 0x891   : > { %1983 = vmatprep.subr.bf16.mxu1 %v2202_v11 }
 0x95e   : > { %v959_v4 = vpop.f32.mrb[4].mxu1 }
 0x95f   : > { %v965_v5 = vadd.f32 %v959_v4, %v920_v3  ;;  %v1957_v6 = vpop.f32.mrb[5].mxu1 }
 0x960   : > { %v962_v7 = vpop.f32.mrb[6].mxu1 }
 0x961   : > { %2082 = vtanh.f32 %v965_v5  ;;  %v1958_v8 = vpop.f32.mrb[7].mxu1  ;;  %v1876_v13 = vmul.f32 -1.442695, %v965_v5 }
 0x963   : > { %2084 = vpow2.f32 %v1876_v13 }
 0x96b   : > { %v2083_v9 = vpop.eup %2082 }
 0x96c   : > { %986 = vrot.lane.b32.xlu0 %v2083_v9, %s2205_s11 }
 0x96d   : > { %v2085_v14 = vpop.eup %2084 }
 0x96e   : > { %v969_v15 = vadd.f32 1.0, %v2085_v14 }
 0x970   : > { %2086 = vrcp.f32 %v969_v15 }
 0x97a   : > { %v2087_v17 = vpop.eup %2086 }
 0x97b   : > { %v984_v22 = vmul.f32 %v2087_v17, %v982_v21  ;;  %v1258_v21 = vstv %s2549_s9 }
 0x97c   : > { %vm1259_vm13 = vcmp.lt.s32.totalorder %v1258_v21, %v2406_v37 }
 0x9de   : > { %v987_v18 = vpop.permute.xlu0 %986 }
 0x9df   : > { %v989_v19 = vmul.f32 %v2087_v17, %v987_v18 }
 0x9e1   : > { %991 = vrot.lane.b32.xlu0 %v989_v19, %s2206_s12 }
 0x9e5   : > { %1010 = vperm.xlu0 %2054, %v1008_v20  }
 0xa53   : > { %v992_v23 = vpop.permute.xlu0 %991 }
 0xa54   : > { %v994_v24 = vadd.f32 %v992_v23, %v984_v22 }
 0xa56   : > { %2088 = vtanh.f32 %v994_v24  ;;  %v1032_v25 = vrot.slane %v994_v24, %v2397_v27 }
 0xa58   : > { %1033 = vrot.lane.b32.xlu0 %v1032_v25, %s2208_s27  ;;  %v1260_v25 = vsel %vm1259_vm13, 1, %v2207_v39 }
 0xa60   : > { %v2089_v26 = vpop.eup %2088 }
 0xa61   : > { %997 = vrot.lane.b32.xlu1 %v2089_v26, %s2205_s11 }
 0xa64   : > { %v1011_v28 = vpop.permute.xlu0 %1010 }
 0xa65   : > { %vm1012_vm10 = vcmp.eq.s32.totalorder %v1011_v28, 1 }
 0xaca   : > { %v1034_v29 = vpop.permute.xlu0 %1033 }
 0xacb   : > { %v1036_v30 = vsel %vm1012_vm10, %v1034_v29, %v910_v57 }
 0xacc   : > { %v1106_v31 = vrot.slane %v1036_v30, %v2397_v27 }
 0xace   : > { %1107 = vrot.lane.b32.xlu0 %v1106_v31, %s2206_s12 }
 0xad3   : > { %v998_v32 = vpop.permute.xlu1 %997 }
 0xad4   : > { %v1000_v33 = vmul.f32 %v2087_v17, %v998_v32 }
 0xad6   : > { %v1020_v34 = vrot.slane %v1000_v33, %v2397_v27 }
 0xad8   : > { %1021 = vrot.lane.b32.xlu1 %v1020_v34, %s2206_s12 }
 0xb40   : > { %v1108_v57 = vpop.permute.xlu0 %1107 }
 0xb4a   : > { %v1022_v35 = vpop.permute.xlu1 %1021 }
 0xb4b   : > { %v1024_v36 = vsel %vm1012_vm10, %v1022_v35, %v898_v63  ;;  %v1037_v38 = vsel %vm1012_vm10, %v1022_v35, 0.0 }
 0xb4c   : > { %1040 = vst.msk [vmem:[%s1039_s14] sm:$0x3] %vm504_vm0, %v1037_v38  ;;  %v1047_v40 = vpack.c.bf16 %v1024_v36, %v1024_v36  ;;  %s1170_s14 = scalar_lea.vmem %s2359_s22, %s2549_s9 [#allocation6]  ;;  %s1419_s9 = scalar_lea.vmem %s2359_s22, %s1418_s1 [#allocation6] }
 0xb4d   : > { %v1171_v13 = vld [vmem:[%s1170_s14] sm:$0x1]  ;;  %s1894_s22 = smul.u32 14, %s2331_s13 }
 0xb4e   : > { %1964 = vmatmul.mubr.msk.bf16.vlgmr.msra.gmra.mrb[8].mxu0 %vm545_vm2, %v1047_v40  ;;  %v1172_v14 = vunpack.c.l.bf16 %v1171_v13 }
 0xb4f   : > { %1976 = vmatpush3.bf16.msra.mxu0 %v2364_v10  ;;  %1979 = vmatprep.mubr.msk.bf16.mxu0 %vm2203_vm1, %v2202_v11  ;;  %s1540_s14 = scalar_lea.vmem %s2347_s18, %s1894_s22 }
 0xb50   : > { %1977 = vmatprep.subr.bf16.mxu0 %v2202_v11 }
 0xb53   : > { %1978 = vmatpush3.bf16.msra.mxu0 %v2369_v12 }
 0xc21   : > { %v1085_v43 = vpop.f32.mrb[8].mxu0 }
 0xc22   : > { %v1091_v44 = vadd.f32 %v1085_v43, %v1046_v42  ;;  %v1965_v45 = vpop.f32.mrb[9].mxu0 }
 0xc23   : > { %v1088_v46 = vpop.f32.mrb[10].mxu0 }
 0xc24   : > { %2090 = vtanh.f32 %v1091_v44  ;;  %v1966_v47 = vpop.f32.mrb[11].mxu0  ;;  %v1881_v49 = vmul.f32 -1.442695, %v1091_v44  ;;  %v1296_v46 = vld [vmem:[%s1295_s25] sm:$0x1] }
 0xc25   : > { %v1297_v47 = vunpack.c.l.bf16 %v1296_v46 }
 0xc26   : > { %2092 = vpow2.f32 %v1881_v49 }
 0xc2e   : > { %v2091_v48 = vpop.eup %2090 }
 0xc2f   : > { %1112 = vrot.lane.b32.xlu1 %v2091_v48, %s2205_s11 }
 0xc30   : > { %v2093_v50 = vpop.eup %2092 }
 0xc31   : > { %v1095_v51 = vadd.f32 1.0, %v2093_v50 }
 0xc33   : > { %2094 = vrcp.f32 %v1095_v51 }
 0xc3d   : > { %v2095_v53 = vpop.eup %2094 }
 0xc3e   : > { %v1110_v58 = vmul.f32 %v2095_v53, %v1108_v57  ;;  %v1383_v57 = vstv %s2571_s23 }
 0xc3f   : > { %vm1384_vm15 = vcmp.lt.s32.totalorder %v1383_v57, %v2406_v37 }
 0xca1   : > { %v1113_v54 = vpop.permute.xlu1 %1112 }
 0xca2   : > { %v1115_v55 = vmul.f32 %v2095_v53, %v1113_v54 }
 0xca4   : > { %1117 = vrot.lane.b32.xlu1 %v1115_v55, %s2206_s12 }
 0xca8   : > { %1136 = vperm.xlu1 %2055, %v1134_v56  }
 0xd16   : > { %v1118_v59 = vpop.permute.xlu1 %1117 }
 0xd17   : > { %v1120_v60 = vadd.f32 %v1118_v59, %v1110_v58 }
 0xd19   : > { %2096 = vtanh.f32 %v1120_v60  ;;  %v1158_v61 = vrot.slane %v1120_v60, %v2397_v27 }
 0xd1b   : > { %1159 = vrot.lane.b32.xlu1 %v1158_v61, %s2208_s27  ;;  %v1385_v61 = vsel %vm1384_vm15, 1, %v2207_v39 }
 0xd23   : > { %v2097_v62 = vpop.eup %2096 }
 0xd24   : > { %1123 = vrot.lane.b32.xlu0 %v2097_v62, %s2205_s11 }
 0xd27   : > { %v1137_v63 = vpop.permute.xlu1 %1136 }
 0xd28   : > { %vm1138_vm12 = vcmp.eq.s32.totalorder %v1137_v63, 1 }
 0xd8d   : > { %v1160_v0 = vpop.permute.xlu1 %1159 }
 0xd8e   : > { %v1162_v1 = vsel %vm1138_vm12, %v1160_v0, %v1036_v30 }
 0xd8f   : > { %v1232_v2 = vrot.slane %v1162_v1, %v2397_v27 }
 0xd91   : > { %1233 = vrot.lane.b32.xlu1 %v1232_v2, %s2206_s12 }
 0xd96   : > { %v1124_v3 = vpop.permute.xlu0 %1123 }
 0xd97   : > { %v1126_v4 = vmul.f32 %v2095_v53, %v1124_v3 }
 0xd99   : > { %v1146_v5 = vrot.slane %v1126_v4, %v2397_v27 }
 0xd9b   : > { %1147 = vrot.lane.b32.xlu0 %v1146_v5, %s2206_s12 }
 0xe03   : > { %v1234_v26 = vpop.permute.xlu1 %1233 }
 0xe0d   : > { %v1148_v6 = vpop.permute.xlu0 %1147 }
 0xe0e   : > { %v1150_v7 = vsel %vm1138_vm12, %v1148_v6, %v1024_v36  ;;  %v1163_v8 = vsel %vm1138_vm12, %v1148_v6, 0.0 }
 0xe0f   : > { %1166 = vst.msk [vmem:[%s1165_s0] sm:$0x3] %vm504_vm0, %v1163_v8  ;;  %v1173_v9 = vpack.c.bf16 %v1150_v7, %v1150_v7  ;;  %s1891_s0 = sshll.u32 %s2571_s23, 1 }
 0xe10   : > { %s1416_s21 = scalar_lea.vmem %s2347_s18, %s1891_s0 }
 0xe11   : > { %1972 = vmatmul.mubr.msk.bf16.vlgmr.msra.gmra.mrb[8].mxu1 %vm545_vm2, %v1173_v9 }
 0xe12   : > { %1984 = vmatpush3.bf16.msra.mxu1 %v2364_v10  ;;  %1987 = vmatprep.mubr.msk.bf16.mxu1 %vm2203_vm1, %v2202_v11 }
 0xe13   : > { %1985 = vmatprep.subr.bf16.mxu1 %v2202_v11 }
 0xe16   : > { %1986 = vmatpush3.bf16.msra.mxu1 %v2369_v12 }
 0xee4   : > { %v1211_v15 = vpop.f32.mrb[8].mxu1 }
 0xee5   : > { %v1217_v16 = vadd.f32 %v1211_v15, %v1172_v14  ;;  %v1973_v17 = vpop.f32.mrb[9].mxu1 }
 0xee6   : > { %v1214_v10 = vpop.f32.mrb[10].mxu1 }
 0xee7   : > { %2098 = vtanh.f32 %v1217_v16  ;;  %v1974_v18 = vpop.f32.mrb[11].mxu1  ;;  %v1886_v11 = vmul.f32 -1.442695, %v1217_v16  ;;  %v1420_v10 = vld [vmem:[%s1419_s9] sm:$0x1] }
 0xee8   : > { %v1421_v18 = vunpack.c.l.bf16 %v1420_v10 }
 0xee9   : > { %2100 = vpow2.f32 %v1886_v11 }
 0xef1   : > { %v2099_v19 = vpop.eup %2098 }
 0xef2   : > { %1238 = vrot.lane.b32.xlu0 %v2099_v19, %s2205_s11 }
 0xef3   : > { %v2101_v12 = vpop.eup %2100 }
 0xef4   : > { %v1221_v20 = vadd.f32 1.0, %v2101_v12 }
 0xef6   : > { %2102 = vrcp.f32 %v1221_v20 }
 0xf00   : > { %v2103_v22 = vpop.eup %2102 }
 0xf01   : > { %v1236_v28 = vmul.f32 %v2103_v22, %v1234_v26  ;;  %v1507_v26 = vstv %s1418_s1 }
 0xf64   : > { %v1239_v23 = vpop.permute.xlu0 %1238 }
 0xf65   : > { %v1241_v24 = vmul.f32 %v2103_v22, %v1239_v23 }
 0xf67   : > { %1243 = vrot.lane.b32.xlu0 %v1241_v24, %s2206_s12 }
 0xf6b   : > { %1262 = vperm.xlu0 %2054, %v1260_v25  }
 0xfd9   : > { %v1244_v29 = vpop.permute.xlu0 %1243 }
 0xfda   : > { %v1246_v30 = vadd.f32 %v1244_v29, %v1236_v28 }
 0xfdc   : > { %2104 = vtanh.f32 %v1246_v30  ;;  %v1284_v31 = vrot.slane %v1246_v30, %v2397_v27 }
 0xfde   : > { %1285 = vrot.lane.b32.xlu0 %v1284_v31, %s2208_s27 }
 0xfe6   : > { %v2105_v32 = vpop.eup %2104 }
 0xfe7   : > { %1249 = vrot.lane.b32.xlu1 %v2105_v32, %s2205_s11 }
 0xfea   : > { %v1263_v33 = vpop.permute.xlu0 %1262 }
 0xfeb   : > { %vm1264_vm14 = vcmp.eq.s32.totalorder %v1263_v33, 1 }
0x1050   : > { %v1286_v34 = vpop.permute.xlu0 %1285 }
0x1051   : > { %v1288_v35 = vsel %vm1264_vm14, %v1286_v34, %v1162_v1 }
0x1052   : > { %v1357_v36 = vrot.slane %v1288_v35, %v2397_v27 }
0x1054   : > { %1358 = vrot.lane.b32.xlu0 %v1357_v36, %s2206_s12 }
0x1059   : > { %v1250_v38 = vpop.permute.xlu1 %1249 }
0x105a   : > { %v1252_v40 = vmul.f32 %v2103_v22, %v1250_v38 }
0x105c   : > { %v1272_v41 = vrot.slane %v1252_v40, %v2397_v27 }
0x105e   : > { %1273 = vrot.lane.b32.xlu1 %v1272_v41, %s2206_s12 }
0x10c6   : > { %v1359_v62 = vpop.permute.xlu0 %1358 }
0x10d0   : > { %v1274_v42 = vpop.permute.xlu1 %1273 }
0x10d1   : > { %v1276_v43 = vsel %vm1264_vm14, %v1274_v42, %v1150_v7  ;;  %v1289_v44 = vsel %vm1264_vm14, %v1274_v42, 0.0 }
0x10d2   : > { %1292 = vst.msk [vmem:[%s1291_s28] sm:$0x3] %vm504_vm0, %v1289_v44  ;;  %v1298_v45 = vpack.c.bf16 %v1276_v43, %v1276_v43 }
0x10d4   : > { %1980 = vmatmul.mubr.msk.bf16.vlgmr.msra.gmra.mrb[12].mxu0 %vm545_vm2, %v1298_v45 }
0x11a7   : > { %v1336_v48 = vpop.f32.mrb[12].mxu0 }
0x11a8   : > { %v1342_v49 = vadd.f32 %v1336_v48, %v1297_v47  ;;  %v1981_v50 = vpop.f32.mrb[13].mxu0 }
0x11a9   : > { %v1339_v51 = vpop.f32.mrb[14].mxu0 }
0x11aa   : > { %2106 = vtanh.f32 %v1342_v49  ;;  %v1982_v52 = vpop.f32.mrb[15].mxu0  ;;  %v1890_v54 = vmul.f32 -1.442695, %v1342_v49 }
0x11ac   : > { %2108 = vpow2.f32 %v1890_v54 }
0x11b4   : > { %v2107_v53 = vpop.eup %2106 }
0x11b5   : > { %1363 = vrot.lane.b32.xlu1 %v2107_v53, %s2205_s11 }
0x11b6   : > { %v2109_v55 = vpop.eup %2108 }
0x11b7   : > { %v1346_v56 = vadd.f32 1.0, %v2109_v55 }
0x11b9   : > { %2110 = vrcp.f32 %v1346_v56 }
0x11c3   : > { %v2111_v58 = vpop.eup %2110 }
0x11c4   : > { %v1361_v63 = vmul.f32 %v2111_v58, %v1359_v62 }
0x1227   : > { %v1364_v59 = vpop.permute.xlu1 %1363 }
0x1228   : > { %v1366_v60 = vmul.f32 %v2111_v58, %v1364_v59 }
0x122a   : > { %1368 = vrot.lane.b32.xlu1 %v1366_v60, %s2206_s12 }
0x122e   : > { %1387 = vperm.xlu1 %2055, %v1385_v61  }
0x129c   : > { %v1369_v0 = vpop.permute.xlu1 %1368 }
0x129d   : > { %v1371_v1 = vadd.f32 %v1369_v0, %v1361_v63 }
0x129f   : > { %2112 = vtanh.f32 %v1371_v1  ;;  %v1409_v2 = vrot.slane %v1371_v1, %v2397_v27 }
0x12a1   : > { %1410 = vrot.lane.b32.xlu1 %v1409_v2, %s2208_s27 }
0x12a9   : > { %v2113_v3 = vpop.eup %2112 }
0x12aa   : > { %1374 = vrot.lane.b32.xlu0 %v2113_v3, %s2205_s11 }
0x12ad   : > { %v1388_v4 = vpop.permute.xlu1 %1387 }
0x12ae   : > { %vm1389_vm1 = vcmp.eq.s32.totalorder %v1388_v4, 1 }
0x1313   : > { %v1411_v5 = vpop.permute.xlu1 %1410 }
0x1314   : > { %v1413_v6 = vsel %vm1389_vm1, %v1411_v5, %v1288_v35 }
0x1315   : > { %v1481_v7 = vrot.slane %v1413_v6, %v2397_v27 }
0x1317   : > { %1482 = vrot.lane.b32.xlu1 %v1481_v7, %s2206_s12 }
0x131c   : > { %v1375_v8 = vpop.permute.xlu0 %1374 }
0x131d   : > { %v1377_v9 = vmul.f32 %v2111_v58, %v1375_v8 }
0x131f   : > { %v1397_v13 = vrot.slane %v1377_v9, %v2397_v27 }
0x1321   : > { %1398 = vrot.lane.b32.xlu0 %v1397_v13, %s2206_s12 }
0x1389   : > { %v1483_v32 = vpop.permute.xlu1 %1482 }
0x1393   : > { %v1399_v14 = vpop.permute.xlu0 %1398 }
0x1394   : > { %v1401_v15 = vsel %vm1389_vm1, %v1399_v14, %v1276_v43  ;;  %v1414_v16 = vsel %vm1389_vm1, %v1399_v14, 0.0 }
0x1395   : > { %1417 = vst.msk [vmem:[%s1416_s21] sm:$0x3] %vm504_vm0, %v1414_v16  ;;  %v1422_v17 = vpack.c.bf16 %v1401_v15, %v1401_v15 }
0x1397   : > { %1988 = vmatmul.mubr.msk.bf16.vlgmr.msra.gmra.mrb[12].mxu1 %vm545_vm2, %v1422_v17  ;;  %vm1508_vm2 = vcmp.lt.s32.totalorder %v1507_v26, %v2406_v37 }
0x1398   : > { %v1509_v31 = vsel %vm1508_vm2, 1, %v2207_v39 }
0x146a   : > { %v1460_v19 = vpop.f32.mrb[12].mxu1 }
0x146b   : > { %v1466_v11 = vadd.f32 %v1460_v19, %v1421_v18  ;;  %v1989_v12 = vpop.f32.mrb[13].mxu1 }
0x146c   : > { %v1463_v20 = vpop.f32.mrb[14].mxu1 }
0x146d   : > { %2114 = vtanh.f32 %v1466_v11  ;;  %v1990_v21 = vpop.f32.mrb[15].mxu1  ;;  %v1893_v23 = vmul.f32 -1.442695, %v1466_v11 }
0x146f   : > { %2116 = vpow2.f32 %v1893_v23 }
0x1477   : > { %v2115_v22 = vpop.eup %2114 }
0x1478   : > { %1487 = vrot.lane.b32.xlu0 %v2115_v22, %s2205_s11 }
0x1479   : > { %v2117_v24 = vpop.eup %2116 }
0x147a   : > { %v1470_v25 = vadd.f32 1.0, %v2117_v24 }
0x147c   : > { %2118 = vrcp.f32 %v1470_v25 }
0x1486   : > { %v2119_v28 = vpop.eup %2118 }
0x1487   : > { %v1485_v33 = vmul.f32 %v2119_v28, %v1483_v32 }
0x14ea   : > { %v1488_v29 = vpop.permute.xlu0 %1487 }
0x14eb   : > { %v1490_v30 = vmul.f32 %v2119_v28, %v1488_v29 }
0x14ed   : > { %1492 = vrot.lane.b32.xlu0 %v1490_v30, %s2206_s12 }
0x14f1   : > { %1511 = vperm.xlu0 %2054, %v1509_v31  }
0x155f   : > { %v1493_v34 = vpop.permute.xlu0 %1492 }
0x1560   : > { %v1495_v35 = vadd.f32 %v1493_v34, %v1485_v33 }
0x1562   : > { %2120 = vtanh.f32 %v1495_v35  ;;  %v1533_v36 = vrot.slane %v1495_v35, %v2397_v27 }
0x1564   : > { %1534 = vrot.lane.b32.xlu0 %v1533_v36, %s2208_s27 }
0x156c   : > { %v2121_v38 = vpop.eup %2120 }
0x156d   : > { %1498 = vrot.lane.b32.xlu1 %v2121_v38, %s2205_s11 }
0x1570   : > { %v1512_v37 = vpop.permute.xlu0 %1511 }
0x1571   : > { %vm1513_vm3 = vcmp.eq.s32.totalorder %v1512_v37, 1 }
0x15d6   : > { %v1535_v40 = vpop.permute.xlu0 %1534 }
0x15d7   : > { %v1537_v41 = vsel %vm1513_vm3, %v1535_v40, %v1413_v6 }
0x15d8   : > { %1543 = vst.msk [vmem:[#allocation3] sm:$0x3] %vm504_vm0, %v1537_v41 }
0x15df   : > { %v1499_v39 = vpop.permute.xlu1 %1498 }
0x15e0   : > { %v1501_v42 = vmul.f32 %v2119_v28, %v1499_v39 }
0x15e2   : > { %v1521_v43 = vrot.slane %v1501_v42, %v2397_v27 }
0x15e4   : > { %1522 = vrot.lane.b32.xlu1 %v1521_v43, %s2206_s12 }
0x1656   : > { %v1523_v44 = vpop.permute.xlu1 %1522 }
0x1657   : > { %v1525_v45 = vsel %vm1513_vm3, %v1523_v44, %v1401_v15  ;;  %v1538_v46 = vsel %vm1513_vm3, %v1523_v44, 0.0 }
0x1658   : > { %1541 = vst.msk [vmem:[%s1540_s14] sm:$0x3] %vm504_vm0, %v1538_v46  ;;  %1542 = vst.msk [vmem:[#allocation2] sm:$0x3] %vm504_vm0, %v1525_v45 }
0x1659 PF: > { %p1896_p2 = scmp.gt.s32.totalorder %s2333_s15, 0 }
0x165a   : > { %v2209_v47 = vmov (!%p1896_p2), 0.0  }
0x165b   : > { %1547 = sbr.rel (%p1896_p2) target bundleno = 5730 (0x1662), region = 93  ;;  %1549 = vst.msk [vmem:[%s2347_s18] sm:$0x3] (!%p1896_p2), %vm504_vm0, %v2209_v47  ;;  %1550 = vst.msk [vmem:[%s2347_s18 + $0x2] sm:$0x3] (!%p1896_p2), %vm504_vm0, %v2209_v47 }
0x165c   : > { %1551 = vst.msk [vmem:[%s2347_s18 + $0x4] sm:$0x3] (!%p1896_p2), %vm504_vm0, %v2209_v47  ;;  %1552 = vst.msk [vmem:[%s2347_s18 + $0x6] sm:$0x3] (!%p1896_p2), %vm504_vm0, %v2209_v47 }
0x165d   : > { %1553 = vst.msk [vmem:[%s2347_s18 + $0x8] sm:$0x3] (!%p1896_p2), %vm504_vm0, %v2209_v47  ;;  %1554 = vst.msk [vmem:[%s2347_s18 + $0xa] sm:$0x3] (!%p1896_p2), %vm504_vm0, %v2209_v47 }
0x165e   : > { %1555 = vst.msk [vmem:[%s2347_s18 + $0xc] sm:$0x3] (!%p1896_p2), %vm504_vm0, %v2209_v47  ;;  %1556 = vst.msk [vmem:[%s2347_s18 + $0xe] sm:$0x3] (!%p1896_p2), %vm504_vm0, %v2209_v47 }
0x1662 PF: > { %v1563_v27 = vld [vmem:[#allocation3] sm:$0x3]  ;;  %v1560_v48 = vld [vmem:[#allocation2] sm:$0x3]  ;;  %s1898_s13 = sshll.u32 %s2192_s10, 5  ;;  %s1609_s19 = sshll.u32 %s2361_s24, 4  ;;  %s1610_s19 = int_to_ptr.vmem [resolvable:$true] %s1609_s19 }
0x1663   : > { %1564 = vst.msk [vmem:[%s2361_s24] sm:$0x3] %vm504_vm0, %v1563_v27  ;;  %1562 = vst.msk [vmem:[%s497_s30] sm:$0x3] %vm504_vm0, %v1560_v48  ;;  %s2636_s27 = scalar_lea.hbm %s2688_s8, %s1898_s13  ;;  %s1584_s28 = scalar_lea.sflag [#allocation8], %s2324_s26 }
0x1664   : > { %s2122_s17 = scalar_lea.vmem %s1610_s19, 32  ;;  %s2210_s10 = smov [#allocation7]  }
0x1665   : > { %p2123_p3 = scmp.ne.s32.totalorder %s1610_s19, %s2122_s17  ;;  %s2126_s23 = sshll.u32 %s2210_s10, 4  ;;  %s2127_s23 = int_to_ptr.vmem [resolvable:$false] %s2126_s23 }
0x1666   : > { %s2128_s25 = scalar_lea.vmem %s2127_s23, 64  ;;  %p2129_p7 = scmp.lt.s32.totalorder %s1610_s19, %s2127_s23 }
0x1667   : > { %p2124_p4 = pnand %p2123_p3, %p2298_p5  ;;  %p2130_p8 = scmp.lt.s32.totalorder %s2128_s25, %s2122_s17 }
0x1669   : > { %p2125_p6 = pneg %p2124_p4  ;;  %p2131_p11 = por %p2130_p8, %p2129_p7 }
0x166b   : > { %p2132_p12 = pnand %p2131_p11, %p2125_p6 }
0x166d   : > { %2135 = shalt.err (!%p2132_p12)
}
0x166e   : > { %s2136_s30 = scalar_lea.hbm %s2636_s27, 32  ;;  %s2140_s24 = scalar_lea.hbm %s2688_s8, 64 }
0x166f   : > { %p2137_p13 = scmp.ne.s32.totalorder %s2636_s27, %s2136_s30  ;;  %p2141_p2 = scmp.lt.u32.totalorder %s2636_s27, %s2688_s8 }
0x1670   : > { %p2142_p3 = scmp.lt.u32.totalorder %s2140_s24, %s2136_s30  ;;  %p2144_p6 = scmp.lt.u32.totalorder %s2136_s30, %s2636_s27 }
0x1671   : > { %p2138_p0 = pnand %p2137_p13, %p2298_p5 }
0x1672   : > { %p2143_p4 = por %p2142_p3, %p2141_p2 }
0x1673   : > { %p2139_p1 = pneg %p2138_p0 }
0x1674   : > { %p2145_p7 = por %p2144_p6, %p2143_p4 }
0x1676   : > { %p2146_p8 = pnand %p2145_p7, %p2139_p1 }
0x1678   : > { %2149 = shalt.err (!%p2146_p8)
}
0x1679   : > { %1991 = dma.vmem_to_hbm [thread:$0]  (%p2298_p5), %s1610_s19, 32, %s2636_s27, %s1584_s28  }
0x167a PF: > { %s2708_s9 = sld [smem:[#allocation13_spill]]  ;;  %s1645_s22 = sand.u32 1, %s2180_s29  }
0x167b   : > { %p1994_p11 = pnand %p1847_p10, %p2309_p9  ;;  %s1646_s14 = scalar_lea.sflag [#allocation8], %s1645_s22 }
0x167d   : > { %2175 = dma.done.wait (!%p1994_p11), %s1646_s14, 32  }
0x167e   : > { %2177 = vsyncadd (!%p1994_p11), %s1646_s14, 4294967264  ;;  %s2709_s29 = sld [smem:[#allocation10_spill]]  ;;  %s2710_s30 = sld [smem:[#allocation11_spill]] }
0x167f   : > { %s2712_s10 = sld [smem:[#allocation12_spill]]  ;;  %s2713_s11 = sld [smem:[#allocation14_spill]] }
0x1680   : > { %s23_s12 = sadd.s32 1, %s2708_s9   ;;  %s2711_s9 = sld [smem:[#allocation15_spill]] }
0x1681   : > { %p20_p12 = scmp.ge.s32.totalorder %s23_s12, 4  }
0x1683   :  { %22 = sbr.rel (!%p20_p12) target bundleno = 7 (0x7), region = 186 }
0x168a   :  { %1651 = vsyncpa [#allocation8], 1 }
0x168b   :  { %1653 = vsyncpa [#allocation8 + $0x1], 1 }

// kernel: bicond_lstm_forward.2
= control target key start
LH: loop header
LB: loop body
LE: loop exit
PB: predicated region body
PF: predicated region fallthrough
CT: control target
= control target key end

     0   :  { %s2553_s0 = inlined_call_operand.<no memory space> [shape: s32[1], index: 0, kind: input, shape index: {}]   ;;  %s2554_s1 = inlined_call_operand.vmem [shape: bf16[8,2,256], index: 1, kind: input, shape index: {}]   ;;  %s2555_s2 = inlined_call_operand.vmem [shape: s32[2,1], index: 2, kind: input, shape index: {}]   ;;  %s2556_s3 = inlined_call_operand.vmem [shape: bf16[2,32,128], index: 3, kind: input, shape index: {}]   ;;  %s2557_s4 = inlined_call_operand.vmem [shape: f32[2,2,32], index: 4, kind: input, shape index: {}, may-alias: {4,5}]   ;;  %s2558_s5 = inlined_call_operand.vmem [shape: f32[2,2,32], index: 5, kind: input, shape index: {}, may-alias: {4,5}]   ;;  %s2559_s6 = inlined_call_operand.vmem [shape: f32[2,8,2,32], index: 6, kind: output, shape index: {0}]   ;;  %s2560_s7 = inlined_call_operand.vmem [shape: f32[2,2,32], index: 7, kind: output, shape index: {1}]   ;;  %s2561_s8 = inlined_call_operand.vmem [shape: f32[2,2,32], index: 8, kind: output, shape index: {2}]  }
   0x1   :  { %2564 = sst [smem:[#allocation9_spill]] %s2554_s1 }
   0x2   :  { %14 = sst [smem:[#allocation5]] %s2553_s0 }
   0x3   :  { %s2182_s29 = smov 0   ;;  %s2184_s30 = smov 0  }
   0x4   :  { %s2186_s9 = smov 0   ;;  %s2188_s10 = smov 0  }
   0x5   :  { %s2190_s11 = smov 0  }
   0x6 LB: > { %2565 = sst [smem:[#allocation7_spill]] %s2120_s10  ;;  %s32_s0 = sadd.s32 1, %s2120_s10  ;;  %s2124_s11 = sphi %s2190_s11, %s20_s11   ;;  %s2120_s10 = sphi %s2188_s10, %s2569_s10   ;;  %s2116_s9 = sphi %s2186_s9, %s2568_s9   ;;  %s2112_s30 = sphi %s2184_s30, %s2571_s30   ;;  %s2108_s29 = sphi %s2182_s29, %s2570_s29  }
   0x7   : > { %p34_p0 = scmp.ge.s32.totalorder %s32_s0, 2  ;;  %p58_p1 = scmp.ne.s32.totalorder %s2112_s30, %s2108_s29 }
   0x8   : > { %p59_p2 = scmp.eq.s32.totalorder %s2124_s11, 0  ;;  %s51_s13 = sadd.s32 1, %s2112_s30 }
   0x9   : > { %s2573_s0 = smov (%p34_p0, %s32_s0), 0  ;;  %p1828_p5 = scmp.ge.s32.totalorder %s2124_s11, 2 }
   0xa   : > { %2566 = sst [smem:[#allocation8_spill]] %s2573_s0  ;;  %p60_p3 = por %p59_p2, %p58_p1 }
   0xb   : > { %s47_s12 = ssub.s32 %s2120_s10, %s2573_s0  ;;  %276 = sbr.rel (%p1828_p5) target bundleno = 32 (0x20), region = 20 }
   0xc   : > { %p49_p4 = scmp.eq.s32.totalorder %s47_s12, 0 }
   0xe   : > { %s2217_s14 = scalar_select %p49_p4, %s2112_s30, %s51_s13  }
  0x12   : > { %279 = sbr.rel (!%p60_p3) target bundleno = 32 (0x20), region = 24  ;;  %s281_s15 = sand.u32 (%p60_p3), 1, %s2112_s30  }
  0x13   : > { %s2567_s1 = sld [smem:[#allocation9_spill]] (%p60_p3)  ;;  %s1829_s19 = sshll.u32 (%p60_p3), %s281_s15, 3 }
  0x14   : > { %s283_s20 = scalar_lea.vmem (%p60_p3), [#allocation6], %s1829_s19 }
  0x19   : > { %s292_s18 = scalar_lea.vmem %s2567_s1, %s2120_s10 }
  0x1a   : > { %v308_v0 = vld [vmem:[%s292_s18] sm:$0x1]  ;;  %v310_v1 = vld [vmem:[%s292_s18 + $0x2] sm:$0x1]  ;;  %v312_v2 = vld [vmem:[%s292_s18 + $0x4] sm:$0x1] }
  0x1b   : > { %v314_v3 = vld [vmem:[%s292_s18 + $0x6] sm:$0x1]  ;;  %309 = vst [vmem:[%s283_s20] sm:$0x1] %v308_v0  ;;  %311 = vst [vmem:[%s283_s20 + $0x1] sm:$0x1] %v310_v1 }
  0x1c   : > { %313 = vst [vmem:[%s283_s20 + $0x2] sm:$0x1] %v312_v2  ;;  %315 = vst [vmem:[%s283_s20 + $0x3] sm:$0x1] %v314_v3  ;;  %v316_v4 = vld [vmem:[%s292_s18 + $0x8] sm:$0x1] }
  0x1d   : > { %v318_v5 = vld [vmem:[%s292_s18 + $0xa] sm:$0x1]  ;;  %v320_v6 = vld [vmem:[%s292_s18 + $0xc] sm:$0x1]  ;;  %317 = vst [vmem:[%s283_s20 + $0x4] sm:$0x1] %v316_v4 }
  0x1e   : > { %319 = vst [vmem:[%s283_s20 + $0x5] sm:$0x1] %v318_v5  ;;  %321 = vst [vmem:[%s283_s20 + $0x6] sm:$0x1] %v320_v6  ;;  %v322_v7 = vld [vmem:[%s292_s18 + $0xe] sm:$0x1] }
  0x1f   : > { %323 = vst [vmem:[%s283_s20 + $0x7] sm:$0x1] %v322_v7 }
  0x20 PF: > { %p1830_p6 = scmp.ge.s32.totalorder %s2124_s11, 1  ;;  %p383_p7 = scmp.lt.s32.totalorder %s2124_s11, 3 }
  0x22   : > { %p384_p8 = pnand %p1830_p6, %p383_p7 }
  0x23   : > { %s390_s21 = sand.u32 (!%p384_p8), 1, %s2108_s29   ;;  %p457_p9 = scmp.lt.s32.totalorder (!%p384_p8), %s2116_s9, 1  ;;  %vm504_vm0 = vcmask (!%p384_p8), 254976  }
  0x24   : > { %387 = sbr.rel (%p384_p8) target bundleno = 5724 (0x165c), region = 77  ;;  %s1831_s22 = sshll.u32 (!%p384_p8), %s390_s21, 3 }
  0x25   : > { %s2230_s23 = ssub.s32 (!%p384_p8), 1, %s2116_s9  ;;  %s2232_s24 = sld [smem:[#allocation5]] (!%p384_p8) }
  0x2b   : > { %s458_s25 = scalar_select %p457_p9, %s2116_s9, 1 }
  0x2c   : > { %p1841_p10 = scmp.le.s32.totalorder %s2232_s24, 0 }
  0x2d   : > { %s1880_s26 = sshll.u32 %s458_s25, 4  ;;  %s2235_s27 = sshll.u32 %s458_s25, 1  ;;  %v2126_v11 = vmov (!%p1841_p10), 0.0   ;;  %vm2127_vm1 = vmmov (!%p1841_p10), 0   ;;  %vm545_vm2 = vcmask (!%p1841_p10), 261120   ;;  %v601_v23 = vlaneseq (!%p1841_p10) }
  0x2e   : > { %s461_s13 = scalar_lea.vmem %s2556_s3, %s1880_s26  ;;  %s465_s16 = scalar_lea.vmem %s2557_s4, %s2235_s27  ;;  %1906 = vmatprep.subr.bf16.mxu0 (!%p1841_p10), %v2126_v11  ;;  %1914 = vmatprep.subr.bf16.mxu1 (!%p1841_p10), %v2126_v11  ;;  %v2128_v21 = vmov (!%p1841_p10), 1983009808   ;;  %v2308_v37 = vld [vmem:[%s2555_s2] sm:$0x3] (!%p1841_p10)  ;;  %v2131_v39 = vmov (!%p1841_p10), 0  }
  0x2f   : > { %s2247_s19 = scalar_lea.vmem %s2559_s6, %s1880_s26  ;;  %s493_s25 = scalar_lea.vmem %s2560_s7, %s2235_s27  ;;  %v503_v8 = vld [vmem:[%s465_s16] sm:$0x3]  ;;  %v2271_v12 = vld [vmem:[%s461_s13 + $0x8] sm:$0xff] (!%p1841_p10)   ;;  %1910 = vmatprep.mubr.msk.bf16.mxu0 (!%p1841_p10), %vm2127_vm1, %v2126_v11  ;;  %1918 = vmatprep.mubr.msk.bf16.mxu1 (!%p1841_p10), %vm2127_vm1, %v2126_v11  ;;  %v599_v22 = vunpack.c.l.s4 (!%p1841_p10), %v2128_v21  ;;  %v602_v26 = vshrl.u32 (!%p1841_p10), %v601_v23, 7 }
  0x30   : > { %s497_s10 = scalar_lea.vmem %s2561_s8, %s2235_s27  ;;  %505 = vst.msk [vmem:[#allocation2] sm:$0x3] %vm504_vm0, %v503_v8  ;;  %s469_s29 = scalar_lea.vmem %s2558_s5, %s2235_s27  ;;  %v2266_v10 = vld [vmem:[%s461_s13] sm:$0xff] (!%p1841_p10)   ;;  %2018 = vset.pattern.permute.xlu0 (!%p1841_p10), %v2131_v39  ;;  %2019 = vset.pattern.permute.xlu1 (!%p1841_p10), %v2131_v39 }
  0x31   : > { %v506_v9 = vld [vmem:[%s469_s29] sm:$0x3]  ;;  %s2263_s26 = scalar_lea.vmem [#allocation6], %s1831_s22  ;;  %520 = sbr.rel (%p1841_p10) target bundleno = 5713 (0x1651), region = 89  ;;  %1907 = vmatpush3.bf16.msra.mxu0 (!%p1841_p10), %v2266_v10  ;;  %1915 = vmatpush3.bf16.msra.mxu1 (!%p1841_p10), %v2266_v10  ;;  %v600_v25 = vunpack.c.0.s8 (!%p1841_p10), %v599_v22 }
  0x32   : > { %507 = vst.msk [vmem:[#allocation3] sm:$0x3] %vm504_vm0, %v506_v9  ;;  %1908 = vmatprep.subr.bf16.mxu0 (!%p1841_p10), %v2126_v11  ;;  %1916 = vmatprep.subr.bf16.mxu1 (!%p1841_p10), %v2126_v11  ;;  %s528_s1 = smul.u32 (!%p1841_p10), 7, %s2116_s9  ;;  %s2129_s22 = smov (!%p1841_p10), 64  }
  0x33   : > { %v2299_v27 = vsub.s32 (!%p1841_p10), %v600_v25, %v602_v26  ;;  %s2130_s13 = smov (!%p1841_p10), 32   ;;  %s2132_s17 = smov (!%p1841_p10), 96  }
  0x34   : > { %s529_s0 = scalar_lea.vmem (!%p1841_p10), %s2263_s26, %s528_s1 [#allocation6]  ;;  %v628_v38 = vstv (!%p1841_p10), %s528_s1  ;;  %s1846_s18 = smul.u32 (!%p1841_p10), 14, %s2116_s9 }
  0x35   : > { %1909 = vmatpush3.bf16.msra.mxu0 (!%p1841_p10), %v2271_v12  ;;  %1917 = vmatpush3.bf16.msra.mxu1 (!%p1841_p10), %v2271_v12  ;;  %v530_v15 = vld [vmem:[%s529_s0] sm:$0x1] (!%p1841_p10)  ;;  %vm629_vm3 = vcmp.lt.s32.totalorder (!%p1841_p10), %v628_v38, %v2308_v37  ;;  %s664_s21 = smul.u32 (!%p1841_p10), 6, %s2116_s9  ;;  %s1850_s15 = sshll.u32 (!%p1841_p10), %s2230_s23, 1 }
  0x36   : > { %1922 = vmatprep.subr.bf16.mxu0 (!%p1841_p10), %v2126_v11  ;;  %1930 = vmatprep.subr.bf16.mxu1 (!%p1841_p10), %v2126_v11  ;;  %v531_v16 = vunpack.c.l.bf16 (!%p1841_p10), %v530_v15  ;;  %v630_v40 = vsel (!%p1841_p10), %vm629_vm3, 1, %v2131_v39  ;;  %s661_s20 = scalar_lea.vmem (!%p1841_p10), %s2247_s19, %s1846_s18  ;;  %s790_s0 = smul.u32 (!%p1841_p10), 5, %s2116_s9 }
  0x37   : > { %v2275_v13 = vld [vmem:[#allocation2] sm:$0x3] (!%p1841_p10)  ;;  %s2340_s28 = sadd.s32 (!%p1841_p10), %s664_s21, %s2230_s23 }
  0x38   : > { %v532_v14 = vpack.c.bf16 %v2275_v13, %v2275_v13  ;;  %s666_s12 = scalar_lea.vmem %s2263_s26, %s2340_s28 [#allocation6]  ;;  %v754_v5 = vstv %s2340_s28  ;;  %s1849_s29 = sshll.u32 %s2340_s28, 1 }
  0x39   : > { %v527_v28 = vld [vmem:[#allocation3] sm:$0x3]  ;;  %v667_v58 = vld [vmem:[%s666_s12] sm:$0x1]  ;;  %vm755_vm5 = vcmp.lt.s32.totalorder %v754_v5, %v2308_v37  ;;  %s787_s1 = scalar_lea.vmem %s2247_s19, %s1849_s29  ;;  %s2369_s16 = sadd.s32 %s1850_s15, %s790_s0 }
  0x3a   : > { %1911 = vmatmul.mubr.msk.bf16.vlgmr.msra.gmra.mrb[0].mxu0 %vm545_vm2, %v532_v14  ;;  %v604_v30 = vrot.slane %v527_v28, %v2299_v27  ;;  %v668_v59 = vunpack.c.l.bf16 %v667_v58  ;;  %v756_v9 = vsel %vm755_vm5, 1, %v2131_v39  ;;  %s792_s18 = scalar_lea.vmem %s2263_s26, %s2369_s16 [#allocation6]  ;;  %s915_s28 = smul.u32 3, %s2230_s23 }
  0x3b   : > { %1923 = vmatpush3.bf16.msra.mxu0 %v2266_v10  ;;  %1926 = vmatprep.mubr.msk.bf16.mxu0 %vm2127_vm1, %v2126_v11  ;;  %s1855_s12 = sshll.u32 %s2116_s9, 2 }
  0x3c   : > { %1924 = vmatprep.subr.bf16.mxu0 %v2126_v11  ;;  %s2397_s29 = sadd.s32 %s1855_s12, %s915_s28 }
  0x3d   : > { %s1859_s0 = sshll.u32 %s2397_s29, 1 }
  0x3e   : > { %s1039_s15 = scalar_lea.vmem %s2247_s19, %s1859_s0 }
  0x3f   : > { %1925 = vmatpush3.bf16.msra.mxu0 %v2271_v12 }
  0x40   : > { %1938 = vmatprep.subr.bf16.mxu0 %v2126_v11 }
 0x10d   : > { %v583_v17 = vpop.f32.mrb[0].mxu0 }
 0x10e   : > { %v589_v18 = vadd.f32 %v583_v17, %v531_v16  ;;  %v1912_v19 = vpop.f32.mrb[1].mxu0 }
 0x10f   : > { %v586_v20 = vpop.f32.mrb[2].mxu0 }
 0x110   : > { %2022 = vtanh.f32 %v589_v18  ;;  %v1913_v24 = vpop.f32.mrb[3].mxu0  ;;  %v1845_v31 = vmul.f32 -1.442695, %v589_v18 }
 0x112   : > { %2024 = vpow2.f32 %v1845_v31  ;;  %v793_v31 = vld [vmem:[%s792_s18] sm:$0x1]  ;;  %s1860_s18 = sshll.u32 %s2230_s23, 2 }
 0x11a   : > { %v2023_v29 = vpop.eup %2022 }
 0x11b   : > { %610 = vrot.lane.b32.xlu0 %v2023_v29, %s2129_s22 }
 0x11c   : > { %v2025_v32 = vpop.eup %2024 }
 0x11d   : > { %v593_v33 = vadd.f32 1.0, %v2025_v32  ;;  %v794_v32 = vunpack.c.l.bf16 %v793_v31 }
 0x11f   : > { %605 = vrot.lane.b32.xlu0 %v604_v30, %s2130_s13  ;;  %2026 = vrcp.f32 %v593_v33 }
 0x123   : > { %632 = vperm.xlu0 %2018, %v630_v40  }
 0x129   : > { %v2027_v34 = vpop.eup %2026 }
 0x18d   : > { %v611_v35 = vpop.permute.xlu0 %610 }
 0x18e   : > { %v613_v36 = vmul.f32 %v2027_v34, %v611_v35 }
 0x190   : > { %615 = vrot.lane.b32.xlu1 %v613_v36, %s2130_s13 }
 0x191   : > { %v606_v41 = vpop.permute.xlu0 %605 }
 0x192   : > { %v608_v42 = vmul.f32 %v2027_v34, %v606_v41 }
 0x1a2   : > { %v633_v50 = vpop.permute.xlu0 %632 }
 0x1a3   : > { %vm634_vm4 = vcmp.eq.s32.totalorder %v633_v50, 1 }
 0x202   : > { %v616_v43 = vpop.permute.xlu1 %615 }
 0x203   : > { %v618_v44 = vadd.f32 %v616_v43, %v608_v42 }
 0x205   : > { %2028 = vtanh.f32 %v618_v44  ;;  %v654_v49 = vrot.slane %v618_v44, %v2299_v27  ;;  %v880_v44 = vstv %s2369_s16 }
 0x206   : > { %vm881_vm7 = vcmp.lt.s32.totalorder %v880_v44, %v2308_v37 }
 0x20f   : > { %v2029_v45 = vpop.eup %2028 }
 0x210   : > { %621 = vrot.lane.b32.xlu1 %v2029_v45, %s2129_s22 }
 0x282   : > { %v622_v46 = vpop.permute.xlu1 %621 }
 0x283   : > { %v624_v47 = vmul.f32 %v2027_v34, %v622_v46 }
 0x285   : > { %v642_v48 = vrot.slane %v624_v47, %v2299_v27 }
 0x287   : > { %643 = vrot.lane.b32.xlu1 %v642_v48, %s2130_s13  ;;  %v882_v48 = vsel %vm881_vm7, 1, %v2131_v39 }
 0x28b   : > { %655 = vrot.lane.b32.xlu1 %v654_v49, %s2132_s17 }
 0x2f9   : > { %v644_v51 = vpop.permute.xlu1 %643 }
 0x2fa   : > { %v2324_v52 = vsel %vm634_vm4, %v644_v51, %v2275_v13  ;;  %v659_v53 = vsel %vm634_vm4, %v644_v51, 0.0 }
 0x2fb   : > { %663 = vst.msk [vmem:[%s661_s20] sm:$0x3] %vm504_vm0, %v659_v53  ;;  %v669_v54 = vpack.c.bf16 %v2324_v52, %v2324_v52  ;;  %s1854_s20 = sshll.u32 %s2369_s16, 1  ;;  %s1042_s16 = smul.u32 3, %s2116_s9 }
 0x2fc   : > { %s913_s21 = scalar_lea.vmem %s2247_s19, %s1854_s20 }
 0x2fd   : > { %v656_v55 = vpop.permute.xlu1 %655  ;;  %1919 = vmatmul.mubr.msk.bf16.vlgmr.msra.gmra.mrb[0].mxu1 %vm545_vm2, %v669_v54  ;;  %s2424_s20 = sadd.s32 %s1860_s18, %s1042_s16 }
 0x2fe   : > { %v658_v56 = vsel %vm634_vm4, %v656_v55, %v527_v28  ;;  %1931 = vmatpush3.bf16.msra.mxu1 %v2266_v10  ;;  %1934 = vmatprep.mubr.msk.bf16.mxu1 %vm2127_vm1, %v2126_v11  ;;  %s1864_s28 = sshll.u32 %s2424_s20, 1 }
 0x2ff   : > { %v728_v57 = vrot.slane %v658_v56, %v2299_v27  ;;  %1932 = vmatprep.subr.bf16.mxu1 %v2126_v11  ;;  %s1165_s12 = scalar_lea.vmem %s2247_s19, %s1864_s28 }
 0x301   : > { %729 = vrot.lane.b32.xlu1 %v728_v57, %s2130_s13 }
 0x302   : > { %1933 = vmatpush3.bf16.msra.mxu1 %v2271_v12 }
 0x303   : > { %1946 = vmatprep.subr.bf16.mxu1 %v2126_v11 }
 0x373   : > { %v730_v13 = vpop.permute.xlu1 %729 }
 0x3d0   : > { %v707_v60 = vpop.f32.mrb[0].mxu1 }
 0x3d1   : > { %v713_v61 = vadd.f32 %v707_v60, %v668_v59  ;;  %v1920_v62 = vpop.f32.mrb[1].mxu1 }
 0x3d2   : > { %v710_v63 = vpop.f32.mrb[2].mxu1 }
 0x3d3   : > { %2030 = vtanh.f32 %v713_v61  ;;  %v1921_v0 = vpop.f32.mrb[3].mxu1  ;;  %v1848_v2 = vmul.f32 -1.442695, %v713_v61 }
 0x3d5   : > { %2032 = vpow2.f32 %v1848_v2 }
 0x3dd   : > { %v2031_v1 = vpop.eup %2030 }
 0x3de   : > { %734 = vrot.lane.b32.xlu0 %v2031_v1, %s2129_s22 }
 0x3df   : > { %v2033_v3 = vpop.eup %2032 }
 0x3e0   : > { %v717_v4 = vadd.f32 1.0, %v2033_v3 }
 0x3e2   : > { %2034 = vrcp.f32 %v717_v4 }
 0x3ec   : > { %v2035_v6 = vpop.eup %2034 }
 0x3ed   : > { %v732_v14 = vmul.f32 %v2035_v6, %v730_v13 }
 0x450   : > { %v735_v7 = vpop.permute.xlu0 %734 }
 0x451   : > { %v737_v8 = vmul.f32 %v2035_v6, %v735_v7 }
 0x453   : > { %739 = vrot.lane.b32.xlu0 %v737_v8, %s2130_s13 }
 0x457   : > { %758 = vperm.xlu0 %2018, %v756_v9  }
 0x4c5   : > { %v740_v15 = vpop.permute.xlu0 %739 }
 0x4c6   : > { %v742_v16 = vadd.f32 %v740_v15, %v732_v14 }
 0x4c8   : > { %2036 = vtanh.f32 %v742_v16  ;;  %v780_v17 = vrot.slane %v742_v16, %v2299_v27  ;;  %v1006_v16 = vstv %s2397_s29 }
 0x4c9   : > { %vm1007_vm9 = vcmp.lt.s32.totalorder %v1006_v16, %v2308_v37 }
 0x4ca   : > { %781 = vrot.lane.b32.xlu0 %v780_v17, %s2132_s17 }
 0x4d2   : > { %v2037_v18 = vpop.eup %2036 }
 0x4d3   : > { %745 = vrot.lane.b32.xlu1 %v2037_v18, %s2129_s22 }
 0x4d6   : > { %v759_v19 = vpop.permute.xlu0 %758 }
 0x4d7   : > { %vm760_vm6 = vcmp.eq.s32.totalorder %v759_v19, 1 }
 0x53c   : > { %v782_v20 = vpop.permute.xlu0 %781 }
 0x53d   : > { %v784_v21 = vsel %vm760_vm6, %v782_v20, %v658_v56  ;;  %v1008_v20 = vsel %vm1007_vm9, 1, %v2131_v39 }
 0x53e   : > { %v854_v22 = vrot.slane %v784_v21, %v2299_v27 }
 0x540   : > { %855 = vrot.lane.b32.xlu0 %v854_v22, %s2130_s13 }
 0x545   : > { %v746_v23 = vpop.permute.xlu1 %745 }
 0x546   : > { %v748_v24 = vmul.f32 %v2035_v6, %v746_v23 }
 0x548   : > { %v768_v25 = vrot.slane %v748_v24, %v2299_v27 }
 0x54a   : > { %769 = vrot.lane.b32.xlu1 %v768_v25, %s2130_s13 }
 0x5b2   : > { %v856_v49 = vpop.permute.xlu0 %855 }
 0x5bc   : > { %v770_v26 = vpop.permute.xlu1 %769 }
 0x5bd   : > { %v772_v28 = vsel %vm760_vm6, %v770_v26, %v2324_v52  ;;  %v785_v29 = vsel %vm760_vm6, %v770_v26, 0.0 }
 0x5be   : > { %788 = vst.msk [vmem:[%s787_s1] sm:$0x3] %vm504_vm0, %v785_v29  ;;  %v795_v30 = vpack.c.bf16 %v772_v28, %v772_v28  ;;  %s918_s1 = scalar_lea.vmem %s2263_s26, %s2397_s29 [#allocation6]  ;;  %s1167_s29 = smul.u32 5, %s2230_s23 }
 0x5bf   : > { %v919_v2 = vld [vmem:[%s918_s1] sm:$0x1]  ;;  %s1865_s1 = sshll.u32 %s2116_s9, 1 }
 0x5c0   : > { %1927 = vmatmul.mubr.msk.bf16.vlgmr.msra.gmra.mrb[4].mxu0 %vm545_vm2, %v795_v30  ;;  %v920_v3 = vunpack.c.l.bf16 %v919_v2  ;;  %s2451_s0 = sadd.s32 %s1865_s1, %s1167_s29  ;;  %s1418_s29 = smul.u32 7, %s2230_s23 }
 0x5c1   : > { %1939 = vmatpush3.bf16.msra.mxu0 %v2266_v10  ;;  %1942 = vmatprep.mubr.msk.bf16.mxu0 %vm2127_vm1, %v2126_v11  ;;  %s1869_s16 = sshll.u32 %s2451_s0, 1 }
 0x5c2   : > { %1940 = vmatprep.subr.bf16.mxu0 %v2126_v11  ;;  %s1291_s18 = scalar_lea.vmem %s2247_s19, %s1869_s16  ;;  %s1419_s1 = scalar_lea.vmem %s2263_s26, %s1418_s29 [#allocation6] }
 0x5c5   : > { %1941 = vmatpush3.bf16.msra.mxu0 %v2271_v12 }
 0x5c6   : > { %1954 = vmatprep.subr.bf16.mxu0 %v2126_v11 }
 0x693   : > { %v833_v33 = vpop.f32.mrb[4].mxu0 }
 0x694   : > { %v839_v34 = vadd.f32 %v833_v33, %v794_v32  ;;  %v1928_v35 = vpop.f32.mrb[5].mxu0 }
 0x695   : > { %v836_v36 = vpop.f32.mrb[6].mxu0 }
 0x696   : > { %2038 = vtanh.f32 %v839_v34  ;;  %v1929_v38 = vpop.f32.mrb[7].mxu0  ;;  %v1852_v41 = vmul.f32 -1.442695, %v839_v34 }
 0x698   : > { %2040 = vpow2.f32 %v1852_v41 }
 0x6a0   : > { %v2039_v40 = vpop.eup %2038 }
 0x6a1   : > { %860 = vrot.lane.b32.xlu1 %v2039_v40, %s2129_s22 }
 0x6a2   : > { %v2041_v42 = vpop.eup %2040 }
 0x6a3   : > { %v843_v43 = vadd.f32 1.0, %v2041_v42 }
 0x6a5   : > { %2042 = vrcp.f32 %v843_v43 }
 0x6af   : > { %v2043_v45 = vpop.eup %2042 }
 0x6b0   : > { %v858_v50 = vmul.f32 %v2043_v45, %v856_v49 }
 0x713   : > { %v861_v46 = vpop.permute.xlu1 %860 }
 0x714   : > { %v863_v47 = vmul.f32 %v2043_v45, %v861_v46 }
 0x716   : > { %865 = vrot.lane.b32.xlu1 %v863_v47, %s2130_s13 }
 0x71a   : > { %884 = vperm.xlu1 %2019, %v882_v48  }
 0x788   : > { %v866_v51 = vpop.permute.xlu1 %865 }
 0x789   : > { %v868_v52 = vadd.f32 %v866_v51, %v858_v50 }
 0x78b   : > { %2044 = vtanh.f32 %v868_v52  ;;  %v906_v53 = vrot.slane %v868_v52, %v2299_v27  ;;  %v1132_v52 = vstv %s2424_s20 }
 0x78c   : > { %vm1133_vm11 = vcmp.lt.s32.totalorder %v1132_v52, %v2308_v37 }
 0x78d   : > { %907 = vrot.lane.b32.xlu1 %v906_v53, %s2132_s17 }
 0x795   : > { %v2045_v54 = vpop.eup %2044 }
 0x796   : > { %871 = vrot.lane.b32.xlu0 %v2045_v54, %s2129_s22 }
 0x799   : > { %v885_v55 = vpop.permute.xlu1 %884 }
 0x79a   : > { %vm886_vm8 = vcmp.eq.s32.totalorder %v885_v55, 1 }
 0x7ff   : > { %v908_v56 = vpop.permute.xlu1 %907 }
 0x800   : > { %v910_v57 = vsel %vm886_vm8, %v908_v56, %v784_v21  ;;  %v1134_v56 = vsel %vm1133_vm11, 1, %v2131_v39 }
 0x801   : > { %v980_v58 = vrot.slane %v910_v57, %v2299_v27 }
 0x803   : > { %981 = vrot.lane.b32.xlu1 %v980_v58, %s2130_s13 }
 0x808   : > { %v872_v59 = vpop.permute.xlu0 %871 }
 0x809   : > { %v874_v60 = vmul.f32 %v2043_v45, %v872_v59 }
 0x80b   : > { %v894_v61 = vrot.slane %v874_v60, %v2299_v27 }
 0x80d   : > { %895 = vrot.lane.b32.xlu0 %v894_v61, %s2130_s13 }
 0x875   : > { %v982_v21 = vpop.permute.xlu1 %981 }
 0x87f   : > { %v896_v62 = vpop.permute.xlu0 %895 }
 0x880   : > { %v898_v63 = vsel %vm886_vm8, %v896_v62, %v772_v28  ;;  %v911_v0 = vsel %vm886_vm8, %v896_v62, 0.0 }
 0x881   : > { %914 = vst.msk [vmem:[%s913_s21] sm:$0x3] %vm504_vm0, %v911_v0  ;;  %v921_v1 = vpack.c.bf16 %v898_v63, %v898_v63  ;;  %s1044_s21 = scalar_lea.vmem %s2263_s26, %s2424_s20 [#allocation6]  ;;  %s1293_s20 = smul.u32 6, %s2230_s23 }
 0x882   : > { %v1045_v41 = vld [vmem:[%s1044_s21] sm:$0x1] }
 0x883   : > { %1935 = vmatmul.mubr.msk.bf16.vlgmr.msra.gmra.mrb[4].mxu1 %vm545_vm2, %v921_v1  ;;  %v1046_v42 = vunpack.c.l.bf16 %v1045_v41  ;;  %s2473_s21 = sadd.s32 %s2116_s9, %s1293_s20 }
 0x884   : > { %1947 = vmatpush3.bf16.msra.mxu1 %v2266_v10  ;;  %1950 = vmatprep.mubr.msk.bf16.mxu1 %vm2127_vm1, %v2126_v11  ;;  %s1295_s28 = scalar_lea.vmem %s2263_s26, %s2473_s21 [#allocation6]  ;;  %s1872_s9 = sshll.u32 %s2473_s21, 1 }
 0x885   : > { %1948 = vmatprep.subr.bf16.mxu1 %v2126_v11 }
 0x888   : > { %1949 = vmatpush3.bf16.msra.mxu1 %v2271_v12 }
 0x889   : > { %1962 = vmatprep.subr.bf16.mxu1 %v2126_v11 }
 0x956   : > { %v959_v4 = vpop.f32.mrb[4].mxu1 }
 0x957   : > { %v965_v5 = vadd.f32 %v959_v4, %v920_v3  ;;  %v1936_v6 = vpop.f32.mrb[5].mxu1 }
 0x958   : > { %v962_v7 = vpop.f32.mrb[6].mxu1 }
 0x959   : > { %2046 = vtanh.f32 %v965_v5  ;;  %v1937_v8 = vpop.f32.mrb[7].mxu1  ;;  %v1857_v13 = vmul.f32 -1.442695, %v965_v5 }
 0x95b   : > { %2048 = vpow2.f32 %v1857_v13 }
 0x963   : > { %v2047_v9 = vpop.eup %2046 }
 0x964   : > { %986 = vrot.lane.b32.xlu0 %v2047_v9, %s2129_s22 }
 0x965   : > { %v2049_v14 = vpop.eup %2048 }
 0x966   : > { %v969_v15 = vadd.f32 1.0, %v2049_v14 }
 0x968   : > { %2050 = vrcp.f32 %v969_v15 }
 0x972   : > { %v2051_v17 = vpop.eup %2050 }
 0x973   : > { %v984_v22 = vmul.f32 %v2051_v17, %v982_v21  ;;  %v1258_v21 = vstv %s2451_s0 }
 0x974   : > { %vm1259_vm13 = vcmp.lt.s32.totalorder %v1258_v21, %v2308_v37 }
 0x9d6   : > { %v987_v18 = vpop.permute.xlu0 %986 }
 0x9d7   : > { %v989_v19 = vmul.f32 %v2051_v17, %v987_v18 }
 0x9d9   : > { %991 = vrot.lane.b32.xlu0 %v989_v19, %s2130_s13 }
 0x9dd   : > { %1010 = vperm.xlu0 %2018, %v1008_v20  }
 0xa4b   : > { %v992_v23 = vpop.permute.xlu0 %991 }
 0xa4c   : > { %v994_v24 = vadd.f32 %v992_v23, %v984_v22 }
 0xa4e   : > { %2052 = vtanh.f32 %v994_v24  ;;  %v1032_v25 = vrot.slane %v994_v24, %v2299_v27 }
 0xa50   : > { %1033 = vrot.lane.b32.xlu0 %v1032_v25, %s2132_s17  ;;  %v1260_v25 = vsel %vm1259_vm13, 1, %v2131_v39 }
 0xa58   : > { %v2053_v26 = vpop.eup %2052 }
 0xa59   : > { %997 = vrot.lane.b32.xlu1 %v2053_v26, %s2129_s22 }
 0xa5c   : > { %v1011_v28 = vpop.permute.xlu0 %1010 }
 0xa5d   : > { %vm1012_vm10 = vcmp.eq.s32.totalorder %v1011_v28, 1 }
 0xac2   : > { %v1034_v29 = vpop.permute.xlu0 %1033 }
 0xac3   : > { %v1036_v30 = vsel %vm1012_vm10, %v1034_v29, %v910_v57 }
 0xac4   : > { %v1106_v31 = vrot.slane %v1036_v30, %v2299_v27 }
 0xac6   : > { %1107 = vrot.lane.b32.xlu0 %v1106_v31, %s2130_s13 }
 0xacb   : > { %v998_v32 = vpop.permute.xlu1 %997 }
 0xacc   : > { %v1000_v33 = vmul.f32 %v2051_v17, %v998_v32 }
 0xace   : > { %v1020_v34 = vrot.slane %v1000_v33, %v2299_v27 }
 0xad0   : > { %1021 = vrot.lane.b32.xlu1 %v1020_v34, %s2130_s13 }
 0xb38   : > { %v1108_v57 = vpop.permute.xlu0 %1107 }
 0xb42   : > { %v1022_v35 = vpop.permute.xlu1 %1021 }
 0xb43   : > { %v1024_v36 = vsel %vm1012_vm10, %v1022_v35, %v898_v63  ;;  %v1037_v38 = vsel %vm1012_vm10, %v1022_v35, 0.0 }
 0xb44   : > { %1040 = vst.msk [vmem:[%s1039_s15] sm:$0x3] %vm504_vm0, %v1037_v38  ;;  %v1047_v40 = vpack.c.bf16 %v1024_v36, %v1024_v36  ;;  %s1170_s15 = scalar_lea.vmem %s2263_s26, %s2451_s0 [#allocation6]  ;;  %s1875_s26 = smul.u32 14, %s2230_s23 }
 0xb45   : > { %v1171_v13 = vld [vmem:[%s1170_s15] sm:$0x1] }
 0xb46   : > { %1943 = vmatmul.mubr.msk.bf16.vlgmr.msra.gmra.mrb[8].mxu0 %vm545_vm2, %v1047_v40  ;;  %v1172_v14 = vunpack.c.l.bf16 %v1171_v13  ;;  %s1540_s0 = scalar_lea.vmem %s2247_s19, %s1875_s26 }
 0xb47   : > { %1955 = vmatpush3.bf16.msra.mxu0 %v2266_v10  ;;  %1958 = vmatprep.mubr.msk.bf16.mxu0 %vm2127_vm1, %v2126_v11 }
 0xb48   : > { %1956 = vmatprep.subr.bf16.mxu0 %v2126_v11 }
 0xb4b   : > { %1957 = vmatpush3.bf16.msra.mxu0 %v2271_v12 }
 0xc19   : > { %v1085_v43 = vpop.f32.mrb[8].mxu0 }
 0xc1a   : > { %v1091_v44 = vadd.f32 %v1085_v43, %v1046_v42  ;;  %v1944_v45 = vpop.f32.mrb[9].mxu0 }
 0xc1b   : > { %v1088_v46 = vpop.f32.mrb[10].mxu0 }
 0xc1c   : > { %2054 = vtanh.f32 %v1091_v44  ;;  %v1945_v47 = vpop.f32.mrb[11].mxu0  ;;  %v1862_v49 = vmul.f32 -1.442695, %v1091_v44  ;;  %v1296_v46 = vld [vmem:[%s1295_s28] sm:$0x1] }
 0xc1d   : > { %v1297_v47 = vunpack.c.l.bf16 %v1296_v46 }
 0xc1e   : > { %2056 = vpow2.f32 %v1862_v49 }
 0xc26   : > { %v2055_v48 = vpop.eup %2054 }
 0xc27   : > { %1112 = vrot.lane.b32.xlu1 %v2055_v48, %s2129_s22 }
 0xc28   : > { %v2057_v50 = vpop.eup %2056 }
 0xc29   : > { %v1095_v51 = vadd.f32 1.0, %v2057_v50 }
 0xc2b   : > { %2058 = vrcp.f32 %v1095_v51 }
 0xc35   : > { %v2059_v53 = vpop.eup %2058 }
 0xc36   : > { %v1110_v58 = vmul.f32 %v2059_v53, %v1108_v57  ;;  %v1383_v57 = vstv %s2473_s21 }
 0xc37   : > { %vm1384_vm15 = vcmp.lt.s32.totalorder %v1383_v57, %v2308_v37 }
 0xc99   : > { %v1113_v54 = vpop.permute.xlu1 %1112 }
 0xc9a   : > { %v1115_v55 = vmul.f32 %v2059_v53, %v1113_v54 }
 0xc9c   : > { %1117 = vrot.lane.b32.xlu1 %v1115_v55, %s2130_s13 }
 0xca0   : > { %1136 = vperm.xlu1 %2019, %v1134_v56  }
 0xd0e   : > { %v1118_v59 = vpop.permute.xlu1 %1117 }
 0xd0f   : > { %v1120_v60 = vadd.f32 %v1118_v59, %v1110_v58 }
 0xd11   : > { %2060 = vtanh.f32 %v1120_v60  ;;  %v1158_v61 = vrot.slane %v1120_v60, %v2299_v27 }
 0xd13   : > { %1159 = vrot.lane.b32.xlu1 %v1158_v61, %s2132_s17  ;;  %v1385_v61 = vsel %vm1384_vm15, 1, %v2131_v39 }
 0xd1b   : > { %v2061_v62 = vpop.eup %2060 }
 0xd1c   : > { %1123 = vrot.lane.b32.xlu0 %v2061_v62, %s2129_s22 }
 0xd1f   : > { %v1137_v63 = vpop.permute.xlu1 %1136 }
 0xd20   : > { %vm1138_vm12 = vcmp.eq.s32.totalorder %v1137_v63, 1 }
 0xd85   : > { %v1160_v0 = vpop.permute.xlu1 %1159 }
 0xd86   : > { %v1162_v1 = vsel %vm1138_vm12, %v1160_v0, %v1036_v30 }
 0xd87   : > { %v1232_v2 = vrot.slane %v1162_v1, %v2299_v27 }
 0xd89   : > { %1233 = vrot.lane.b32.xlu1 %v1232_v2, %s2130_s13 }
 0xd8e   : > { %v1124_v3 = vpop.permute.xlu0 %1123 }
 0xd8f   : > { %v1126_v4 = vmul.f32 %v2059_v53, %v1124_v3 }
 0xd91   : > { %v1146_v5 = vrot.slane %v1126_v4, %v2299_v27 }
 0xd93   : > { %1147 = vrot.lane.b32.xlu0 %v1146_v5, %s2130_s13 }
 0xdfb   : > { %v1234_v26 = vpop.permute.xlu1 %1233 }
 0xe05   : > { %v1148_v6 = vpop.permute.xlu0 %1147 }
 0xe06   : > { %v1150_v7 = vsel %vm1138_vm12, %v1148_v6, %v1024_v36  ;;  %v1163_v8 = vsel %vm1138_vm12, %v1148_v6, 0.0 }
 0xe07   : > { %1166 = vst.msk [vmem:[%s1165_s12] sm:$0x3] %vm504_vm0, %v1163_v8  ;;  %v1173_v9 = vpack.c.bf16 %v1150_v7, %v1150_v7  ;;  %s1416_s12 = scalar_lea.vmem %s2247_s19, %s1872_s9 }
 0xe09   : > { %1951 = vmatmul.mubr.msk.bf16.vlgmr.msra.gmra.mrb[8].mxu1 %vm545_vm2, %v1173_v9 }
 0xe0a   : > { %1963 = vmatpush3.bf16.msra.mxu1 %v2266_v10  ;;  %1966 = vmatprep.mubr.msk.bf16.mxu1 %vm2127_vm1, %v2126_v11 }
 0xe0b   : > { %1964 = vmatprep.subr.bf16.mxu1 %v2126_v11 }
 0xe0e   : > { %1965 = vmatpush3.bf16.msra.mxu1 %v2271_v12 }
 0xedc   : > { %v1211_v15 = vpop.f32.mrb[8].mxu1 }
 0xedd   : > { %v1217_v16 = vadd.f32 %v1211_v15, %v1172_v14  ;;  %v1952_v17 = vpop.f32.mrb[9].mxu1 }
 0xede   : > { %v1214_v10 = vpop.f32.mrb[10].mxu1 }
 0xedf   : > { %2062 = vtanh.f32 %v1217_v16  ;;  %v1953_v18 = vpop.f32.mrb[11].mxu1  ;;  %v1867_v11 = vmul.f32 -1.442695, %v1217_v16  ;;  %v1420_v10 = vld [vmem:[%s1419_s1] sm:$0x1] }
 0xee0   : > { %v1421_v18 = vunpack.c.l.bf16 %v1420_v10 }
 0xee1   : > { %2064 = vpow2.f32 %v1867_v11 }
 0xee9   : > { %v2063_v19 = vpop.eup %2062 }
 0xeea   : > { %1238 = vrot.lane.b32.xlu0 %v2063_v19, %s2129_s22 }
 0xeeb   : > { %v2065_v12 = vpop.eup %2064 }
 0xeec   : > { %v1221_v20 = vadd.f32 1.0, %v2065_v12 }
 0xeee   : > { %2066 = vrcp.f32 %v1221_v20 }
 0xef8   : > { %v2067_v22 = vpop.eup %2066 }
 0xef9   : > { %v1236_v28 = vmul.f32 %v2067_v22, %v1234_v26  ;;  %v1507_v26 = vstv %s1418_s29 }
 0xf5c   : > { %v1239_v23 = vpop.permute.xlu0 %1238 }
 0xf5d   : > { %v1241_v24 = vmul.f32 %v2067_v22, %v1239_v23 }
 0xf5f   : > { %1243 = vrot.lane.b32.xlu0 %v1241_v24, %s2130_s13 }
 0xf63   : > { %1262 = vperm.xlu0 %2018, %v1260_v25  }
 0xfd1   : > { %v1244_v29 = vpop.permute.xlu0 %1243 }
 0xfd2   : > { %v1246_v30 = vadd.f32 %v1244_v29, %v1236_v28 }
 0xfd4   : > { %2068 = vtanh.f32 %v1246_v30  ;;  %v1284_v31 = vrot.slane %v1246_v30, %v2299_v27 }
 0xfd6   : > { %1285 = vrot.lane.b32.xlu0 %v1284_v31, %s2132_s17 }
 0xfde   : > { %v2069_v32 = vpop.eup %2068 }
 0xfdf   : > { %1249 = vrot.lane.b32.xlu1 %v2069_v32, %s2129_s22 }
 0xfe2   : > { %v1263_v33 = vpop.permute.xlu0 %1262 }
 0xfe3   : > { %vm1264_vm14 = vcmp.eq.s32.totalorder %v1263_v33, 1 }
0x1048   : > { %v1286_v34 = vpop.permute.xlu0 %1285 }
0x1049   : > { %v1288_v35 = vsel %vm1264_vm14, %v1286_v34, %v1162_v1 }
0x104a   : > { %v1357_v36 = vrot.slane %v1288_v35, %v2299_v27 }
0x104c   : > { %1358 = vrot.lane.b32.xlu0 %v1357_v36, %s2130_s13 }
0x1051   : > { %v1250_v38 = vpop.permute.xlu1 %1249 }
0x1052   : > { %v1252_v40 = vmul.f32 %v2067_v22, %v1250_v38 }
0x1054   : > { %v1272_v41 = vrot.slane %v1252_v40, %v2299_v27 }
0x1056   : > { %1273 = vrot.lane.b32.xlu1 %v1272_v41, %s2130_s13 }
0x10be   : > { %v1359_v62 = vpop.permute.xlu0 %1358 }
0x10c8   : > { %v1274_v42 = vpop.permute.xlu1 %1273 }
0x10c9   : > { %v1276_v43 = vsel %vm1264_vm14, %v1274_v42, %v1150_v7  ;;  %v1289_v44 = vsel %vm1264_vm14, %v1274_v42, 0.0 }
0x10ca   : > { %1292 = vst.msk [vmem:[%s1291_s18] sm:$0x3] %vm504_vm0, %v1289_v44  ;;  %v1298_v45 = vpack.c.bf16 %v1276_v43, %v1276_v43 }
0x10cc   : > { %1959 = vmatmul.mubr.msk.bf16.vlgmr.msra.gmra.mrb[12].mxu0 %vm545_vm2, %v1298_v45 }
0x119f   : > { %v1336_v48 = vpop.f32.mrb[12].mxu0 }
0x11a0   : > { %v1342_v49 = vadd.f32 %v1336_v48, %v1297_v47  ;;  %v1960_v50 = vpop.f32.mrb[13].mxu0 }
0x11a1   : > { %v1339_v51 = vpop.f32.mrb[14].mxu0 }
0x11a2   : > { %2070 = vtanh.f32 %v1342_v49  ;;  %v1961_v52 = vpop.f32.mrb[15].mxu0  ;;  %v1871_v54 = vmul.f32 -1.442695, %v1342_v49 }
0x11a4   : > { %2072 = vpow2.f32 %v1871_v54 }
0x11ac   : > { %v2071_v53 = vpop.eup %2070 }
0x11ad   : > { %1363 = vrot.lane.b32.xlu1 %v2071_v53, %s2129_s22 }
0x11ae   : > { %v2073_v55 = vpop.eup %2072 }
0x11af   : > { %v1346_v56 = vadd.f32 1.0, %v2073_v55 }
0x11b1   : > { %2074 = vrcp.f32 %v1346_v56 }
0x11bb   : > { %v2075_v58 = vpop.eup %2074 }
0x11bc   : > { %v1361_v63 = vmul.f32 %v2075_v58, %v1359_v62 }
0x121f   : > { %v1364_v59 = vpop.permute.xlu1 %1363 }
0x1220   : > { %v1366_v60 = vmul.f32 %v2075_v58, %v1364_v59 }
0x1222   : > { %1368 = vrot.lane.b32.xlu1 %v1366_v60, %s2130_s13 }
0x1226   : > { %1387 = vperm.xlu1 %2019, %v1385_v61  }
0x1294   : > { %v1369_v0 = vpop.permute.xlu1 %1368 }
0x1295   : > { %v1371_v1 = vadd.f32 %v1369_v0, %v1361_v63 }
0x1297   : > { %2076 = vtanh.f32 %v1371_v1  ;;  %v1409_v2 = vrot.slane %v1371_v1, %v2299_v27 }
0x1299   : > { %1410 = vrot.lane.b32.xlu1 %v1409_v2, %s2132_s17 }
0x12a1   : > { %v2077_v3 = vpop.eup %2076 }
0x12a2   : > { %1374 = vrot.lane.b32.xlu0 %v2077_v3, %s2129_s22 }
0x12a5   : > { %v1388_v4 = vpop.permute.xlu1 %1387 }
0x12a6   : > { %vm1389_vm1 = vcmp.eq.s32.totalorder %v1388_v4, 1 }
0x130b   : > { %v1411_v5 = vpop.permute.xlu1 %1410 }
0x130c   : > { %v1413_v6 = vsel %vm1389_vm1, %v1411_v5, %v1288_v35 }
0x130d   : > { %v1481_v7 = vrot.slane %v1413_v6, %v2299_v27 }
0x130f   : > { %1482 = vrot.lane.b32.xlu1 %v1481_v7, %s2130_s13 }
0x1314   : > { %v1375_v8 = vpop.permute.xlu0 %1374 }
0x1315   : > { %v1377_v9 = vmul.f32 %v2075_v58, %v1375_v8 }
0x1317   : > { %v1397_v13 = vrot.slane %v1377_v9, %v2299_v27 }
0x1319   : > { %1398 = vrot.lane.b32.xlu0 %v1397_v13, %s2130_s13 }
0x1381   : > { %v1483_v32 = vpop.permute.xlu1 %1482 }
0x138b   : > { %v1399_v14 = vpop.permute.xlu0 %1398 }
0x138c   : > { %v1401_v15 = vsel %vm1389_vm1, %v1399_v14, %v1276_v43  ;;  %v1414_v16 = vsel %vm1389_vm1, %v1399_v14, 0.0 }
0x138d   : > { %1417 = vst.msk [vmem:[%s1416_s12] sm:$0x3] %vm504_vm0, %v1414_v16  ;;  %v1422_v17 = vpack.c.bf16 %v1401_v15, %v1401_v15 }
0x138f   : > { %1967 = vmatmul.mubr.msk.bf16.vlgmr.msra.gmra.mrb[12].mxu1 %vm545_vm2, %v1422_v17  ;;  %vm1508_vm2 = vcmp.lt.s32.totalorder %v1507_v26, %v2308_v37 }
0x1390   : > { %v1509_v31 = vsel %vm1508_vm2, 1, %v2131_v39 }
0x1462   : > { %v1460_v19 = vpop.f32.mrb[12].mxu1 }
0x1463   : > { %v1466_v11 = vadd.f32 %v1460_v19, %v1421_v18  ;;  %v1968_v12 = vpop.f32.mrb[13].mxu1 }
0x1464   : > { %v1463_v20 = vpop.f32.mrb[14].mxu1 }
0x1465   : > { %2078 = vtanh.f32 %v1466_v11  ;;  %v1969_v21 = vpop.f32.mrb[15].mxu1  ;;  %v1874_v23 = vmul.f32 -1.442695, %v1466_v11 }
0x1467   : > { %2080 = vpow2.f32 %v1874_v23 }
0x146f   : > { %v2079_v22 = vpop.eup %2078 }
0x1470   : > { %1487 = vrot.lane.b32.xlu0 %v2079_v22, %s2129_s22 }
0x1471   : > { %v2081_v24 = vpop.eup %2080 }
0x1472   : > { %v1470_v25 = vadd.f32 1.0, %v2081_v24 }
0x1474   : > { %2082 = vrcp.f32 %v1470_v25 }
0x147e   : > { %v2083_v28 = vpop.eup %2082 }
0x147f   : > { %v1485_v33 = vmul.f32 %v2083_v28, %v1483_v32 }
0x14e2   : > { %v1488_v29 = vpop.permute.xlu0 %1487 }
0x14e3   : > { %v1490_v30 = vmul.f32 %v2083_v28, %v1488_v29 }
0x14e5   : > { %1492 = vrot.lane.b32.xlu0 %v1490_v30, %s2130_s13 }
0x14e9   : > { %1511 = vperm.xlu0 %2018, %v1509_v31  }
0x1557   : > { %v1493_v34 = vpop.permute.xlu0 %1492 }
0x1558   : > { %v1495_v35 = vadd.f32 %v1493_v34, %v1485_v33 }
0x155a   : > { %2084 = vtanh.f32 %v1495_v35  ;;  %v1533_v36 = vrot.slane %v1495_v35, %v2299_v27 }
0x155c   : > { %1534 = vrot.lane.b32.xlu0 %v1533_v36, %s2132_s17 }
0x1564   : > { %v2085_v38 = vpop.eup %2084 }
0x1565   : > { %1498 = vrot.lane.b32.xlu1 %v2085_v38, %s2129_s22 }
0x1568   : > { %v1512_v37 = vpop.permute.xlu0 %1511 }
0x1569   : > { %vm1513_vm3 = vcmp.eq.s32.totalorder %v1512_v37, 1 }
0x15ce   : > { %v1535_v40 = vpop.permute.xlu0 %1534 }
0x15cf   : > { %v1537_v41 = vsel %vm1513_vm3, %v1535_v40, %v1413_v6 }
0x15d0   : > { %1543 = vst.msk [vmem:[#allocation3] sm:$0x3] %vm504_vm0, %v1537_v41 }
0x15d7   : > { %v1499_v39 = vpop.permute.xlu1 %1498 }
0x15d8   : > { %v1501_v42 = vmul.f32 %v2083_v28, %v1499_v39 }
0x15da   : > { %v1521_v43 = vrot.slane %v1501_v42, %v2299_v27 }
0x15dc   : > { %1522 = vrot.lane.b32.xlu1 %v1521_v43, %s2130_s13 }
0x164e   : > { %v1523_v44 = vpop.permute.xlu1 %1522 }
0x164f   : > { %v1525_v45 = vsel %vm1513_vm3, %v1523_v44, %v1401_v15  ;;  %v1538_v46 = vsel %vm1513_vm3, %v1523_v44, 0.0 }
0x1650   : > { %1541 = vst.msk [vmem:[%s1540_s0] sm:$0x3] %vm504_vm0, %v1538_v46  ;;  %1542 = vst.msk [vmem:[#allocation2] sm:$0x3] %vm504_vm0, %v1525_v45 }
0x1651 PF: > { %p1877_p11 = scmp.gt.s32.totalorder %s2232_s24, 0 }
0x1652   : > { %v2133_v47 = vmov (!%p1877_p11), 0.0  }
0x1653   : > { %1547 = sbr.rel (%p1877_p11) target bundleno = 5722 (0x165a), region = 93  ;;  %1549 = vst.msk [vmem:[%s2247_s19] sm:$0x3] (!%p1877_p11), %vm504_vm0, %v2133_v47  ;;  %1550 = vst.msk [vmem:[%s2247_s19 + $0x2] sm:$0x3] (!%p1877_p11), %vm504_vm0, %v2133_v47 }
0x1654   : > { %1551 = vst.msk [vmem:[%s2247_s19 + $0x4] sm:$0x3] (!%p1877_p11), %vm504_vm0, %v2133_v47  ;;  %1552 = vst.msk [vmem:[%s2247_s19 + $0x6] sm:$0x3] (!%p1877_p11), %vm504_vm0, %v2133_v47 }
0x1655   : > { %1553 = vst.msk [vmem:[%s2247_s19 + $0x8] sm:$0x3] (!%p1877_p11), %vm504_vm0, %v2133_v47  ;;  %1554 = vst.msk [vmem:[%s2247_s19 + $0xa] sm:$0x3] (!%p1877_p11), %vm504_vm0, %v2133_v47 }
0x1656   : > { %1555 = vst.msk [vmem:[%s2247_s19 + $0xc] sm:$0x3] (!%p1877_p11), %vm504_vm0, %v2133_v47  ;;  %1556 = vst.msk [vmem:[%s2247_s19 + $0xe] sm:$0x3] (!%p1877_p11), %vm504_vm0, %v2133_v47 }
0x165a PF: > { %v1560_v27 = vld [vmem:[#allocation2] sm:$0x3]  ;;  %v1563_v48 = vld [vmem:[#allocation3] sm:$0x3] }
0x165b   : > { %1562 = vst.msk [vmem:[%s493_s25] sm:$0x3] %vm504_vm0, %v1560_v27  ;;  %1564 = vst.msk [vmem:[%s497_s10] sm:$0x3] %vm504_vm0, %v1563_v48 }
0x165c PF: > { %s20_s11 = sadd.s32 1, %s2124_s11   ;;  %s2568_s9 = sld [smem:[#allocation7_spill]] }
0x165d   : > { %p17_p12 = scmp.ge.s32.totalorder %s20_s11, 4   ;;  %s2569_s10 = sld [smem:[#allocation8_spill]] }
0x165e   : > { %s2570_s29 = smov %s2112_s30  ;;  %s2571_s30 = smov %s2217_s14 }
0x165f   :  { %19 = sbr.rel (!%p17_p12) target bundleno = 6 (0x6), region = 181 }

</bundles_post_ra>
